<compile_context>
chip_gen: v5e
topology: v5e:2x2
jax: 0.10.0
libtpu: 0.0.40
codegen_flags: <defaults>
</compile_context>

<pallas_src>
import jax
import jax.numpy as jnp
from jax import lax
from jax.experimental import pallas as pl
from jax.experimental.pallas import tpu as pltpu

CDT = jnp.bfloat16          # dtype streamed through the MXU (f32 accumulate)
LANE = 128
SUBLANE = 8
RECURRENCE_UNROLL = 8       # tunable bounded unroll of the serial recurrence


def _round_up(n, m):
    return ((n + m - 1) // m) * m


def _sigmoid(x):
    # sigmoid(x) == 0.5 * tanh(0.5 * x) + 0.5 : single EUP op, no exact divide.
    return 0.5 * jnp.tanh(0.5 * x) + 0.5


# ---------------------------------------------------------------------------
# Fused kernel: all GRU layers + fc1 + ReLU + regressor in one pallas_call.
# ---------------------------------------------------------------------------

def make_gru_model_kernel(num_layers, seq_len, bc, hp, unroll):
    """Kernel ref order:
         x_ref,
         layer 0:   [wih(bias folded), whh, bhn]
         layer >0:  [wih, whh, bgi, bhn]
         w1, b1, w2, b2,
         out_ref,
         gi_scratch, seq_scratch
    """
    def kernel(*refs):
        it = iter(refs)
        x_ref = next(it)
        layers = []
        for l in range(num_layers):
            if l == 0:
                layers.append((next(it), next(it), None, next(it)))
            else:
                layers.append((next(it), next(it), next(it), next(it)))
        w1_ref, b1_ref, w2_ref, b2_ref = next(it), next(it), next(it), next(it)
        out_ref = next(it)
        gi_ref = next(it)
        seq_ref = next(it)

        h = None
        for l, (wih_ref, whh_ref, bgi_ref, bhn_ref) in enumerate(layers):
            # ---- Phase 1: batched input-to-hidden matmul over ALL timesteps ----
            # bf16 MXU, f32 accumulate.  Layer 0's combined [b_ir+b_hr|b_iz+b_hz|b_in]
            # bias is folded into the matmul via the ones-lane of x (no VPU add pass).
            if l == 0:
                xin = x_ref[0]                                       # (T*Bc, Dp) bf16
                gi_ref[...] = jnp.dot(xin, wih_ref[...],
                                      preferred_element_type=jnp.float32)
            else:
                xin = seq_ref[...].astype(CDT)                       # (T*Bc, Hp) bf16
                gi_ref[...] = (jnp.dot(xin, wih_ref[...],
                                       preferred_element_type=jnp.float32)
                               + bgi_ref[...])

            # ---- Phase 2: serial recurrence (h @ W_hh + gate math per step) ----
            whh = whh_ref[...]                                       # (Hp, 3*Hp) bf16
            bhn_b = jnp.broadcast_to(bhn_ref[...], (bc, hp))         # hoisted broadcast
            store_seq = l < num_layers - 1                           # next layer's input

            def step(t, h_prev):
                row = pl.multiple_of(t * bc, bc)
                gi_t = gi_ref[pl.ds(row, bc), :]                     # (Bc, 3*Hp) f32
                gh = jnp.dot(h_prev.astype(CDT), whh,
                             preferred_element_type=jnp.float32)
                r = _sigmoid(gi_t[:, 0:hp] + gh[:, 0:hp])
                z = _sigmoid(gi_t[:, hp:2 * hp] + gh[:, hp:2 * hp])
                n = jnp.tanh(gi_t[:, 2 * hp:3 * hp]
                             + r * (gh[:, 2 * hp:3 * hp] + bhn_b))
                h_new = n + z * (h_prev - n)                         # == (1-z)*n + z*h
                if store_seq:
                    seq_ref[pl.ds(row, bc), :] = h_new
                return h_new

            h = lax.fori_loop(0, seq_len, step,
                              jnp.zeros((bc, hp), jnp.float32),      # PyTorch h0 = 0
                              unroll=unroll)

        # ---- Fused head on the final hidden state: fc1 -> ReLU -> regressor ----
        l1 = jnp.dot(h, w1_ref[...], preferred_element_type=jnp.float32) + b1_ref[...]
        l1 = jnp.maximum(l1, 0.0)
        out = jnp.dot(l1, w2_ref[...], preferred_element_type=jnp.float32) + b2_ref[...]
        out_ref[0] = out

    return kernel


# ---------------------------------------------------------------------------
# Wrapper: pad/cast operands (layout plumbing) and invoke the fused kernel.
# ---------------------------------------------------------------------------

def _pad2(a, rows, cols):
    return jnp.pad(a, ((0, rows - a.shape[0]), (0, cols - a.shape[1])))


def _pad_gate_cols(w, h, hp):
    """(rows, 3*h) -> (rows, 3*hp): gate g placed at lane-aligned block [g*hp, g*hp+h)."""
    return jnp.concatenate(
        [jnp.pad(w[:, g * h:(g + 1) * h], ((0, 0), (0, hp - h))) for g in range(3)],
        axis=1)


@jax.jit
def gru_model_forward(x_btd, params):
    """Full forward pass: (B, T, D) -> (B, 1)."""
    B, T, D = x_btd.shape
    H = params["gru_layers"][0][1].shape[0]          # whh is (H, 3H)
    L = len(params["gru_layers"])
    F1 = params["fc1_w"].shape[1]                    # 2*H

    Bc = SUBLANE                                     # batch rows per grid chunk
    Bp = _round_up(max(B, Bc), Bc)
    NC = Bp // Bc                                    # number of batch chunks (grid)
    Dp = _round_up(D + 1, LANE)                      # +1: ones-lane for folded l0 bias
    Hp = _round_up(H, LANE)
    F1p = _round_up(F1, LANE)
    OUTP = LANE                                      # lane-dense output; column 0 real

    # ---- input: (B,T,D) -> chunked (NC, T*Bc, Dp) bf16, bias lane D set to 1 ----
    xt = jnp.transpose(x_btd, (1, 0, 2))                             # (T, B, D)
    xt = jnp.pad(xt, ((0, 0), (0, Bp - B), (0, Dp - D)))             # (T, Bp, Dp)
    xt = xt.at[:, :, D].set(1.0)                                     # ones-lane
    x_p = (xt.reshape(T, NC, Bc, Dp).transpose(1, 0, 2, 3)
             .reshape(NC, T * Bc, Dp).astype(CDT))

    operands = [x_p]
    in_specs = [pl.BlockSpec((1, T * Bc, Dp), lambda c: (c, 0, 0))]

    def full_spec(a):
        return pl.BlockSpec(a.shape, lambda c, _nd=a.ndim: (0,) * _nd)

    for li, (wih, whh, bih, bhh) in enumerate(params["gru_layers"]):
        bgi = jnp.concatenate([bih[:, 0:H] + bhh[:, 0:H],
                               bih[:, H:2 * H] + bhh[:, H:2 * H],
                               bih[:, 2 * H:3 * H]], axis=1)          # (1, 3H)
        bhn = jnp.pad(bhh[:, 2 * H:3 * H], ((0, 0), (0, Hp - H)))     # (1, Hp) f32
        whh_p = _pad2(_pad_gate_cols(whh, H, Hp), Hp, 3 * Hp).astype(CDT)
        if li == 0:
            # fold the combined bias into W_ih row D (multiplied by the ones-lane)
            wih_aug = jnp.concatenate([wih, bgi], axis=0)             # (D+1, 3H)
            wih_p = _pad2(_pad_gate_cols(wih_aug, H, Hp), Dp, 3 * Hp).astype(CDT)
            layer_ops = [wih_p, whh_p, bhn]
        else:
            wih_p = _pad2(_pad_gate_cols(wih, H, Hp), Hp, 3 * Hp).astype(CDT)
            bgi_p = _pad_gate_cols(bgi, H, Hp)                        # (1, 3Hp) f32
            layer_ops = [wih_p, whh_p, bgi_p, bhn]
        operands += layer_ops
        in_specs += [full_spec(a) for a in layer_ops]

    head_ops = [
        _pad2(params["fc1_w"], Hp, F1p),
        _pad2(params["fc1_b"], 1, F1p),
        _pad2(params["reg_w"], F1p, OUTP),
        _pad2(params["reg_b"], 1, OUTP),
    ]
    operands += head_ops
    in_specs += [full_spec(a) for a in head_ops]

    kernel = make_gru_model_kernel(L, T, Bc, Hp, unroll=min(RECURRENCE_UNROLL, T))

    # VMEM budget: double-buffered operands/output + scratch + headroom, clamped
    # to the chip's physical VMEM (v7x only has 64 MiB per TensorCore).
    scratch_bytes = (T * Bc * 3 * Hp + T * Bc * Hp) * 4
    op_bytes = sum(int(a.size) * a.dtype.itemsize for a in operands)
    out_bytes = Bc * OUTP * 4
    vmem_need = 2 * op_bytes + 2 * out_bytes + scratch_bytes + (4 << 20)
    try:
        vmem_cap = int(pltpu.get_tpu_info().vmem_capacity_bytes)
    except Exception:
        vmem_cap = 64 << 20
    vmem_limit = int(min(max(vmem_need, 32 << 20), int(vmem_cap * 0.9)))

    out_p = pl.pallas_call(
        kernel,
        out_shape=jax.ShapeDtypeStruct((NC, Bc, OUTP), jnp.float32),
        grid_spec=pltpu.PrefetchScalarGridSpec(
            num_scalar_prefetch=0,
            grid=(NC,),
            in_specs=in_specs,
            out_specs=pl.BlockSpec((1, Bc, OUTP), lambda c: (c, 0, 0)),
            scratch_shapes=[
                pltpu.VMEM((T * Bc, 3 * Hp), jnp.float32),   # GI for all timesteps
                pltpu.VMEM((T * Bc, Hp), jnp.float32),       # inter-layer hidden seq
            ]),
        compiler_params=pltpu.CompilerParams(
            dimension_semantics=("parallel",),               # batch chunks (2 TCs on v7x)
            vmem_limit_bytes=vmem_limit),
    )(*operands)

    return out_p.reshape(NC * Bc, OUTP)[:B, :1]


# ---------------------------------------------------------------------------
# Deterministic parameter init (mirrors the PyTorch module's shapes)
# ---------------------------------------------------------------------------

def init_params(key, input_dim, hidden_dim, layer_dim):
    params = {"gru_layers": []}
    H = hidden_dim
    bound = 1.0 / jnp.sqrt(jnp.float32(H))
    for layer in range(layer_dim):
        d_in = input_dim if layer == 0 else H
        key, k1, k2, k3, k4 = jax.random.split(key, 5)
        # stored transposed vs. PyTorch: (in, 3H) and (H, 3H); gate order [r,z,n]
        wih = jax.random.uniform(k1, (d_in, 3 * H), jnp.float32, -bound, bound)
        whh = jax.random.uniform(k2, (H, 3 * H), jnp.float32, -bound, bound)
        bih = jax.random.uniform(k3, (1, 3 * H), jnp.float32, -bound, bound)
        bhh = jax.random.uniform(k4, (1, 3 * H), jnp.float32, -bound, bound)
        params["gru_layers"].append((wih, whh, bih, bhh))
    key, k1, k2, k3, k4 = jax.random.split(key, 5)
    b1 = 1.0 / jnp.sqrt(jnp.float32(H))
    params["fc1_w"] = jax.random.uniform(k1, (H, 2 * H), jnp.float32, -b1, b1)
    params["fc1_b"] = jax.random.uniform(k2, (1, 2 * H), jnp.float32, -b1, b1)
    b2 = 1.0 / jnp.sqrt(jnp.float32(2 * H))
    params["reg_w"] = jax.random.uniform(k3, (2 * H, 1), jnp.float32, -b2, b2)
    params["reg_b"] = jax.random.uniform(k4, (1, 1), jnp.float32, -b2, b2)
    return params


# ---------------------------------------------------------------------------
# Pure-JAX references: f32 (PyTorch semantics) and one mirroring the kernel's
# bf16 casts / folded layer-0 bias for a tight implementation check.
# ---------------------------------------------------------------------------

def reference_forward(x_btd, params, mirror_kernel_casts=False):
    def cast(a):
        return a.astype(CDT) if mirror_kernel_casts else a

    x = jnp.transpose(x_btd, (1, 0, 2))              # (T, B, D)
    for li, (wih, whh, bih, bhh) in enumerate(params["gru_layers"]):
        Tn, Bn, _ = x.shape
        H = whh.shape[0]
        bgi = jnp.concatenate([bih[:, 0:H] + bhh[:, 0:H],
                               bih[:, H:2 * H] + bhh[:, H:2 * H],
                               bih[:, 2 * H:3 * H]], axis=1)
        if mirror_kernel_casts and li == 0:
            bgi = bgi.astype(CDT).astype(jnp.float32)   # folded through bf16 W_ih row
        bhn = bhh[:, 2 * H:3 * H]
        wih_c, whh_c = cast(wih), cast(whh)
        h = jnp.zeros((Bn, H), jnp.float32)
        outs = []
        for t in range(Tn):
            gi = jnp.dot(cast(x[t]), wih_c, preferred_element_type=jnp.float32) + bgi
            gh = jnp.dot(cast(h), whh_c, preferred_element_type=jnp.float32)
            r = jax.nn.sigmoid(gi[:, :H] + gh[:, :H])
            z = jax.nn.sigmoid(gi[:, H:2 * H] + gh[:, H:2 * H])
            n = jnp.tanh(gi[:, 2 * H:] + r * (gh[:, 2 * H:] + bhn))
            h = n + z * (h - n)
            outs.append(h)
        x = jnp.stack(outs, axis=0)
    h_last = x[-1]
    l1 = jnp.maximum(h_last @ params["fc1_w"] + params["fc1_b"], 0.0)
    return l1 @ params["reg_w"] + params["reg_b"]


# ---------------------------------------------------------------------------

if __name__ == "__main__":
    # Small, module-consistent shapes: batch=2, seq=8, input_dim=16,
    # hidden_dim=32, layer_dim=2, dropout_prob=0.0, activation='relu'.
    B, T, D, H, L = 2, 8, 16, 32, 2

    key = jax.random.PRNGKey(0)
    key, xk = jax.random.split(key)
    x = jax.random.normal(xk, (B, T, D), jnp.float32)

    params = init_params(key, input_dim=D, hidden_dim=H, layer_dim=L)

    out = jax.block_until_ready(gru_model_forward(x, params))
    assert out.shape == (B, 1), out.shape

    ref_mirror = reference_forward(x, params, mirror_kernel_casts=True)
    ref_f32 = reference_forward(x, params, mirror_kernel_casts=False)
    # Tight check against a reference mirroring the kernel's bf16 casts ...
    assert jnp.allclose(out, ref_mirror, atol=1e-3, rtol=1e-3), (out, ref_mirror)
    # ... and a loose sanity check against the pure-f32 (PyTorch-semantics) path,
    # since the bf16 W_hh / h casts compound over the recurrence.
    assert jnp.allclose(out, ref_f32, atol=5e-2, rtol=0.0), (out, ref_f32)

    print("KERNEL_OK")
</pallas_src>

<mosaic_0001>
module attributes {stable_mosaic.version = 11 : i64} {
  func.func @kernel(%arg0: i32, %arg1: memref<1x64x128xbf16, #tpu.memory_space<vmem>>, %arg2: memref<128x384xbf16, #tpu.memory_space<vmem>>, %arg3: memref<128x384xbf16, #tpu.memory_space<vmem>>, %arg4: memref<1x128xf32, #tpu.memory_space<vmem>>, %arg5: memref<128x384xbf16, #tpu.memory_space<vmem>>, %arg6: memref<128x384xbf16, #tpu.memory_space<vmem>>, %arg7: memref<1x384xf32, #tpu.memory_space<vmem>>, %arg8: memref<1x128xf32, #tpu.memory_space<vmem>>, %arg9: memref<128x128xf32, #tpu.memory_space<vmem>>, %arg10: memref<1x128xf32, #tpu.memory_space<vmem>>, %arg11: memref<128x128xf32, #tpu.memory_space<vmem>>, %arg12: memref<1x128xf32, #tpu.memory_space<vmem>>, %arg13: memref<1x8x128xf32, #tpu.memory_space<vmem>>, %arg14: memref<64x384xf32, #tpu.memory_space<vmem>>, %arg15: memref<64x128xf32, #tpu.memory_space<vmem>>) attributes {dimension_semantics = [#tpu.dimension_semantics<parallel>], iteration_bounds = array<i64: 1>, scalar_prefetch = 0 : i64, scratch_operands = 2 : i64, tpu.core_type = #tpu.core_type<tc>, window_params = [{transform_indices = @transform_0, window_bounds = array<i64: 1, 64, 128>}, {pipeline_mode = #tpu.pipeline_mode<synchronous>, transform_indices = @transform_1, window_bounds = array<i64: 128, 384>}, {pipeline_mode = #tpu.pipeline_mode<synchronous>, transform_indices = @transform_2, window_bounds = array<i64: 128, 384>}, {pipeline_mode = #tpu.pipeline_mode<synchronous>, transform_indices = @transform_3, window_bounds = array<i64: 1, 128>}, {pipeline_mode = #tpu.pipeline_mode<synchronous>, transform_indices = @transform_4, window_bounds = array<i64: 128, 384>}, {pipeline_mode = #tpu.pipeline_mode<synchronous>, transform_indices = @transform_5, window_bounds = array<i64: 128, 384>}, {pipeline_mode = #tpu.pipeline_mode<synchronous>, transform_indices = @transform_6, window_bounds = array<i64: 1, 384>}, {pipeline_mode = #tpu.pipeline_mode<synchronous>, transform_indices = @transform_7, window_bounds = array<i64: 1, 128>}, {pipeline_mode = #tpu.pipeline_mode<synchronous>, transform_indices = @transform_8, window_bounds = array<i64: 128, 128>}, {pipeline_mode = #tpu.pipeline_mode<synchronous>, transform_indices = @transform_9, window_bounds = array<i64: 1, 128>}, {pipeline_mode = #tpu.pipeline_mode<synchronous>, transform_indices = @transform_10, window_bounds = array<i64: 128, 128>}, {pipeline_mode = #tpu.pipeline_mode<synchronous>, transform_indices = @transform_11, window_bounds = array<i64: 1, 128>}, {transform_indices = @transform_12, window_bounds = array<i64: 1, 8, 128>}]} {
    %c0 = arith.constant 0 : index
    %c0_0 = arith.constant 0 : index
    %c0_1 = arith.constant 0 : index
    %0 = vector.load %arg1[%c0, %c0_0, %c0_1] : memref<1x64x128xbf16, #tpu.memory_space<vmem>>, vector<1x64x128xbf16>
    %1 = vector.shape_cast %0 : vector<1x64x128xbf16> to vector<64x128xbf16>
    %c0_2 = arith.constant 0 : index
    %c0_3 = arith.constant 0 : index
    %2 = vector.load %arg2[%c0_2, %c0_3] : memref<128x384xbf16, #tpu.memory_space<vmem>>, vector<128x384xbf16>
    %cst = arith.constant dense<0.000000e+00> : vector<64x384xf32>
    %3 = tpu.matmul %1, %2, %cst {dimension_numbers = #tpu.dot_dimension_numbers<[1], [0], [0], [1], [0, 0, 1, 1], [], []>} : vector<64x128xbf16>, vector<128x384xbf16>, vector<64x384xf32> -> vector<64x384xf32>
    %c0_4 = arith.constant 0 : index
    %c0_5 = arith.constant 0 : index
    %4 = vector.load %arg14[%c0_4, %c0_5] : memref<64x384xf32, #tpu.memory_space<vmem>>, vector<64x384xf32>
    tpu.vector_store %arg14[%c0_4, %c0_5], %3 {strides = array<i32>} : memref<64x384xf32, #tpu.memory_space<vmem>>, vector<64x384xf32>,
    %c0_6 = arith.constant 0 : index
    %c0_7 = arith.constant 0 : index
    %5 = vector.load %arg3[%c0_6, %c0_7] : memref<128x384xbf16, #tpu.memory_space<vmem>>, vector<128x384xbf16>
    %c0_8 = arith.constant 0 : index
    %c0_9 = arith.constant 0 : index
    %6 = vector.load %arg4[%c0_8, %c0_9] : memref<1x128xf32, #tpu.memory_space<vmem>>, vector<1x128xf32>
    %7 = vector.shape_cast %6 : vector<1x128xf32> to vector<1x128xf32>
    %8 = vector.broadcast %7 : vector<1x128xf32> to vector<8x128xf32>
    %cst_10 = arith.constant 0.000000e+00 : f32
    %9 = vector.broadcast %cst_10 : f32 to vector<8x128xf32>
    %c0_i32 = arith.constant 0 : i32
    %c8_i32 = arith.constant 8 : i32
    %10 = arith.muli %c0_i32, %c8_i32 : i32
    %11 = tpu.assume_multiple %10, 8 : i32
    %12 = arith.index_cast %11 : i32 to index
    %c0_11 = arith.constant 0 : index
    %13 = vector.load %arg14[%12, %c0_11] : memref<64x384xf32, #tpu.memory_space<vmem>>, vector<8x384xf32>
    %14 = arith.truncf %9 : vector<8x128xf32> to vector<8x128xbf16>
    %cst_12 = arith.constant dense<0.000000e+00> : vector<8x384xf32>
    %15 = tpu.matmul %14, %5, %cst_12 {dimension_numbers = #tpu.dot_dimension_numbers<[1], [0], [0], [1], [0, 0, 1, 1], [], []>} : vector<8x128xbf16>, vector<128x384xbf16>, vector<8x384xf32> -> vector<8x384xf32>
    %16 = vector.extract_strided_slice %13 {offsets = [0, 0], sizes = [8, 128], strides = [1, 1]} : vector<8x384xf32> to vector<8x128xf32>
    %17 = vector.extract_strided_slice %15 {offsets = [0, 0], sizes = [8, 128], strides = [1, 1]} : vector<8x384xf32> to vector<8x128xf32>
    %18 = arith.addf %16, %17 : vector<8x128xf32>
    %cst_13 = arith.constant 5.000000e-01 : f32
    %19 = vector.broadcast %cst_13 : f32 to vector<8x128xf32>
    %20 = arith.mulf %19, %18 : vector<8x128xf32>
    %21 = math.tanh %20 : vector<8x128xf32>
    %cst_14 = arith.constant 5.000000e-01 : f32
    %22 = vector.broadcast %cst_14 : f32 to vector<8x128xf32>
    %23 = arith.mulf %22, %21 : vector<8x128xf32>
    %cst_15 = arith.constant 5.000000e-01 : f32
    %24 = vector.broadcast %cst_15 : f32 to vector<8x128xf32>
    %25 = arith.addf %23, %24 : vector<8x128xf32>
    %26 = vector.extract_strided_slice %13 {offsets = [0, 128], sizes = [8, 128], strides = [1, 1]} : vector<8x384xf32> to vector<8x128xf32>
    %27 = vector.extract_strided_slice %15 {offsets = [0, 128], sizes = [8, 128], strides = [1, 1]} : vector<8x384xf32> to vector<8x128xf32>
    %28 = arith.addf %26, %27 : vector<8x128xf32>
    %cst_16 = arith.constant 5.000000e-01 : f32
    %29 = vector.broadcast %cst_16 : f32 to vector<8x128xf32>
    %30 = arith.mulf %29, %28 : vector<8x128xf32>
    %31 = math.tanh %30 : vector<8x128xf32>
    %cst_17 = arith.constant 5.000000e-01 : f32
    %32 = vector.broadcast %cst_17 : f32 to vector<8x128xf32>
    %33 = arith.mulf %32, %31 : vector<8x128xf32>
    %cst_18 = arith.constant 5.000000e-01 : f32
    %34 = vector.broadcast %cst_18 : f32 to vector<8x128xf32>
    %35 = arith.addf %33, %34 : vector<8x128xf32>
    %36 = vector.extract_strided_slice %13 {offsets = [0, 256], sizes = [8, 128], strides = [1, 1]} : vector<8x384xf32> to vector<8x128xf32>
    %37 = vector.extract_strided_slice %15 {offsets = [0, 256], sizes = [8, 128], strides = [1, 1]} : vector<8x384xf32> to vector<8x128xf32>
    %38 = arith.addf %37, %8 : vector<8x128xf32>
    %39 = arith.mulf %25, %38 : vector<8x128xf32>
    %40 = arith.addf %36, %39 : vector<8x128xf32>
    %41 = math.tanh %40 : vector<8x128xf32>
    %42 = arith.subf %9, %41 : vector<8x128xf32>
    %43 = arith.mulf %35, %42 : vector<8x128xf32>
    %44 = arith.addf %41, %43 : vector<8x128xf32>
    %45 = arith.index_cast %11 : i32 to index
    %c0_19 = arith.constant 0 : index
    %46 = vector.load %arg15[%45, %c0_19] : memref<64x128xf32, #tpu.memory_space<vmem>>, vector<8x128xf32>
    tpu.vector_store %arg15[%45, %c0_19], %44 {strides = array<i32>} : memref<64x128xf32, #tpu.memory_space<vmem>>, vector<8x128xf32>,
    %c1_i32 = arith.constant 1 : i32
    %c8_i32_20 = arith.constant 8 : i32
    %47 = arith.muli %c1_i32, %c8_i32_20 : i32
    %48 = tpu.assume_multiple %47, 8 : i32
    %49 = arith.index_cast %48 : i32 to index
    %c0_21 = arith.constant 0 : index
    %50 = vector.load %arg14[%49, %c0_21] : memref<64x384xf32, #tpu.memory_space<vmem>>, vector<8x384xf32>
    %51 = arith.truncf %44 : vector<8x128xf32> to vector<8x128xbf16>
    %cst_22 = arith.constant dense<0.000000e+00> : vector<8x384xf32>
    %52 = tpu.matmul %51, %5, %cst_22 {dimension_numbers = #tpu.dot_dimension_numbers<[1], [0], [0], [1], [0, 0, 1, 1], [], []>} : vector<8x128xbf16>, vector<128x384xbf16>, vector<8x384xf32> -> vector<8x384xf32>
    %53 = vector.extract_strided_slice %50 {offsets = [0, 0], sizes = [8, 128], strides = [1, 1]} : vector<8x384xf32> to vector<8x128xf32>
    %54 = vector.extract_strided_slice %52 {offsets = [0, 0], sizes = [8, 128], strides = [1, 1]} : vector<8x384xf32> to vector<8x128xf32>
    %55 = arith.addf %53, %54 : vector<8x128xf32>
    %cst_23 = arith.constant 5.000000e-01 : f32
    %56 = vector.broadcast %cst_23 : f32 to vector<8x128xf32>
    %57 = arith.mulf %56, %55 : vector<8x128xf32>
    %58 = math.tanh %57 : vector<8x128xf32>
    %cst_24 = arith.constant 5.000000e-01 : f32
    %59 = vector.broadcast %cst_24 : f32 to vector<8x128xf32>
    %60 = arith.mulf %59, %58 : vector<8x128xf32>
    %cst_25 = arith.constant 5.000000e-01 : f32
    %61 = vector.broadcast %cst_25 : f32 to vector<8x128xf32>
    %62 = arith.addf %60, %61 : vector<8x128xf32>
    %63 = vector.extract_strided_slice %50 {offsets = [0, 128], sizes = [8, 128], strides = [1, 1]} : vector<8x384xf32> to vector<8x128xf32>
    %64 = vector.extract_strided_slice %52 {offsets = [0, 128], sizes = [8, 128], strides = [1, 1]} : vector<8x384xf32> to vector<8x128xf32>
    %65 = arith.addf %63, %64 : vector<8x128xf32>
    %cst_26 = arith.constant 5.000000e-01 : f32
    %66 = vector.broadcast %cst_26 : f32 to vector<8x128xf32>
    %67 = arith.mulf %66, %65 : vector<8x128xf32>
    %68 = math.tanh %67 : vector<8x128xf32>
    %cst_27 = arith.constant 5.000000e-01 : f32
    %69 = vector.broadcast %cst_27 : f32 to vector<8x128xf32>
    %70 = arith.mulf %69, %68 : vector<8x128xf32>
    %cst_28 = arith.constant 5.000000e-01 : f32
    %71 = vector.broadcast %cst_28 : f32 to vector<8x128xf32>
    %72 = arith.addf %70, %71 : vector<8x128xf32>
    %73 = vector.extract_strided_slice %50 {offsets = [0, 256], sizes = [8, 128], strides = [1, 1]} : vector<8x384xf32> to vector<8x128xf32>
    %74 = vector.extract_strided_slice %52 {offsets = [0, 256], sizes = [8, 128], strides = [1, 1]} : vector<8x384xf32> to vector<8x128xf32>
    %75 = arith.addf %74, %8 : vector<8x128xf32>
    %76 = arith.mulf %62, %75 : vector<8x128xf32>
    %77 = arith.addf %73, %76 : vector<8x128xf32>
    %78 = math.tanh %77 : vector<8x128xf32>
    %79 = arith.subf %44, %78 : vector<8x128xf32>
    %80 = arith.mulf %72, %79 : vector<8x128xf32>
    %81 = arith.addf %78, %80 : vector<8x128xf32>
    %82 = arith.index_cast %48 : i32 to index
    %c0_29 = arith.constant 0 : index
    %83 = vector.load %arg15[%82, %c0_29] : memref<64x128xf32, #tpu.memory_space<vmem>>, vector<8x128xf32>
    tpu.vector_store %arg15[%82, %c0_29], %81 {strides = array<i32>} : memref<64x128xf32, #tpu.memory_space<vmem>>, vector<8x128xf32>,
    %c2_i32 = arith.constant 2 : i32
    %c8_i32_30 = arith.constant 8 : i32
    %84 = arith.muli %c2_i32, %c8_i32_30 : i32
    %85 = tpu.assume_multiple %84, 8 : i32
    %86 = arith.index_cast %85 : i32 to index
    %c0_31 = arith.constant 0 : index
    %87 = vector.load %arg14[%86, %c0_31] : memref<64x384xf32, #tpu.memory_space<vmem>>, vector<8x384xf32>
    %88 = arith.truncf %81 : vector<8x128xf32> to vector<8x128xbf16>
    %cst_32 = arith.constant dense<0.000000e+00> : vector<8x384xf32>
    %89 = tpu.matmul %88, %5, %cst_32 {dimension_numbers = #tpu.dot_dimension_numbers<[1], [0], [0], [1], [0, 0, 1, 1], [], []>} : vector<8x128xbf16>, vector<128x384xbf16>, vector<8x384xf32> -> vector<8x384xf32>
    %90 = vector.extract_strided_slice %87 {offsets = [0, 0], sizes = [8, 128], strides = [1, 1]} : vector<8x384xf32> to vector<8x128xf32>
    %91 = vector.extract_strided_slice %89 {offsets = [0, 0], sizes = [8, 128], strides = [1, 1]} : vector<8x384xf32> to vector<8x128xf32>
    %92 = arith.addf %90, %91 : vector<8x128xf32>
    %cst_33 = arith.constant 5.000000e-01 : f32
    %93 = vector.broadcast %cst_33 : f32 to vector<8x128xf32>
    %94 = arith.mulf %93, %92 : vector<8x128xf32>
    %95 = math.tanh %94 : vector<8x128xf32>
    %cst_34 = arith.constant 5.000000e-01 : f32
    %96 = vector.broadcast %cst_34 : f32 to vector<8x128xf32>
    %97 = arith.mulf %96, %95 : vector<8x128xf32>
    %cst_35 = arith.constant 5.000000e-01 : f32
    %98 = vector.broadcast %cst_35 : f32 to vector<8x128xf32>
    %99 = arith.addf %97, %98 : vector<8x128xf32>
    %100 = vector.extract_strided_slice %87 {offsets = [0, 128], sizes = [8, 128], strides = [1, 1]} : vector<8x384xf32> to vector<8x128xf32>
    %101 = vector.extract_strided_slice %89 {offsets = [0, 128], sizes = [8, 128], strides = [1, 1]} : vector<8x384xf32> to vector<8x128xf32>
    %102 = arith.addf %100, %101 : vector<8x128xf32>
    %cst_36 = arith.constant 5.000000e-01 : f32
    %103 = vector.broadcast %cst_36 : f32 to vector<8x128xf32>
    %104 = arith.mulf %103, %102 : vector<8x128xf32>
    %105 = math.tanh %104 : vector<8x128xf32>
    %cst_37 = arith.constant 5.000000e-01 : f32
    %106 = vector.broadcast %cst_37 : f32 to vector<8x128xf32>
    %107 = arith.mulf %106, %105 : vector<8x128xf32>
    %cst_38 = arith.constant 5.000000e-01 : f32
    %108 = vector.broadcast %cst_38 : f32 to vector<8x128xf32>
    %109 = arith.addf %107, %108 : vector<8x128xf32>
    %110 = vector.extract_strided_slice %87 {offsets = [0, 256], sizes = [8, 128], strides = [1, 1]} : vector<8x384xf32> to vector<8x128xf32>
    %111 = vector.extract_strided_slice %89 {offsets = [0, 256], sizes = [8, 128], strides = [1, 1]} : vector<8x384xf32> to vector<8x128xf32>
    %112 = arith.addf %111, %8 : vector<8x128xf32>
    %113 = arith.mulf %99, %112 : vector<8x128xf32>
    %114 = arith.addf %110, %113 : vector<8x128xf32>
    %115 = math.tanh %114 : vector<8x128xf32>
    %116 = arith.subf %81, %115 : vector<8x128xf32>
    %117 = arith.mulf %109, %116 : vector<8x128xf32>
    %118 = arith.addf %115, %117 : vector<8x128xf32>
    %119 = arith.index_cast %85 : i32 to index
    %c0_39 = arith.constant 0 : index
    %120 = vector.load %arg15[%119, %c0_39] : memref<64x128xf32, #tpu.memory_space<vmem>>, vector<8x128xf32>
    tpu.vector_store %arg15[%119, %c0_39], %118 {strides = array<i32>} : memref<64x128xf32, #tpu.memory_space<vmem>>, vector<8x128xf32>,
    %c3_i32 = arith.constant 3 : i32
    %c8_i32_40 = arith.constant 8 : i32
    %121 = arith.muli %c3_i32, %c8_i32_40 : i32
    %122 = tpu.assume_multiple %121, 8 : i32
    %123 = arith.index_cast %122 : i32 to index
    %c0_41 = arith.constant 0 : index
    %124 = vector.load %arg14[%123, %c0_41] : memref<64x384xf32, #tpu.memory_space<vmem>>, vector<8x384xf32>
    %125 = arith.truncf %118 : vector<8x128xf32> to vector<8x128xbf16>
    %cst_42 = arith.constant dense<0.000000e+00> : vector<8x384xf32>
    %126 = tpu.matmul %125, %5, %cst_42 {dimension_numbers = #tpu.dot_dimension_numbers<[1], [0], [0], [1], [0, 0, 1, 1], [], []>} : vector<8x128xbf16>, vector<128x384xbf16>, vector<8x384xf32> -> vector<8x384xf32>
    %127 = vector.extract_strided_slice %124 {offsets = [0, 0], sizes = [8, 128], strides = [1, 1]} : vector<8x384xf32> to vector<8x128xf32>
    %128 = vector.extract_strided_slice %126 {offsets = [0, 0], sizes = [8, 128], strides = [1, 1]} : vector<8x384xf32> to vector<8x128xf32>
    %129 = arith.addf %127, %128 : vector<8x128xf32>
    %cst_43 = arith.constant 5.000000e-01 : f32
    %130 = vector.broadcast %cst_43 : f32 to vector<8x128xf32>
    %131 = arith.mulf %130, %129 : vector<8x128xf32>
    %132 = math.tanh %131 : vector<8x128xf32>
    %cst_44 = arith.constant 5.000000e-01 : f32
    %133 = vector.broadcast %cst_44 : f32 to vector<8x128xf32>
    %134 = arith.mulf %133, %132 : vector<8x128xf32>
    %cst_45 = arith.constant 5.000000e-01 : f32
    %135 = vector.broadcast %cst_45 : f32 to vector<8x128xf32>
    %136 = arith.addf %134, %135 : vector<8x128xf32>
    %137 = vector.extract_strided_slice %124 {offsets = [0, 128], sizes = [8, 128], strides = [1, 1]} : vector<8x384xf32> to vector<8x128xf32>
    %138 = vector.extract_strided_slice %126 {offsets = [0, 128], sizes = [8, 128], strides = [1, 1]} : vector<8x384xf32> to vector<8x128xf32>
    %139 = arith.addf %137, %138 : vector<8x128xf32>
    %cst_46 = arith.constant 5.000000e-01 : f32
    %140 = vector.broadcast %cst_46 : f32 to vector<8x128xf32>
    %141 = arith.mulf %140, %139 : vector<8x128xf32>
    %142 = math.tanh %141 : vector<8x128xf32>
    %cst_47 = arith.constant 5.000000e-01 : f32
    %143 = vector.broadcast %cst_47 : f32 to vector<8x128xf32>
    %144 = arith.mulf %143, %142 : vector<8x128xf32>
    %cst_48 = arith.constant 5.000000e-01 : f32
    %145 = vector.broadcast %cst_48 : f32 to vector<8x128xf32>
    %146 = arith.addf %144, %145 : vector<8x128xf32>
    %147 = vector.extract_strided_slice %124 {offsets = [0, 256], sizes = [8, 128], strides = [1, 1]} : vector<8x384xf32> to vector<8x128xf32>
    %148 = vector.extract_strided_slice %126 {offsets = [0, 256], sizes = [8, 128], strides = [1, 1]} : vector<8x384xf32> to vector<8x128xf32>
    %149 = arith.addf %148, %8 : vector<8x128xf32>
    %150 = arith.mulf %136, %149 : vector<8x128xf32>
    %151 = arith.addf %147, %150 : vector<8x128xf32>
    %152 = math.tanh %151 : vector<8x128xf32>
    %153 = arith.subf %118, %152 : vector<8x128xf32>
    %154 = arith.mulf %146, %153 : vector<8x128xf32>
    %155 = arith.addf %152, %154 : vector<8x128xf32>
    %156 = arith.index_cast %122 : i32 to index
    %c0_49 = arith.constant 0 : index
    %157 = vector.load %arg15[%156, %c0_49] : memref<64x128xf32, #tpu.memory_space<vmem>>, vector<8x128xf32>
    tpu.vector_store %arg15[%156, %c0_49], %155 {strides = array<i32>} : memref<64x128xf32, #tpu.memory_space<vmem>>, vector<8x128xf32>,
    %c4_i32 = arith.constant 4 : i32
    %c8_i32_50 = arith.constant 8 : i32
    %158 = arith.muli %c4_i32, %c8_i32_50 : i32
    %159 = tpu.assume_multiple %158, 8 : i32
    %160 = arith.index_cast %159 : i32 to index
    %c0_51 = arith.constant 0 : index
    %161 = vector.load %arg14[%160, %c0_51] : memref<64x384xf32, #tpu.memory_space<vmem>>, vector<8x384xf32>
    %162 = arith.truncf %155 : vector<8x128xf32> to vector<8x128xbf16>
    %cst_52 = arith.constant dense<0.000000e+00> : vector<8x384xf32>
    %163 = tpu.matmul %162, %5, %cst_52 {dimension_numbers = #tpu.dot_dimension_numbers<[1], [0], [0], [1], [0, 0, 1, 1], [], []>} : vector<8x128xbf16>, vector<128x384xbf16>, vector<8x384xf32> -> vector<8x384xf32>
    %164 = vector.extract_strided_slice %161 {offsets = [0, 0], sizes = [8, 128], strides = [1, 1]} : vector<8x384xf32> to vector<8x128xf32>
    %165 = vector.extract_strided_slice %163 {offsets = [0, 0], sizes = [8, 128], strides = [1, 1]} : vector<8x384xf32> to vector<8x128xf32>
    %166 = arith.addf %164, %165 : vector<8x128xf32>
    %cst_53 = arith.constant 5.000000e-01 : f32
    %167 = vector.broadcast %cst_53 : f32 to vector<8x128xf32>
    %168 = arith.mulf %167, %166 : vector<8x128xf32>
    %169 = math.tanh %168 : vector<8x128xf32>
    %cst_54 = arith.constant 5.000000e-01 : f32
    %170 = vector.broadcast %cst_54 : f32 to vector<8x128xf32>
    %171 = arith.mulf %170, %169 : vector<8x128xf32>
    %cst_55 = arith.constant 5.000000e-01 : f32
    %172 = vector.broadcast %cst_55 : f32 to vector<8x128xf32>
    %173 = arith.addf %171, %172 : vector<8x128xf32>
    %174 = vector.extract_strided_slice %161 {offsets = [0, 128], sizes = [8, 128], strides = [1, 1]} : vector<8x384xf32> to vector<8x128xf32>
    %175 = vector.extract_strided_slice %163 {offsets = [0, 128], sizes = [8, 128], strides = [1, 1]} : vector<8x384xf32> to vector<8x128xf32>
    %176 = arith.addf %174, %175 : vector<8x128xf32>
    %cst_56 = arith.constant 5.000000e-01 : f32
    %177 = vector.broadcast %cst_56 : f32 to vector<8x128xf32>
    %178 = arith.mulf %177, %176 : vector<8x128xf32>
    %179 = math.tanh %178 : vector<8x128xf32>
    %cst_57 = arith.constant 5.000000e-01 : f32
    %180 = vector.broadcast %cst_57 : f32 to vector<8x128xf32>
    %181 = arith.mulf %180, %179 : vector<8x128xf32>
    %cst_58 = arith.constant 5.000000e-01 : f32
    %182 = vector.broadcast %cst_58 : f32 to vector<8x128xf32>
    %183 = arith.addf %181, %182 : vector<8x128xf32>
    %184 = vector.extract_strided_slice %161 {offsets = [0, 256], sizes = [8, 128], strides = [1, 1]} : vector<8x384xf32> to vector<8x128xf32>
    %185 = vector.extract_strided_slice %163 {offsets = [0, 256], sizes = [8, 128], strides = [1, 1]} : vector<8x384xf32> to vector<8x128xf32>
    %186 = arith.addf %185, %8 : vector<8x128xf32>
    %187 = arith.mulf %173, %186 : vector<8x128xf32>
    %188 = arith.addf %184, %187 : vector<8x128xf32>
    %189 = math.tanh %188 : vector<8x128xf32>
    %190 = arith.subf %155, %189 : vector<8x128xf32>
    %191 = arith.mulf %183, %190 : vector<8x128xf32>
    %192 = arith.addf %189, %191 : vector<8x128xf32>
    %193 = arith.index_cast %159 : i32 to index
    %c0_59 = arith.constant 0 : index
    %194 = vector.load %arg15[%193, %c0_59] : memref<64x128xf32, #tpu.memory_space<vmem>>, vector<8x128xf32>
    tpu.vector_store %arg15[%193, %c0_59], %192 {strides = array<i32>} : memref<64x128xf32, #tpu.memory_space<vmem>>, vector<8x128xf32>,
    %c5_i32 = arith.constant 5 : i32
    %c8_i32_60 = arith.constant 8 : i32
    %195 = arith.muli %c5_i32, %c8_i32_60 : i32
    %196 = tpu.assume_multiple %195, 8 : i32
    %197 = arith.index_cast %196 : i32 to index
    %c0_61 = arith.constant 0 : index
    %198 = vector.load %arg14[%197, %c0_61] : memref<64x384xf32, #tpu.memory_space<vmem>>, vector<8x384xf32>
    %199 = arith.truncf %192 : vector<8x128xf32> to vector<8x128xbf16>
    %cst_62 = arith.constant dense<0.000000e+00> : vector<8x384xf32>
    %200 = tpu.matmul %199, %5, %cst_62 {dimension_numbers = #tpu.dot_dimension_numbers<[1], [0], [0], [1], [0, 0, 1, 1], [], []>} : vector<8x128xbf16>, vector<128x384xbf16>, vector<8x384xf32> -> vector<8x384xf32>
    %201 = vector.extract_strided_slice %198 {offsets = [0, 0], sizes = [8, 128], strides = [1, 1]} : vector<8x384xf32> to vector<8x128xf32>
    %202 = vector.extract_strided_slice %200 {offsets = [0, 0], sizes = [8, 128], strides = [1, 1]} : vector<8x384xf32> to vector<8x128xf32>
    %203 = arith.addf %201, %202 : vector<8x128xf32>
    %cst_63 = arith.constant 5.000000e-01 : f32
    %204 = vector.broadcast %cst_63 : f32 to vector<8x128xf32>
    %205 = arith.mulf %204, %203 : vector<8x128xf32>
    %206 = math.tanh %205 : vector<8x128xf32>
    %cst_64 = arith.constant 5.000000e-01 : f32
    %207 = vector.broadcast %cst_64 : f32 to vector<8x128xf32>
    %208 = arith.mulf %207, %206 : vector<8x128xf32>
    %cst_65 = arith.constant 5.000000e-01 : f32
    %209 = vector.broadcast %cst_65 : f32 to vector<8x128xf32>
    %210 = arith.addf %208, %209 : vector<8x128xf32>
    %211 = vector.extract_strided_slice %198 {offsets = [0, 128], sizes = [8, 128], strides = [1, 1]} : vector<8x384xf32> to vector<8x128xf32>
    %212 = vector.extract_strided_slice %200 {offsets = [0, 128], sizes = [8, 128], strides = [1, 1]} : vector<8x384xf32> to vector<8x128xf32>
    %213 = arith.addf %211, %212 : vector<8x128xf32>
    %cst_66 = arith.constant 5.000000e-01 : f32
    %214 = vector.broadcast %cst_66 : f32 to vector<8x128xf32>
    %215 = arith.mulf %214, %213 : vector<8x128xf32>
    %216 = math.tanh %215 : vector<8x128xf32>
    %cst_67 = arith.constant 5.000000e-01 : f32
    %217 = vector.broadcast %cst_67 : f32 to vector<8x128xf32>
    %218 = arith.mulf %217, %216 : vector<8x128xf32>
    %cst_68 = arith.constant 5.000000e-01 : f32
    %219 = vector.broadcast %cst_68 : f32 to vector<8x128xf32>
    %220 = arith.addf %218, %219 : vector<8x128xf32>
    %221 = vector.extract_strided_slice %198 {offsets = [0, 256], sizes = [8, 128], strides = [1, 1]} : vector<8x384xf32> to vector<8x128xf32>
    %222 = vector.extract_strided_slice %200 {offsets = [0, 256], sizes = [8, 128], strides = [1, 1]} : vector<8x384xf32> to vector<8x128xf32>
    %223 = arith.addf %222, %8 : vector<8x128xf32>
    %224 = arith.mulf %210, %223 : vector<8x128xf32>
    %225 = arith.addf %221, %224 : vector<8x128xf32>
    %226 = math.tanh %225 : vector<8x128xf32>
    %227 = arith.subf %192, %226 : vector<8x128xf32>
    %228 = arith.mulf %220, %227 : vector<8x128xf32>
    %229 = arith.addf %226, %228 : vector<8x128xf32>
    %230 = arith.index_cast %196 : i32 to index
    %c0_69 = arith.constant 0 : index
    %231 = vector.load %arg15[%230, %c0_69] : memref<64x128xf32, #tpu.memory_space<vmem>>, vector<8x128xf32>
    tpu.vector_store %arg15[%230, %c0_69], %229 {strides = array<i32>} : memref<64x128xf32, #tpu.memory_space<vmem>>, vector<8x128xf32>,
    %c6_i32 = arith.constant 6 : i32
    %c8_i32_70 = arith.constant 8 : i32
    %232 = arith.muli %c6_i32, %c8_i32_70 : i32
    %233 = tpu.assume_multiple %232, 8 : i32
    %234 = arith.index_cast %233 : i32 to index
    %c0_71 = arith.constant 0 : index
    %235 = vector.load %arg14[%234, %c0_71] : memref<64x384xf32, #tpu.memory_space<vmem>>, vector<8x384xf32>
    %236 = arith.truncf %229 : vector<8x128xf32> to vector<8x128xbf16>
    %cst_72 = arith.constant dense<0.000000e+00> : vector<8x384xf32>
    %237 = tpu.matmul %236, %5, %cst_72 {dimension_numbers = #tpu.dot_dimension_numbers<[1], [0], [0], [1], [0, 0, 1, 1], [], []>} : vector<8x128xbf16>, vector<128x384xbf16>, vector<8x384xf32> -> vector<8x384xf32>
    %238 = vector.extract_strided_slice %235 {offsets = [0, 0], sizes = [8, 128], strides = [1, 1]} : vector<8x384xf32> to vector<8x128xf32>
    %239 = vector.extract_strided_slice %237 {offsets = [0, 0], sizes = [8, 128], strides = [1, 1]} : vector<8x384xf32> to vector<8x128xf32>
    %240 = arith.addf %238, %239 : vector<8x128xf32>
    %cst_73 = arith.constant 5.000000e-01 : f32
    %241 = vector.broadcast %cst_73 : f32 to vector<8x128xf32>
    %242 = arith.mulf %241, %240 : vector<8x128xf32>
    %243 = math.tanh %242 : vector<8x128xf32>
    %cst_74 = arith.constant 5.000000e-01 : f32
    %244 = vector.broadcast %cst_74 : f32 to vector<8x128xf32>
    %245 = arith.mulf %244, %243 : vector<8x128xf32>
    %cst_75 = arith.constant 5.000000e-01 : f32
    %246 = vector.broadcast %cst_75 : f32 to vector<8x128xf32>
    %247 = arith.addf %245, %246 : vector<8x128xf32>
    %248 = vector.extract_strided_slice %235 {offsets = [0, 128], sizes = [8, 128], strides = [1, 1]} : vector<8x384xf32> to vector<8x128xf32>
    %249 = vector.extract_strided_slice %237 {offsets = [0, 128], sizes = [8, 128], strides = [1, 1]} : vector<8x384xf32> to vector<8x128xf32>
    %250 = arith.addf %248, %249 : vector<8x128xf32>
    %cst_76 = arith.constant 5.000000e-01 : f32
    %251 = vector.broadcast %cst_76 : f32 to vector<8x128xf32>
    %252 = arith.mulf %251, %250 : vector<8x128xf32>
    %253 = math.tanh %252 : vector<8x128xf32>
    %cst_77 = arith.constant 5.000000e-01 : f32
    %254 = vector.broadcast %cst_77 : f32 to vector<8x128xf32>
    %255 = arith.mulf %254, %253 : vector<8x128xf32>
    %cst_78 = arith.constant 5.000000e-01 : f32
    %256 = vector.broadcast %cst_78 : f32 to vector<8x128xf32>
    %257 = arith.addf %255, %256 : vector<8x128xf32>
    %258 = vector.extract_strided_slice %235 {offsets = [0, 256], sizes = [8, 128], strides = [1, 1]} : vector<8x384xf32> to vector<8x128xf32>
    %259 = vector.extract_strided_slice %237 {offsets = [0, 256], sizes = [8, 128], strides = [1, 1]} : vector<8x384xf32> to vector<8x128xf32>
    %260 = arith.addf %259, %8 : vector<8x128xf32>
    %261 = arith.mulf %247, %260 : vector<8x128xf32>
    %262 = arith.addf %258, %261 : vector<8x128xf32>
    %263 = math.tanh %262 : vector<8x128xf32>
    %264 = arith.subf %229, %263 : vector<8x128xf32>
    %265 = arith.mulf %257, %264 : vector<8x128xf32>
    %266 = arith.addf %263, %265 : vector<8x128xf32>
    %267 = arith.index_cast %233 : i32 to index
    %c0_79 = arith.constant 0 : index
    %268 = vector.load %arg15[%267, %c0_79] : memref<64x128xf32, #tpu.memory_space<vmem>>, vector<8x128xf32>
    tpu.vector_store %arg15[%267, %c0_79], %266 {strides = array<i32>} : memref<64x128xf32, #tpu.memory_space<vmem>>, vector<8x128xf32>,
    %c7_i32 = arith.constant 7 : i32
    %c8_i32_80 = arith.constant 8 : i32
    %269 = arith.muli %c7_i32, %c8_i32_80 : i32
    %270 = tpu.assume_multiple %269, 8 : i32
    %271 = arith.index_cast %270 : i32 to index
    %c0_81 = arith.constant 0 : index
    %272 = vector.load %arg14[%271, %c0_81] : memref<64x384xf32, #tpu.memory_space<vmem>>, vector<8x384xf32>
    %273 = arith.truncf %266 : vector<8x128xf32> to vector<8x128xbf16>
    %cst_82 = arith.constant dense<0.000000e+00> : vector<8x384xf32>
    %274 = tpu.matmul %273, %5, %cst_82 {dimension_numbers = #tpu.dot_dimension_numbers<[1], [0], [0], [1], [0, 0, 1, 1], [], []>} : vector<8x128xbf16>, vector<128x384xbf16>, vector<8x384xf32> -> vector<8x384xf32>
    %275 = vector.extract_strided_slice %272 {offsets = [0, 0], sizes = [8, 128], strides = [1, 1]} : vector<8x384xf32> to vector<8x128xf32>
    %276 = vector.extract_strided_slice %274 {offsets = [0, 0], sizes = [8, 128], strides = [1, 1]} : vector<8x384xf32> to vector<8x128xf32>
    %277 = arith.addf %275, %276 : vector<8x128xf32>
    %cst_83 = arith.constant 5.000000e-01 : f32
    %278 = vector.broadcast %cst_83 : f32 to vector<8x128xf32>
    %279 = arith.mulf %278, %277 : vector<8x128xf32>
    %280 = math.tanh %279 : vector<8x128xf32>
    %cst_84 = arith.constant 5.000000e-01 : f32
    %281 = vector.broadcast %cst_84 : f32 to vector<8x128xf32>
    %282 = arith.mulf %281, %280 : vector<8x128xf32>
    %cst_85 = arith.constant 5.000000e-01 : f32
    %283 = vector.broadcast %cst_85 : f32 to vector<8x128xf32>
    %284 = arith.addf %282, %283 : vector<8x128xf32>
    %285 = vector.extract_strided_slice %272 {offsets = [0, 128], sizes = [8, 128], strides = [1, 1]} : vector<8x384xf32> to vector<8x128xf32>
    %286 = vector.extract_strided_slice %274 {offsets = [0, 128], sizes = [8, 128], strides = [1, 1]} : vector<8x384xf32> to vector<8x128xf32>
    %287 = arith.addf %285, %286 : vector<8x128xf32>
    %cst_86 = arith.constant 5.000000e-01 : f32
    %288 = vector.broadcast %cst_86 : f32 to vector<8x128xf32>
    %289 = arith.mulf %288, %287 : vector<8x128xf32>
    %290 = math.tanh %289 : vector<8x128xf32>
    %cst_87 = arith.constant 5.000000e-01 : f32
    %291 = vector.broadcast %cst_87 : f32 to vector<8x128xf32>
    %292 = arith.mulf %291, %290 : vector<8x128xf32>
    %cst_88 = arith.constant 5.000000e-01 : f32
    %293 = vector.broadcast %cst_88 : f32 to vector<8x128xf32>
    %294 = arith.addf %292, %293 : vector<8x128xf32>
    %295 = vector.extract_strided_slice %272 {offsets = [0, 256], sizes = [8, 128], strides = [1, 1]} : vector<8x384xf32> to vector<8x128xf32>
    %296 = vector.extract_strided_slice %274 {offsets = [0, 256], sizes = [8, 128], strides = [1, 1]} : vector<8x384xf32> to vector<8x128xf32>
    %297 = arith.addf %296, %8 : vector<8x128xf32>
    %298 = arith.mulf %284, %297 : vector<8x128xf32>
    %299 = arith.addf %295, %298 : vector<8x128xf32>
    %300 = math.tanh %299 : vector<8x128xf32>
    %301 = arith.subf %266, %300 : vector<8x128xf32>
    %302 = arith.mulf %294, %301 : vector<8x128xf32>
    %303 = arith.addf %300, %302 : vector<8x128xf32>
    %304 = arith.index_cast %270 : i32 to index
    %c0_89 = arith.constant 0 : index
    %305 = vector.load %arg15[%304, %c0_89] : memref<64x128xf32, #tpu.memory_space<vmem>>, vector<8x128xf32>
    tpu.vector_store %arg15[%304, %c0_89], %303 {strides = array<i32>} : memref<64x128xf32, #tpu.memory_space<vmem>>, vector<8x128xf32>,
    %c8_i32_90 = arith.constant 8 : i32
    %c0_91 = arith.constant 0 : index
    %c0_92 = arith.constant 0 : index
    %306 = vector.load %arg15[%c0_91, %c0_92] : memref<64x128xf32, #tpu.memory_space<vmem>>, vector<64x128xf32>
    %307 = arith.truncf %306 : vector<64x128xf32> to vector<64x128xbf16>
    %c0_93 = arith.constant 0 : index
    %c0_94 = arith.constant 0 : index
    %308 = vector.load %arg5[%c0_93, %c0_94] : memref<128x384xbf16, #tpu.memory_space<vmem>>, vector<128x384xbf16>
    %cst_95 = arith.constant dense<0.000000e+00> : vector<64x384xf32>
    %309 = tpu.matmul %307, %308, %cst_95 {dimension_numbers = #tpu.dot_dimension_numbers<[1], [0], [0], [1], [0, 0, 1, 1], [], []>} : vector<64x128xbf16>, vector<128x384xbf16>, vector<64x384xf32> -> vector<64x384xf32>
    %c0_96 = arith.constant 0 : index
    %c0_97 = arith.constant 0 : index
    %310 = vector.load %arg7[%c0_96, %c0_97] : memref<1x384xf32, #tpu.memory_space<vmem>>, vector<1x384xf32>
    %311 = vector.broadcast %310 : vector<1x384xf32> to vector<64x384xf32>
    %312 = arith.addf %309, %311 : vector<64x384xf32>
    %c0_98 = arith.constant 0 : index
    %c0_99 = arith.constant 0 : index
    %313 = vector.load %arg14[%c0_98, %c0_99] : memref<64x384xf32, #tpu.memory_space<vmem>>, vector<64x384xf32>
    tpu.vector_store %arg14[%c0_98, %c0_99], %312 {strides = array<i32>} : memref<64x384xf32, #tpu.memory_space<vmem>>, vector<64x384xf32>,
    %c0_100 = arith.constant 0 : index
    %c0_101 = arith.constant 0 : index
    %314 = vector.load %arg6[%c0_100, %c0_101] : memref<128x384xbf16, #tpu.memory_space<vmem>>, vector<128x384xbf16>
    %c0_102 = arith.constant 0 : index
    %c0_103 = arith.constant 0 : index
    %315 = vector.load %arg8[%c0_102, %c0_103] : memref<1x128xf32, #tpu.memory_space<vmem>>, vector<1x128xf32>
    %316 = vector.shape_cast %315 : vector<1x128xf32> to vector<1x128xf32>
    %317 = vector.broadcast %316 : vector<1x128xf32> to vector<8x128xf32>
    %cst_104 = arith.constant 0.000000e+00 : f32
    %318 = vector.broadcast %cst_104 : f32 to vector<8x128xf32>
    %c0_i32_105 = arith.constant 0 : i32
    %c8_i32_106 = arith.constant 8 : i32
    %319 = arith.muli %c0_i32_105, %c8_i32_106 : i32
    %320 = tpu.assume_multiple %319, 8 : i32
    %321 = arith.index_cast %320 : i32 to index
    %c0_107 = arith.constant 0 : index
    %322 = vector.load %arg14[%321, %c0_107] : memref<64x384xf32, #tpu.memory_space<vmem>>, vector<8x384xf32>
    %323 = arith.truncf %318 : vector<8x128xf32> to vector<8x128xbf16>
    %cst_108 = arith.constant dense<0.000000e+00> : vector<8x384xf32>
    %324 = tpu.matmul %323, %314, %cst_108 {dimension_numbers = #tpu.dot_dimension_numbers<[1], [0], [0], [1], [0, 0, 1, 1], [], []>} : vector<8x128xbf16>, vector<128x384xbf16>, vector<8x384xf32> -> vector<8x384xf32>
    %325 = vector.extract_strided_slice %322 {offsets = [0, 0], sizes = [8, 128], strides = [1, 1]} : vector<8x384xf32> to vector<8x128xf32>
    %326 = vector.extract_strided_slice %324 {offsets = [0, 0], sizes = [8, 128], strides = [1, 1]} : vector<8x384xf32> to vector<8x128xf32>
    %327 = arith.addf %325, %326 : vector<8x128xf32>
    %cst_109 = arith.constant 5.000000e-01 : f32
    %328 = vector.broadcast %cst_109 : f32 to vector<8x128xf32>
    %329 = arith.mulf %328, %327 : vector<8x128xf32>
    %330 = math.tanh %329 : vector<8x128xf32>
    %cst_110 = arith.constant 5.000000e-01 : f32
    %331 = vector.broadcast %cst_110 : f32 to vector<8x128xf32>
    %332 = arith.mulf %331, %330 : vector<8x128xf32>
    %cst_111 = arith.constant 5.000000e-01 : f32
    %333 = vector.broadcast %cst_111 : f32 to vector<8x128xf32>
    %334 = arith.addf %332, %333 : vector<8x128xf32>
    %335 = vector.extract_strided_slice %322 {offsets = [0, 128], sizes = [8, 128], strides = [1, 1]} : vector<8x384xf32> to vector<8x128xf32>
    %336 = vector.extract_strided_slice %324 {offsets = [0, 128], sizes = [8, 128], strides = [1, 1]} : vector<8x384xf32> to vector<8x128xf32>
    %337 = arith.addf %335, %336 : vector<8x128xf32>
    %cst_112 = arith.constant 5.000000e-01 : f32
    %338 = vector.broadcast %cst_112 : f32 to vector<8x128xf32>
    %339 = arith.mulf %338, %337 : vector<8x128xf32>
    %340 = math.tanh %339 : vector<8x128xf32>
    %cst_113 = arith.constant 5.000000e-01 : f32
    %341 = vector.broadcast %cst_113 : f32 to vector<8x128xf32>
    %342 = arith.mulf %341, %340 : vector<8x128xf32>
    %cst_114 = arith.constant 5.000000e-01 : f32
    %343 = vector.broadcast %cst_114 : f32 to vector<8x128xf32>
    %344 = arith.addf %342, %343 : vector<8x128xf32>
    %345 = vector.extract_strided_slice %322 {offsets = [0, 256], sizes = [8, 128], strides = [1, 1]} : vector<8x384xf32> to vector<8x128xf32>
    %346 = vector.extract_strided_slice %324 {offsets = [0, 256], sizes = [8, 128], strides = [1, 1]} : vector<8x384xf32> to vector<8x128xf32>
    %347 = arith.addf %346, %317 : vector<8x128xf32>
    %348 = arith.mulf %334, %347 : vector<8x128xf32>
    %349 = arith.addf %345, %348 : vector<8x128xf32>
    %350 = math.tanh %349 : vector<8x128xf32>
    %351 = arith.subf %318, %350 : vector<8x128xf32>
    %352 = arith.mulf %344, %351 : vector<8x128xf32>
    %353 = arith.addf %350, %352 : vector<8x128xf32>
    %c1_i32_115 = arith.constant 1 : i32
    %c8_i32_116 = arith.constant 8 : i32
    %354 = arith.muli %c1_i32_115, %c8_i32_116 : i32
    %355 = tpu.assume_multiple %354, 8 : i32
    %356 = arith.index_cast %355 : i32 to index
    %c0_117 = arith.constant 0 : index
    %357 = vector.load %arg14[%356, %c0_117] : memref<64x384xf32, #tpu.memory_space<vmem>>, vector<8x384xf32>
    %358 = arith.truncf %353 : vector<8x128xf32> to vector<8x128xbf16>
    %cst_118 = arith.constant dense<0.000000e+00> : vector<8x384xf32>
    %359 = tpu.matmul %358, %314, %cst_118 {dimension_numbers = #tpu.dot_dimension_numbers<[1], [0], [0], [1], [0, 0, 1, 1], [], []>} : vector<8x128xbf16>, vector<128x384xbf16>, vector<8x384xf32> -> vector<8x384xf32>
    %360 = vector.extract_strided_slice %357 {offsets = [0, 0], sizes = [8, 128], strides = [1, 1]} : vector<8x384xf32> to vector<8x128xf32>
    %361 = vector.extract_strided_slice %359 {offsets = [0, 0], sizes = [8, 128], strides = [1, 1]} : vector<8x384xf32> to vector<8x128xf32>
    %362 = arith.addf %360, %361 : vector<8x128xf32>
    %cst_119 = arith.constant 5.000000e-01 : f32
    %363 = vector.broadcast %cst_119 : f32 to vector<8x128xf32>
    %364 = arith.mulf %363, %362 : vector<8x128xf32>
    %365 = math.tanh %364 : vector<8x128xf32>
    %cst_120 = arith.constant 5.000000e-01 : f32
    %366 = vector.broadcast %cst_120 : f32 to vector<8x128xf32>
    %367 = arith.mulf %366, %365 : vector<8x128xf32>
    %cst_121 = arith.constant 5.000000e-01 : f32
    %368 = vector.broadcast %cst_121 : f32 to vector<8x128xf32>
    %369 = arith.addf %367, %368 : vector<8x128xf32>
    %370 = vector.extract_strided_slice %357 {offsets = [0, 128], sizes = [8, 128], strides = [1, 1]} : vector<8x384xf32> to vector<8x128xf32>
    %371 = vector.extract_strided_slice %359 {offsets = [0, 128], sizes = [8, 128], strides = [1, 1]} : vector<8x384xf32> to vector<8x128xf32>
    %372 = arith.addf %370, %371 : vector<8x128xf32>
    %cst_122 = arith.constant 5.000000e-01 : f32
    %373 = vector.broadcast %cst_122 : f32 to vector<8x128xf32>
    %374 = arith.mulf %373, %372 : vector<8x128xf32>
    %375 = math.tanh %374 : vector<8x128xf32>
    %cst_123 = arith.constant 5.000000e-01 : f32
    %376 = vector.broadcast %cst_123 : f32 to vector<8x128xf32>
    %377 = arith.mulf %376, %375 : vector<8x128xf32>
    %cst_124 = arith.constant 5.000000e-01 : f32
    %378 = vector.broadcast %cst_124 : f32 to vector<8x128xf32>
    %379 = arith.addf %377, %378 : vector<8x128xf32>
    %380 = vector.extract_strided_slice %357 {offsets = [0, 256], sizes = [8, 128], strides = [1, 1]} : vector<8x384xf32> to vector<8x128xf32>
    %381 = vector.extract_strided_slice %359 {offsets = [0, 256], sizes = [8, 128], strides = [1, 1]} : vector<8x384xf32> to vector<8x128xf32>
    %382 = arith.addf %381, %317 : vector<8x128xf32>
    %383 = arith.mulf %369, %382 : vector<8x128xf32>
    %384 = arith.addf %380, %383 : vector<8x128xf32>
    %385 = math.tanh %384 : vector<8x128xf32>
    %386 = arith.subf %353, %385 : vector<8x128xf32>
    %387 = arith.mulf %379, %386 : vector<8x128xf32>
    %388 = arith.addf %385, %387 : vector<8x128xf32>
    %c2_i32_125 = arith.constant 2 : i32
    %c8_i32_126 = arith.constant 8 : i32
    %389 = arith.muli %c2_i32_125, %c8_i32_126 : i32
    %390 = tpu.assume_multiple %389, 8 : i32
    %391 = arith.index_cast %390 : i32 to index
    %c0_127 = arith.constant 0 : index
    %392 = vector.load %arg14[%391, %c0_127] : memref<64x384xf32, #tpu.memory_space<vmem>>, vector<8x384xf32>
    %393 = arith.truncf %388 : vector<8x128xf32> to vector<8x128xbf16>
    %cst_128 = arith.constant dense<0.000000e+00> : vector<8x384xf32>
    %394 = tpu.matmul %393, %314, %cst_128 {dimension_numbers = #tpu.dot_dimension_numbers<[1], [0], [0], [1], [0, 0, 1, 1], [], []>} : vector<8x128xbf16>, vector<128x384xbf16>, vector<8x384xf32> -> vector<8x384xf32>
    %395 = vector.extract_strided_slice %392 {offsets = [0, 0], sizes = [8, 128], strides = [1, 1]} : vector<8x384xf32> to vector<8x128xf32>
    %396 = vector.extract_strided_slice %394 {offsets = [0, 0], sizes = [8, 128], strides = [1, 1]} : vector<8x384xf32> to vector<8x128xf32>
    %397 = arith.addf %395, %396 : vector<8x128xf32>
    %cst_129 = arith.constant 5.000000e-01 : f32
    %398 = vector.broadcast %cst_129 : f32 to vector<8x128xf32>
    %399 = arith.mulf %398, %397 : vector<8x128xf32>
    %400 = math.tanh %399 : vector<8x128xf32>
    %cst_130 = arith.constant 5.000000e-01 : f32
    %401 = vector.broadcast %cst_130 : f32 to vector<8x128xf32>
    %402 = arith.mulf %401, %400 : vector<8x128xf32>
    %cst_131 = arith.constant 5.000000e-01 : f32
    %403 = vector.broadcast %cst_131 : f32 to vector<8x128xf32>
    %404 = arith.addf %402, %403 : vector<8x128xf32>
    %405 = vector.extract_strided_slice %392 {offsets = [0, 128], sizes = [8, 128], strides = [1, 1]} : vector<8x384xf32> to vector<8x128xf32>
    %406 = vector.extract_strided_slice %394 {offsets = [0, 128], sizes = [8, 128], strides = [1, 1]} : vector<8x384xf32> to vector<8x128xf32>
    %407 = arith.addf %405, %406 : vector<8x128xf32>
    %cst_132 = arith.constant 5.000000e-01 : f32
    %408 = vector.broadcast %cst_132 : f32 to vector<8x128xf32>
    %409 = arith.mulf %408, %407 : vector<8x128xf32>
    %410 = math.tanh %409 : vector<8x128xf32>
    %cst_133 = arith.constant 5.000000e-01 : f32
    %411 = vector.broadcast %cst_133 : f32 to vector<8x128xf32>
    %412 = arith.mulf %411, %410 : vector<8x128xf32>
    %cst_134 = arith.constant 5.000000e-01 : f32
    %413 = vector.broadcast %cst_134 : f32 to vector<8x128xf32>
    %414 = arith.addf %412, %413 : vector<8x128xf32>
    %415 = vector.extract_strided_slice %392 {offsets = [0, 256], sizes = [8, 128], strides = [1, 1]} : vector<8x384xf32> to vector<8x128xf32>
    %416 = vector.extract_strided_slice %394 {offsets = [0, 256], sizes = [8, 128], strides = [1, 1]} : vector<8x384xf32> to vector<8x128xf32>
    %417 = arith.addf %416, %317 : vector<8x128xf32>
    %418 = arith.mulf %404, %417 : vector<8x128xf32>
    %419 = arith.addf %415, %418 : vector<8x128xf32>
    %420 = math.tanh %419 : vector<8x128xf32>
    %421 = arith.subf %388, %420 : vector<8x128xf32>
    %422 = arith.mulf %414, %421 : vector<8x128xf32>
    %423 = arith.addf %420, %422 : vector<8x128xf32>
    %c3_i32_135 = arith.constant 3 : i32
    %c8_i32_136 = arith.constant 8 : i32
    %424 = arith.muli %c3_i32_135, %c8_i32_136 : i32
    %425 = tpu.assume_multiple %424, 8 : i32
    %426 = arith.index_cast %425 : i32 to index
    %c0_137 = arith.constant 0 : index
    %427 = vector.load %arg14[%426, %c0_137] : memref<64x384xf32, #tpu.memory_space<vmem>>, vector<8x384xf32>
    %428 = arith.truncf %423 : vector<8x128xf32> to vector<8x128xbf16>
    %cst_138 = arith.constant dense<0.000000e+00> : vector<8x384xf32>
    %429 = tpu.matmul %428, %314, %cst_138 {dimension_numbers = #tpu.dot_dimension_numbers<[1], [0], [0], [1], [0, 0, 1, 1], [], []>} : vector<8x128xbf16>, vector<128x384xbf16>, vector<8x384xf32> -> vector<8x384xf32>
    %430 = vector.extract_strided_slice %427 {offsets = [0, 0], sizes = [8, 128], strides = [1, 1]} : vector<8x384xf32> to vector<8x128xf32>
    %431 = vector.extract_strided_slice %429 {offsets = [0, 0], sizes = [8, 128], strides = [1, 1]} : vector<8x384xf32> to vector<8x128xf32>
    %432 = arith.addf %430, %431 : vector<8x128xf32>
    %cst_139 = arith.constant 5.000000e-01 : f32
    %433 = vector.broadcast %cst_139 : f32 to vector<8x128xf32>
    %434 = arith.mulf %433, %432 : vector<8x128xf32>
    %435 = math.tanh %434 : vector<8x128xf32>
    %cst_140 = arith.constant 5.000000e-01 : f32
    %436 = vector.broadcast %cst_140 : f32 to vector<8x128xf32>
    %437 = arith.mulf %436, %435 : vector<8x128xf32>
    %cst_141 = arith.constant 5.000000e-01 : f32
    %438 = vector.broadcast %cst_141 : f32 to vector<8x128xf32>
    %439 = arith.addf %437, %438 : vector<8x128xf32>
    %440 = vector.extract_strided_slice %427 {offsets = [0, 128], sizes = [8, 128], strides = [1, 1]} : vector<8x384xf32> to vector<8x128xf32>
    %441 = vector.extract_strided_slice %429 {offsets = [0, 128], sizes = [8, 128], strides = [1, 1]} : vector<8x384xf32> to vector<8x128xf32>
    %442 = arith.addf %440, %441 : vector<8x128xf32>
    %cst_142 = arith.constant 5.000000e-01 : f32
    %443 = vector.broadcast %cst_142 : f32 to vector<8x128xf32>
    %444 = arith.mulf %443, %442 : vector<8x128xf32>
    %445 = math.tanh %444 : vector<8x128xf32>
    %cst_143 = arith.constant 5.000000e-01 : f32
    %446 = vector.broadcast %cst_143 : f32 to vector<8x128xf32>
    %447 = arith.mulf %446, %445 : vector<8x128xf32>
    %cst_144 = arith.constant 5.000000e-01 : f32
    %448 = vector.broadcast %cst_144 : f32 to vector<8x128xf32>
    %449 = arith.addf %447, %448 : vector<8x128xf32>
    %450 = vector.extract_strided_slice %427 {offsets = [0, 256], sizes = [8, 128], strides = [1, 1]} : vector<8x384xf32> to vector<8x128xf32>
    %451 = vector.extract_strided_slice %429 {offsets = [0, 256], sizes = [8, 128], strides = [1, 1]} : vector<8x384xf32> to vector<8x128xf32>
    %452 = arith.addf %451, %317 : vector<8x128xf32>
    %453 = arith.mulf %439, %452 : vector<8x128xf32>
    %454 = arith.addf %450, %453 : vector<8x128xf32>
    %455 = math.tanh %454 : vector<8x128xf32>
    %456 = arith.subf %423, %455 : vector<8x128xf32>
    %457 = arith.mulf %449, %456 : vector<8x128xf32>
    %458 = arith.addf %455, %457 : vector<8x128xf32>
    %c4_i32_145 = arith.constant 4 : i32
    %c8_i32_146 = arith.constant 8 : i32
    %459 = arith.muli %c4_i32_145, %c8_i32_146 : i32
    %460 = tpu.assume_multiple %459, 8 : i32
    %461 = arith.index_cast %460 : i32 to index
    %c0_147 = arith.constant 0 : index
    %462 = vector.load %arg14[%461, %c0_147] : memref<64x384xf32, #tpu.memory_space<vmem>>, vector<8x384xf32>
    %463 = arith.truncf %458 : vector<8x128xf32> to vector<8x128xbf16>
    %cst_148 = arith.constant dense<0.000000e+00> : vector<8x384xf32>
    %464 = tpu.matmul %463, %314, %cst_148 {dimension_numbers = #tpu.dot_dimension_numbers<[1], [0], [0], [1], [0, 0, 1, 1], [], []>} : vector<8x128xbf16>, vector<128x384xbf16>, vector<8x384xf32> -> vector<8x384xf32>
    %465 = vector.extract_strided_slice %462 {offsets = [0, 0], sizes = [8, 128], strides = [1, 1]} : vector<8x384xf32> to vector<8x128xf32>
    %466 = vector.extract_strided_slice %464 {offsets = [0, 0], sizes = [8, 128], strides = [1, 1]} : vector<8x384xf32> to vector<8x128xf32>
    %467 = arith.addf %465, %466 : vector<8x128xf32>
    %cst_149 = arith.constant 5.000000e-01 : f32
    %468 = vector.broadcast %cst_149 : f32 to vector<8x128xf32>
    %469 = arith.mulf %468, %467 : vector<8x128xf32>
    %470 = math.tanh %469 : vector<8x128xf32>
    %cst_150 = arith.constant 5.000000e-01 : f32
    %471 = vector.broadcast %cst_150 : f32 to vector<8x128xf32>
    %472 = arith.mulf %471, %470 : vector<8x128xf32>
    %cst_151 = arith.constant 5.000000e-01 : f32
    %473 = vector.broadcast %cst_151 : f32 to vector<8x128xf32>
    %474 = arith.addf %472, %473 : vector<8x128xf32>
    %475 = vector.extract_strided_slice %462 {offsets = [0, 128], sizes = [8, 128], strides = [1, 1]} : vector<8x384xf32> to vector<8x128xf32>
    %476 = vector.extract_strided_slice %464 {offsets = [0, 128], sizes = [8, 128], strides = [1, 1]} : vector<8x384xf32> to vector<8x128xf32>
    %477 = arith.addf %475, %476 : vector<8x128xf32>
    %cst_152 = arith.constant 5.000000e-01 : f32
    %478 = vector.broadcast %cst_152 : f32 to vector<8x128xf32>
    %479 = arith.mulf %478, %477 : vector<8x128xf32>
    %480 = math.tanh %479 : vector<8x128xf32>
    %cst_153 = arith.constant 5.000000e-01 : f32
    %481 = vector.broadcast %cst_153 : f32 to vector<8x128xf32>
    %482 = arith.mulf %481, %480 : vector<8x128xf32>
    %cst_154 = arith.constant 5.000000e-01 : f32
    %483 = vector.broadcast %cst_154 : f32 to vector<8x128xf32>
    %484 = arith.addf %482, %483 : vector<8x128xf32>
    %485 = vector.extract_strided_slice %462 {offsets = [0, 256], sizes = [8, 128], strides = [1, 1]} : vector<8x384xf32> to vector<8x128xf32>
    %486 = vector.extract_strided_slice %464 {offsets = [0, 256], sizes = [8, 128], strides = [1, 1]} : vector<8x384xf32> to vector<8x128xf32>
    %487 = arith.addf %486, %317 : vector<8x128xf32>
    %488 = arith.mulf %474, %487 : vector<8x128xf32>
    %489 = arith.addf %485, %488 : vector<8x128xf32>
    %490 = math.tanh %489 : vector<8x128xf32>
    %491 = arith.subf %458, %490 : vector<8x128xf32>
    %492 = arith.mulf %484, %491 : vector<8x128xf32>
    %493 = arith.addf %490, %492 : vector<8x128xf32>
    %c5_i32_155 = arith.constant 5 : i32
    %c8_i32_156 = arith.constant 8 : i32
    %494 = arith.muli %c5_i32_155, %c8_i32_156 : i32
    %495 = tpu.assume_multiple %494, 8 : i32
    %496 = arith.index_cast %495 : i32 to index
    %c0_157 = arith.constant 0 : index
    %497 = vector.load %arg14[%496, %c0_157] : memref<64x384xf32, #tpu.memory_space<vmem>>, vector<8x384xf32>
    %498 = arith.truncf %493 : vector<8x128xf32> to vector<8x128xbf16>
    %cst_158 = arith.constant dense<0.000000e+00> : vector<8x384xf32>
    %499 = tpu.matmul %498, %314, %cst_158 {dimension_numbers = #tpu.dot_dimension_numbers<[1], [0], [0], [1], [0, 0, 1, 1], [], []>} : vector<8x128xbf16>, vector<128x384xbf16>, vector<8x384xf32> -> vector<8x384xf32>
    %500 = vector.extract_strided_slice %497 {offsets = [0, 0], sizes = [8, 128], strides = [1, 1]} : vector<8x384xf32> to vector<8x128xf32>
    %501 = vector.extract_strided_slice %499 {offsets = [0, 0], sizes = [8, 128], strides = [1, 1]} : vector<8x384xf32> to vector<8x128xf32>
    %502 = arith.addf %500, %501 : vector<8x128xf32>
    %cst_159 = arith.constant 5.000000e-01 : f32
    %503 = vector.broadcast %cst_159 : f32 to vector<8x128xf32>
    %504 = arith.mulf %503, %502 : vector<8x128xf32>
    %505 = math.tanh %504 : vector<8x128xf32>
    %cst_160 = arith.constant 5.000000e-01 : f32
    %506 = vector.broadcast %cst_160 : f32 to vector<8x128xf32>
    %507 = arith.mulf %506, %505 : vector<8x128xf32>
    %cst_161 = arith.constant 5.000000e-01 : f32
    %508 = vector.broadcast %cst_161 : f32 to vector<8x128xf32>
    %509 = arith.addf %507, %508 : vector<8x128xf32>
    %510 = vector.extract_strided_slice %497 {offsets = [0, 128], sizes = [8, 128], strides = [1, 1]} : vector<8x384xf32> to vector<8x128xf32>
    %511 = vector.extract_strided_slice %499 {offsets = [0, 128], sizes = [8, 128], strides = [1, 1]} : vector<8x384xf32> to vector<8x128xf32>
    %512 = arith.addf %510, %511 : vector<8x128xf32>
    %cst_162 = arith.constant 5.000000e-01 : f32
    %513 = vector.broadcast %cst_162 : f32 to vector<8x128xf32>
    %514 = arith.mulf %513, %512 : vector<8x128xf32>
    %515 = math.tanh %514 : vector<8x128xf32>
    %cst_163 = arith.constant 5.000000e-01 : f32
    %516 = vector.broadcast %cst_163 : f32 to vector<8x128xf32>
    %517 = arith.mulf %516, %515 : vector<8x128xf32>
    %cst_164 = arith.constant 5.000000e-01 : f32
    %518 = vector.broadcast %cst_164 : f32 to vector<8x128xf32>
    %519 = arith.addf %517, %518 : vector<8x128xf32>
    %520 = vector.extract_strided_slice %497 {offsets = [0, 256], sizes = [8, 128], strides = [1, 1]} : vector<8x384xf32> to vector<8x128xf32>
    %521 = vector.extract_strided_slice %499 {offsets = [0, 256], sizes = [8, 128], strides = [1, 1]} : vector<8x384xf32> to vector<8x128xf32>
    %522 = arith.addf %521, %317 : vector<8x128xf32>
    %523 = arith.mulf %509, %522 : vector<8x128xf32>
    %524 = arith.addf %520, %523 : vector<8x128xf32>
    %525 = math.tanh %524 : vector<8x128xf32>
    %526 = arith.subf %493, %525 : vector<8x128xf32>
    %527 = arith.mulf %519, %526 : vector<8x128xf32>
    %528 = arith.addf %525, %527 : vector<8x128xf32>
    %c6_i32_165 = arith.constant 6 : i32
    %c8_i32_166 = arith.constant 8 : i32
    %529 = arith.muli %c6_i32_165, %c8_i32_166 : i32
    %530 = tpu.assume_multiple %529, 8 : i32
    %531 = arith.index_cast %530 : i32 to index
    %c0_167 = arith.constant 0 : index
    %532 = vector.load %arg14[%531, %c0_167] : memref<64x384xf32, #tpu.memory_space<vmem>>, vector<8x384xf32>
    %533 = arith.truncf %528 : vector<8x128xf32> to vector<8x128xbf16>
    %cst_168 = arith.constant dense<0.000000e+00> : vector<8x384xf32>
    %534 = tpu.matmul %533, %314, %cst_168 {dimension_numbers = #tpu.dot_dimension_numbers<[1], [0], [0], [1], [0, 0, 1, 1], [], []>} : vector<8x128xbf16>, vector<128x384xbf16>, vector<8x384xf32> -> vector<8x384xf32>
    %535 = vector.extract_strided_slice %532 {offsets = [0, 0], sizes = [8, 128], strides = [1, 1]} : vector<8x384xf32> to vector<8x128xf32>
    %536 = vector.extract_strided_slice %534 {offsets = [0, 0], sizes = [8, 128], strides = [1, 1]} : vector<8x384xf32> to vector<8x128xf32>
    %537 = arith.addf %535, %536 : vector<8x128xf32>
    %cst_169 = arith.constant 5.000000e-01 : f32
    %538 = vector.broadcast %cst_169 : f32 to vector<8x128xf32>
    %539 = arith.mulf %538, %537 : vector<8x128xf32>
    %540 = math.tanh %539 : vector<8x128xf32>
    %cst_170 = arith.constant 5.000000e-01 : f32
    %541 = vector.broadcast %cst_170 : f32 to vector<8x128xf32>
    %542 = arith.mulf %541, %540 : vector<8x128xf32>
    %cst_171 = arith.constant 5.000000e-01 : f32
    %543 = vector.broadcast %cst_171 : f32 to vector<8x128xf32>
    %544 = arith.addf %542, %543 : vector<8x128xf32>
    %545 = vector.extract_strided_slice %532 {offsets = [0, 128], sizes = [8, 128], strides = [1, 1]} : vector<8x384xf32> to vector<8x128xf32>
    %546 = vector.extract_strided_slice %534 {offsets = [0, 128], sizes = [8, 128], strides = [1, 1]} : vector<8x384xf32> to vector<8x128xf32>
    %547 = arith.addf %545, %546 : vector<8x128xf32>
    %cst_172 = arith.constant 5.000000e-01 : f32
    %548 = vector.broadcast %cst_172 : f32 to vector<8x128xf32>
    %549 = arith.mulf %548, %547 : vector<8x128xf32>
    %550 = math.tanh %549 : vector<8x128xf32>
    %cst_173 = arith.constant 5.000000e-01 : f32
    %551 = vector.broadcast %cst_173 : f32 to vector<8x128xf32>
    %552 = arith.mulf %551, %550 : vector<8x128xf32>
    %cst_174 = arith.constant 5.000000e-01 : f32
    %553 = vector.broadcast %cst_174 : f32 to vector<8x128xf32>
    %554 = arith.addf %552, %553 : vector<8x128xf32>
    %555 = vector.extract_strided_slice %532 {offsets = [0, 256], sizes = [8, 128], strides = [1, 1]} : vector<8x384xf32> to vector<8x128xf32>
    %556 = vector.extract_strided_slice %534 {offsets = [0, 256], sizes = [8, 128], strides = [1, 1]} : vector<8x384xf32> to vector<8x128xf32>
    %557 = arith.addf %556, %317 : vector<8x128xf32>
    %558 = arith.mulf %544, %557 : vector<8x128xf32>
    %559 = arith.addf %555, %558 : vector<8x128xf32>
    %560 = math.tanh %559 : vector<8x128xf32>
    %561 = arith.subf %528, %560 : vector<8x128xf32>
    %562 = arith.mulf %554, %561 : vector<8x128xf32>
    %563 = arith.addf %560, %562 : vector<8x128xf32>
    %c7_i32_175 = arith.constant 7 : i32
    %c8_i32_176 = arith.constant 8 : i32
    %564 = arith.muli %c7_i32_175, %c8_i32_176 : i32
    %565 = tpu.assume_multiple %564, 8 : i32
    %566 = arith.index_cast %565 : i32 to index
    %c0_177 = arith.constant 0 : index
    %567 = vector.load %arg14[%566, %c0_177] : memref<64x384xf32, #tpu.memory_space<vmem>>, vector<8x384xf32>
    %568 = arith.truncf %563 : vector<8x128xf32> to vector<8x128xbf16>
    %cst_178 = arith.constant dense<0.000000e+00> : vector<8x384xf32>
    %569 = tpu.matmul %568, %314, %cst_178 {dimension_numbers = #tpu.dot_dimension_numbers<[1], [0], [0], [1], [0, 0, 1, 1], [], []>} : vector<8x128xbf16>, vector<128x384xbf16>, vector<8x384xf32> -> vector<8x384xf32>
    %570 = vector.extract_strided_slice %567 {offsets = [0, 0], sizes = [8, 128], strides = [1, 1]} : vector<8x384xf32> to vector<8x128xf32>
    %571 = vector.extract_strided_slice %569 {offsets = [0, 0], sizes = [8, 128], strides = [1, 1]} : vector<8x384xf32> to vector<8x128xf32>
    %572 = arith.addf %570, %571 : vector<8x128xf32>
    %cst_179 = arith.constant 5.000000e-01 : f32
    %573 = vector.broadcast %cst_179 : f32 to vector<8x128xf32>
    %574 = arith.mulf %573, %572 : vector<8x128xf32>
    %575 = math.tanh %574 : vector<8x128xf32>
    %cst_180 = arith.constant 5.000000e-01 : f32
    %576 = vector.broadcast %cst_180 : f32 to vector<8x128xf32>
    %577 = arith.mulf %576, %575 : vector<8x128xf32>
    %cst_181 = arith.constant 5.000000e-01 : f32
    %578 = vector.broadcast %cst_181 : f32 to vector<8x128xf32>
    %579 = arith.addf %577, %578 : vector<8x128xf32>
    %580 = vector.extract_strided_slice %567 {offsets = [0, 128], sizes = [8, 128], strides = [1, 1]} : vector<8x384xf32> to vector<8x128xf32>
    %581 = vector.extract_strided_slice %569 {offsets = [0, 128], sizes = [8, 128], strides = [1, 1]} : vector<8x384xf32> to vector<8x128xf32>
    %582 = arith.addf %580, %581 : vector<8x128xf32>
    %cst_182 = arith.constant 5.000000e-01 : f32
    %583 = vector.broadcast %cst_182 : f32 to vector<8x128xf32>
    %584 = arith.mulf %583, %582 : vector<8x128xf32>
    %585 = math.tanh %584 : vector<8x128xf32>
    %cst_183 = arith.constant 5.000000e-01 : f32
    %586 = vector.broadcast %cst_183 : f32 to vector<8x128xf32>
    %587 = arith.mulf %586, %585 : vector<8x128xf32>
    %cst_184 = arith.constant 5.000000e-01 : f32
    %588 = vector.broadcast %cst_184 : f32 to vector<8x128xf32>
    %589 = arith.addf %587, %588 : vector<8x128xf32>
    %590 = vector.extract_strided_slice %567 {offsets = [0, 256], sizes = [8, 128], strides = [1, 1]} : vector<8x384xf32> to vector<8x128xf32>
    %591 = vector.extract_strided_slice %569 {offsets = [0, 256], sizes = [8, 128], strides = [1, 1]} : vector<8x384xf32> to vector<8x128xf32>
    %592 = arith.addf %591, %317 : vector<8x128xf32>
    %593 = arith.mulf %579, %592 : vector<8x128xf32>
    %594 = arith.addf %590, %593 : vector<8x128xf32>
    %595 = math.tanh %594 : vector<8x128xf32>
    %596 = arith.subf %563, %595 : vector<8x128xf32>
    %597 = arith.mulf %589, %596 : vector<8x128xf32>
    %598 = arith.addf %595, %597 : vector<8x128xf32>
    %c8_i32_185 = arith.constant 8 : i32
    %c0_186 = arith.constant 0 : index
    %c0_187 = arith.constant 0 : index
    %599 = vector.load %arg9[%c0_186, %c0_187] : memref<128x128xf32, #tpu.memory_space<vmem>>, vector<128x128xf32>
    %cst_188 = arith.constant dense<0.000000e+00> : vector<8x128xf32>
    %600 = tpu.matmul %598, %599, %cst_188 {dimension_numbers = #tpu.dot_dimension_numbers<[1], [0], [0], [1], [0, 0, 1, 1], [], []>} : vector<8x128xf32>, vector<128x128xf32>, vector<8x128xf32> -> vector<8x128xf32>
    %c0_189 = arith.constant 0 : index
    %c0_190 = arith.constant 0 : index
    %601 = vector.load %arg10[%c0_189, %c0_190] : memref<1x128xf32, #tpu.memory_space<vmem>>, vector<1x128xf32>
    %602 = vector.broadcast %601 : vector<1x128xf32> to vector<8x128xf32>
    %603 = arith.addf %600, %602 : vector<8x128xf32>
    %cst_191 = arith.constant 0.000000e+00 : f32
    %604 = vector.broadcast %cst_191 : f32 to vector<8x128xf32>
    %605 = arith.maximumf %603, %604 : vector<8x128xf32>
    %c0_192 = arith.constant 0 : index
    %c0_193 = arith.constant 0 : index
    %606 = vector.load %arg11[%c0_192, %c0_193] : memref<128x128xf32, #tpu.memory_space<vmem>>, vector<128x128xf32>
    %cst_194 = arith.constant dense<0.000000e+00> : vector<8x128xf32>
    %607 = tpu.matmul %605, %606, %cst_194 {dimension_numbers = #tpu.dot_dimension_numbers<[1], [0], [0], [1], [0, 0, 1, 1], [], []>} : vector<8x128xf32>, vector<128x128xf32>, vector<8x128xf32> -> vector<8x128xf32>
    %c0_195 = arith.constant 0 : index
    %c0_196 = arith.constant 0 : index
    %608 = vector.load %arg12[%c0_195, %c0_196] : memref<1x128xf32, #tpu.memory_space<vmem>>, vector<1x128xf32>
    %609 = vector.broadcast %608 : vector<1x128xf32> to vector<8x128xf32>
    %610 = arith.addf %607, %609 : vector<8x128xf32>
    %c0_197 = arith.constant 0 : index
    %c0_198 = arith.constant 0 : index
    %c0_199 = arith.constant 0 : index
    %611 = vector.load %arg13[%c0_197, %c0_198, %c0_199] : memref<1x8x128xf32, #tpu.memory_space<vmem>>, vector<1x8x128xf32>
    %612 = vector.shape_cast %611 : vector<1x8x128xf32> to vector<8x128xf32>
    %613 = vector.shape_cast %610 : vector<8x128xf32> to vector<1x8x128xf32>
    tpu.vector_store %arg13[%c0_197, %c0_198, %c0_199], %613 {strides = array<i32>} : memref<1x8x128xf32, #tpu.memory_space<vmem>>, vector<1x8x128xf32>,
    return
  }
  func.func @transform_0(%arg0: i32) -> (i32, i32, i32) {
    %c0_i32 = arith.constant 0 : i32
    %c0_i32_0 = arith.constant 0 : i32
    %c0_i32_1 = arith.constant 0 : i32
    return %arg0, %c0_i32, %c0_i32_0 : i32, i32, i32
  }
  func.func @transform_1(%arg0: i32) -> (i32, i32) {
    %c0_i32 = arith.constant 0 : i32
    %c0_i32_0 = arith.constant 0 : i32
    %c0_i32_1 = arith.constant 0 : i32
    return %c0_i32, %c0_i32_0 : i32, i32
  }
  func.func @transform_2(%arg0: i32) -> (i32, i32) {
    %c0_i32 = arith.constant 0 : i32
    %c0_i32_0 = arith.constant 0 : i32
    %c0_i32_1 = arith.constant 0 : i32
    return %c0_i32, %c0_i32_0 : i32, i32
  }
  func.func @transform_3(%arg0: i32) -> (i32, i32) {
    %c0_i32 = arith.constant 0 : i32
    %c0_i32_0 = arith.constant 0 : i32
    %c0_i32_1 = arith.constant 0 : i32
    return %c0_i32, %c0_i32_0 : i32, i32
  }
  func.func @transform_4(%arg0: i32) -> (i32, i32) {
    %c0_i32 = arith.constant 0 : i32
    %c0_i32_0 = arith.constant 0 : i32
    %c0_i32_1 = arith.constant 0 : i32
    return %c0_i32, %c0_i32_0 : i32, i32
  }
  func.func @transform_5(%arg0: i32) -> (i32, i32) {
    %c0_i32 = arith.constant 0 : i32
    %c0_i32_0 = arith.constant 0 : i32
    %c0_i32_1 = arith.constant 0 : i32
    return %c0_i32, %c0_i32_0 : i32, i32
  }
  func.func @transform_6(%arg0: i32) -> (i32, i32) {
    %c0_i32 = arith.constant 0 : i32
    %c0_i32_0 = arith.constant 0 : i32
    %c0_i32_1 = arith.constant 0 : i32
    return %c0_i32, %c0_i32_0 : i32, i32
  }
  func.func @transform_7(%arg0: i32) -> (i32, i32) {
    %c0_i32 = arith.constant 0 : i32
    %c0_i32_0 = arith.constant 0 : i32
    %c0_i32_1 = arith.constant 0 : i32
    return %c0_i32, %c0_i32_0 : i32, i32
  }
  func.func @transform_8(%arg0: i32) -> (i32, i32) {
    %c0_i32 = arith.constant 0 : i32
    %c0_i32_0 = arith.constant 0 : i32
    %c0_i32_1 = arith.constant 0 : i32
    return %c0_i32, %c0_i32_0 : i32, i32
  }
  func.func @transform_9(%arg0: i32) -> (i32, i32) {
    %c0_i32 = arith.constant 0 : i32
    %c0_i32_0 = arith.constant 0 : i32
    %c0_i32_1 = arith.constant 0 : i32
    return %c0_i32, %c0_i32_0 : i32, i32
  }
  func.func @transform_10(%arg0: i32) -> (i32, i32) {
    %c0_i32 = arith.constant 0 : i32
    %c0_i32_0 = arith.constant 0 : i32
    %c0_i32_1 = arith.constant 0 : i32
    return %c0_i32, %c0_i32_0 : i32, i32
  }
  func.func @transform_11(%arg0: i32) -> (i32, i32) {
    %c0_i32 = arith.constant 0 : i32
    %c0_i32_0 = arith.constant 0 : i32
    %c0_i32_1 = arith.constant 0 : i32
    return %c0_i32, %c0_i32_0 : i32, i32
  }
  func.func @transform_12(%arg0: i32) -> (i32, i32, i32) {
    %c0_i32 = arith.constant 0 : i32
    %c0_i32_0 = arith.constant 0 : i32
    %c0_i32_1 = arith.constant 0 : i32
    return %arg0, %c0_i32, %c0_i32_0 : i32, i32, i32
  }
}

</mosaic_0001>

<bundles_post_ra>
// kernel: gru_model_forward.1
= control target key start
LH: loop header
LB: loop body
LE: loop exit
PB: predicated region body
PF: predicated region fallthrough
CT: control target
= control target key end

     0   :  { %s4156_s1 = inlined_call_operand.vmem [shape: bf16[128,384], index: 1, kind: input, shape index: {}]   ;;  %s4157_s2 = inlined_call_operand.vmem [shape: bf16[128,384], index: 2, kind: input, shape index: {}]   ;;  %s4158_s0 = inlined_call_operand.vmem [shape: bf16[1,64,128], index: 0, kind: input, shape index: {}]   ;;  %s4159_s3 = inlined_call_operand.vmem [shape: f32[1,128], index: 3, kind: input, shape index: {}]   ;;  %s4160_s4 = inlined_call_operand.vmem [shape: bf16[128,384], index: 4, kind: input, shape index: {}]   ;;  %s4161_s5 = inlined_call_operand.vmem [shape: bf16[128,384], index: 5, kind: input, shape index: {}]   ;;  %s4162_s7 = inlined_call_operand.vmem [shape: f32[1,128], index: 7, kind: input, shape index: {}]   ;;  %s4163_s6 = inlined_call_operand.vmem [shape: f32[1,384], index: 6, kind: input, shape index: {}]   ;;  %s4164_s9 = inlined_call_operand.vmem [shape: f32[1,128], index: 9, kind: input, shape index: {}]   ;;  %s4165_s8 = inlined_call_operand.vmem [shape: f32[128,128], index: 8, kind: input, shape index: {}]   ;;  %s4166_s10 = inlined_call_operand.vmem [shape: f32[128,128], index: 10, kind: input, shape index: {}]   ;;  %s4167_s11 = inlined_call_operand.vmem [shape: f32[1,128], index: 11, kind: input, shape index: {}]   ;;  %s4168_s12 = inlined_call_operand.vmem [shape: f32[1,8,128], index: 12, kind: output, shape index: {}]  }
   0x1   :  { %v2156_v0 = vld [vmem:[%s4156_s1 + $0xa8] sm:$0xf]  ;;  %v2480_v1 = vld [vmem:[%s4156_s1 + $0xb0] sm:$0xf0]  ;;  %v2144_v5 = vld [vmem:[%s4156_s1 + $0x90] sm:$0xf] }
   0x2   :  { %v2252_v2 = vld [vmem:[%s4157_s2 + $0xa8] sm:$0xf]  ;;  %v2157_v3 = vor.u32 %v2480_v1, %v2156_v0  ;;  %v2504_v4 = vld [vmem:[%s4157_s2 + $0xb0] sm:$0xf0]  ;;  %v2477_v6 = vld [vmem:[%s4156_s1 + $0x98] sm:$0xf0] }
   0x3   :  { %v2740_v7 = vor.u32 %v2504_v4, %v2252_v2  ;;  %v2240_v8 = vld [vmem:[%s4157_s2 + $0x90] sm:$0xf]  ;;  %v2501_v9 = vld [vmem:[%s4157_s2 + $0x98] sm:$0xf0]  ;;  %v2145_v10 = vor.u32 %v2477_v6, %v2144_v5  ;;  %v2132_v12 = vld [vmem:[%s4156_s1 + $0x78] sm:$0xf] }
   0x4   :  { %234 = vmatpush.bf16.msra.mxu0 %v2157_v3  ;;  %v2749_v11 = vor.u32 %v2501_v9, %v2240_v8  ;;  %v2474_v13 = vld [vmem:[%s4156_s1 + $0x80] sm:$0xf0]  ;;  %v2228_v14 = vld [vmem:[%s4157_s2 + $0x78] sm:$0xf]  ;;  %v2120_v18 = vld [vmem:[%s4156_s1 + $0x60] sm:$0xf] }
   0x5   :  { %515 = vmatpush.bf16.msra.mxu3 %v2740_v7  ;;  %v2498_v15 = vld [vmem:[%s4157_s2 + $0x80] sm:$0xf0]  ;;  %v2133_v16 = vor.u32 %v2474_v13, %v2132_v12  ;;  %v2471_v19 = vld [vmem:[%s4156_s1 + $0x68] sm:$0xf0]  ;;  %v2216_v20 = vld [vmem:[%s4157_s2 + $0x60] sm:$0xf] }
   0x6   :  { %v2764_v17 = vor.u32 %v2498_v15, %v2228_v14  ;;  %v2495_v21 = vld [vmem:[%s4157_s2 + $0x68] sm:$0xf0]  ;;  %v2121_v22 = vor.u32 %v2471_v19, %v2120_v18  ;;  %v2108_v24 = vld [vmem:[%s4156_s1 + $0x48] sm:$0xf]  ;;  %v2468_v25 = vld [vmem:[%s4156_s1 + $0x50] sm:$0xf0] }
   0x7   :  { %v2779_v23 = vor.u32 %v2495_v21, %v2216_v20  ;;  %v2204_v26 = vld [vmem:[%s4157_s2 + $0x48] sm:$0xf]  ;;  %v2492_v27 = vld [vmem:[%s4157_s2 + $0x50] sm:$0xf0]  ;;  %v2109_v28 = vor.u32 %v2468_v25, %v2108_v24  ;;  %v2096_v30 = vld [vmem:[%s4156_s1 + $0x30] sm:$0xf] }
   0x8   :  { %235 = vmatpush.bf16.msra.mxu0 %v2145_v10  ;;  %v2794_v29 = vor.u32 %v2492_v27, %v2204_v26  ;;  %v2465_v31 = vld [vmem:[%s4156_s1 + $0x38] sm:$0xf0]  ;;  %v2192_v32 = vld [vmem:[%s4157_s2 + $0x30] sm:$0xf]  ;;  %v2084_v38 = vld [vmem:[%s4156_s1 + $0x18] sm:$0xf] }
   0x9   :  { %516 = vmatpush.bf16.msra.mxu3 %v2749_v11  ;;  %v2489_v33 = vld [vmem:[%s4157_s2 + $0x38] sm:$0xf0]  ;;  %v2097_v34 = vor.u32 %v2465_v31, %v2096_v30  ;;  %v2164_v35 = vld [vmem:[%s4156_s1 + $0xb0] sm:$0xf]  ;;  %v2462_v39 = vld [vmem:[%s4156_s1 + $0x20] sm:$0xf0] }
   0xa   :  { %v2481_v36 = vld [vmem:[%s4156_s1 + $0xb8] sm:$0xf0]  ;;  %v2815_v37 = vor.u32 %v2489_v33, %v2192_v32  ;;  %v2180_v40 = vld [vmem:[%s4157_s2 + $0x18] sm:$0xf]  ;;  %v2486_v42 = vld [vmem:[%s4157_s2 + $0x20] sm:$0xf0]  ;;  %v2085_v49 = vor.u32 %v2462_v39, %v2084_v38 }
   0xb   :  { %v2165_v41 = vor.u32 %v2481_v36, %v2164_v35  ;;  %v2479_v43 = vld [vmem:[%s4156_s1 + $0xac] sm:$0xf]  ;;  %v2158_v44 = vld [vmem:[%s4156_s1 + $0xb4] sm:$0xf0]  ;;  %v2072_v45 = vld [vmem:[%s4156_s1] sm:$0xf]  ;;  %v2854_v54 = vor.u32 %v2486_v42, %v2180_v40 }
   0xc   :  { %236 = vmatpush.bf16.msra.mxu0 %v2133_v16  ;;  %v2161_v46 = vor.u32 %v2479_v43, %v2158_v44  ;;  %v2152_v47 = vld [vmem:[%s4156_s1 + $0x98] sm:$0xf]  ;;  %v2478_v48 = vld [vmem:[%s4156_s1 + $0xa0] sm:$0xf0]  ;;  %v2459_v50 = vld [vmem:[%s4156_s1 + $0x8] sm:$0xf0] }
   0xd   :  { %517 = vmatpush.bf16.msra.mxu3 %v2764_v17  ;;  %292 = vmatpush.bf16.msra.mxu2 %v2165_v41  ;;  %v2153_v51 = vor.u32 %v2478_v48, %v2152_v47  ;;  %v2476_v52 = vld [vmem:[%s4156_s1 + $0x94] sm:$0xf]  ;;  %v2146_v53 = vld [vmem:[%s4156_s1 + $0x9c] sm:$0xf0]  ;;  %v2475_v58 = vld [vmem:[%s4156_s1 + $0x88] sm:$0xf0]  ;;  %v2073_v1 = vor.u32 %v2459_v50, %v2072_v45 }
   0xe   :  { %v2168_v55 = vld [vmem:[%s4157_s2] sm:$0xf]  ;;  %263 = vmatpush.bf16.msra.mxu1 %v2161_v46  ;;  %v2149_v56 = vor.u32 %v2476_v52, %v2146_v53  ;;  %v2483_v59 = vld [vmem:[%s4157_s2 + $0x8] sm:$0xf0]  ;;  %v2260_v60 = vld [vmem:[%s4157_s2 + $0xb0] sm:$0xf] }
   0xf   :  { %v2140_v57 = vld [vmem:[%s4156_s1 + $0x80] sm:$0xf]  ;;  %v2505_v61 = vld [vmem:[%s4157_s2 + $0xb8] sm:$0xf0]  ;;  %v2503_v62 = vld [vmem:[%s4157_s2 + $0xac] sm:$0xf]  ;;  %v2881_v2 = vor.u32 %v2483_v59, %v2168_v55 }
  0x10   :  { %237 = vmatpush.bf16.msra.mxu0 %v2121_v22  ;;  %v2254_v63 = vld [vmem:[%s4157_s2 + $0xb4] sm:$0xf0]  ;;  %v2141_v0 = vor.u32 %v2475_v58, %v2140_v57  ;;  %v2883_v3 = vor.u32 %v2505_v61, %v2260_v60  ;;  %v2502_v5 = vld [vmem:[%s4157_s2 + $0xa0] sm:$0xf0]  ;;  %v2500_v9 = vld [vmem:[%s4157_s2 + $0x94] sm:$0xf] }
  0x11   :  { %518 = vmatpush.bf16.msra.mxu3 %v2779_v23  ;;  %293 = vmatpush.bf16.msra.mxu2 %v2153_v51  ;;  %v2248_v4 = vld [vmem:[%s4157_s2 + $0x98] sm:$0xf]  ;;  %v2891_v6 = vor.u32 %v2503_v62, %v2254_v63  ;;  %v2896_v8 = vld [vmem:[%s4158_s0] sm:$0xff]  ;;  %v2499_v14 = vld [vmem:[%s4157_s2 + $0x88] sm:$0xf0]  ;;  %v4169_v24 = vmov 0  }
  0x12   :  { %264 = vmatpush.bf16.msra.mxu1 %v2149_v56  ;;  %v2242_v10 = vld [vmem:[%s4157_s2 + $0x9c] sm:$0xf0]  ;;  %v2906_v12 = vor.u32 %v2502_v5, %v2248_v4  ;;  %v2473_v16 = vld [vmem:[%s4156_s1 + $0x7c] sm:$0xf]  ;;  %v2134_v18 = vld [vmem:[%s4156_s1 + $0x84] sm:$0xf0] }
  0x13   :  { %v2236_v13 = vld [vmem:[%s4157_s2 + $0x80] sm:$0xf]  ;;  %v2915_v15 = vor.u32 %v2500_v9, %v2242_v10  ;;  %v2497_v19 = vld [vmem:[%s4157_s2 + $0x7c] sm:$0xf]  ;;  %v2230_v20 = vld [vmem:[%s4157_s2 + $0x84] sm:$0xf0]  ;;  %v2137_v21 = vor.u32 %v2473_v16, %v2134_v18 }
  0x14   :  { %238 = vmatpush.bf16.msra.mxu0 %v2109_v28  ;;  %v2128_v22 = vld [vmem:[%s4156_s1 + $0x68] sm:$0xf]  ;;  %v2472_v25 = vld [vmem:[%s4156_s1 + $0x70] sm:$0xf0]  ;;  %v2938_v26 = vor.u32 %v2499_v14, %v2236_v13  ;;  %v2470_v28 = vld [vmem:[%s4156_s1 + $0x64] sm:$0xf] }
  0x15   :  { %519 = vmatpush.bf16.msra.mxu3 %v2794_v29  ;;  %294 = vmatpush.bf16.msra.mxu2 %v2141_v0  ;;  %v2129_v27 = vor.u32 %v2472_v25, %v2128_v22  ;;  %v2122_v30 = vld [vmem:[%s4156_s1 + $0x6c] sm:$0xf0]  ;;  %v2224_v32 = vld [vmem:[%s4157_s2 + $0x68] sm:$0xf]  ;;  %v2496_v33 = vld [vmem:[%s4157_s2 + $0x70] sm:$0xf0] }
  0x16   :  { %265 = vmatpush.bf16.msra.mxu1 %v2137_v21  ;;  %v2116_v31 = vld [vmem:[%s4156_s1 + $0x50] sm:$0xf]  ;;  %v2125_v35 = vor.u32 %v2470_v28, %v2122_v30  ;;  %v2469_v36 = vld [vmem:[%s4156_s1 + $0x58] sm:$0xf0]  ;;  %v2494_v38 = vld [vmem:[%s4157_s2 + $0x64] sm:$0xf]  ;;  %v2980_v45 = vor.u32 %v2496_v33, %v2224_v32 }
  0x17   :  { %v2218_v39 = vld [vmem:[%s4157_s2 + $0x6c] sm:$0xf0]  ;;  %v2117_v40 = vor.u32 %v2469_v36, %v2116_v31  ;;  %v2467_v41 = vld [vmem:[%s4156_s1 + $0x4c] sm:$0xf]  ;;  %v2110_v42 = vld [vmem:[%s4156_s1 + $0x54] sm:$0xf0] }
  0x18   :  { %239 = vmatpush.bf16.msra.mxu0 %v2097_v34  ;;  %v2956_v34 = vor.u32 %v2497_v19, %v2230_v20  ;;  %v2104_v43 = vld [vmem:[%s4156_s1 + $0x38] sm:$0xf]  ;;  %v2466_v44 = vld [vmem:[%s4156_s1 + $0x40] sm:$0xf0]  ;;  %v2212_v46 = vld [vmem:[%s4157_s2 + $0x50] sm:$0xf]  ;;  %v2113_v47 = vor.u32 %v2467_v41, %v2110_v42  ;;  %v2986_v48 = vor.u32 %v2494_v38, %v2218_v39 }
  0x19   :  { %520 = vmatpush.bf16.msra.mxu3 %v2815_v37  ;;  %295 = vmatpush.bf16.msra.mxu2 %v2129_v27  ;;  %v2464_v50 = vld [vmem:[%s4156_s1 + $0x34] sm:$0xf]  ;;  %v2098_v51 = vld [vmem:[%s4156_s1 + $0x3c] sm:$0xf0]  ;;  %v2491_v52 = vld [vmem:[%s4157_s2 + $0x4c] sm:$0xf]  ;;  %v2105_v55 = vor.u32 %v2466_v44, %v2104_v43 }
  0x1a   :  { %266 = vmatpush.bf16.msra.mxu1 %v2125_v35  ;;  %v2206_v53 = vld [vmem:[%s4157_s2 + $0x54] sm:$0xf0]  ;;  %v2092_v56 = vld [vmem:[%s4156_s1 + $0x20] sm:$0xf]  ;;  %v2463_v57 = vld [vmem:[%s4156_s1 + $0x28] sm:$0xf0]  ;;  %v2101_v59 = vor.u32 %v2464_v50, %v2098_v51 }
  0x1b   :  { %v3013_v60 = vor.u32 %v2491_v52, %v2206_v53  ;;  %v2200_v61 = vld [vmem:[%s4157_s2 + $0x38] sm:$0xf]  ;;  %v2490_v62 = vld [vmem:[%s4157_s2 + $0x40] sm:$0xf0]  ;;  %v3024_v63 = vld [vmem:[%s4158_s0 + $0x8] sm:$0xff]  ;;  %v2093_v4 = vor.u32 %v2463_v57, %v2092_v56 }
  0x1c   :  { %240 = vmatpush.bf16.msra.mxu0 %v2085_v49  ;;  %v2493_v49 = vld [vmem:[%s4157_s2 + $0x58] sm:$0xf0]  ;;  %v2488_v0 = vld [vmem:[%s4157_s2 + $0x34] sm:$0xf]  ;;  %v3033_v5 = vor.u32 %v2490_v62, %v2200_v61  ;;  %v2182_v13 = vld [vmem:[%s4157_s2 + $0x24] sm:$0xf0] }
  0x1d   :  { %521 = vmatpush.bf16.msra.mxu3 %v2854_v54  ;;  %296 = vmatpush.bf16.msra.mxu2 %v2117_v40  ;;  %v3010_v58 = vor.u32 %v2493_v49, %v2212_v46  ;;  %v2485_v9 = vld [vmem:[%s4157_s2 + $0x1c] sm:$0xf]  ;;  %v2086_v16 = vld [vmem:[%s4156_s1 + $0x24] sm:$0xf0]  ;;  %v2188_v18 = vld [vmem:[%s4157_s2 + $0x20] sm:$0xf] }
  0x1e   :  { %267 = vmatpush.bf16.msra.mxu1 %v2113_v47  ;;  %v2461_v14 = vld [vmem:[%s4156_s1 + $0x1c] sm:$0xf]  ;;  %v2487_v19 = vld [vmem:[%s4157_s2 + $0x28] sm:$0xf0]  ;;  %v2080_v21 = vld [vmem:[%s4156_s1 + $0x8] sm:$0xf]  ;;  %v3073_v32 = vor.u32 %v2485_v9, %v2182_v13 }
  0x1f   :  { %v2089_v20 = vor.u32 %v2461_v14, %v2086_v16  ;;  %v2460_v22 = vld [vmem:[%s4156_s1 + $0x10] sm:$0xf0]  ;;  %v2458_v25 = vld [vmem:[%s4156_s1 + $0x4] sm:$0xf]  ;;  %v2074_v27 = vld [vmem:[%s4156_s1 + $0xc] sm:$0xf0]  ;;  %v3070_v28 = vor.u32 %v2487_v19, %v2188_v18 }
  0x20   :  { %241 = vmatpush.bf16.msra.mxu0 %v2073_v1  ;;  %v2194_v1 = vld [vmem:[%s4157_s2 + $0x3c] sm:$0xf0]  ;;  %v2081_v30 = vor.u32 %v2460_v22, %v2080_v21  ;;  %v2077_v31 = vor.u32 %v2458_v25, %v2074_v27  ;;  %v2176_v33 = vld [vmem:[%s4157_s2 + $0x8] sm:$0xf]  ;;  %v2484_v35 = vld [vmem:[%s4157_s2 + $0x10] sm:$0xf0] }
  0x21   :  { %522 = vmatpush.bf16.msra.mxu3 %v2881_v2  ;;  %297 = vmatpush.bf16.msra.mxu2 %v2105_v55  ;;  %v3039_v10 = vor.u32 %v2488_v0, %v2194_v1  ;;  %v2482_v36 = vld [vmem:[%s4157_s2 + $0x4] sm:$0xf]  ;;  %v2170_v38 = vld [vmem:[%s4157_s2 + $0xc] sm:$0xf0]  ;;  %v3089_v39 = vor.u32 %v2484_v35, %v2176_v33 }
  0x22   :  { %268 = vmatpush.bf16.msra.mxu1 %v2101_v59  ;;  %v3092_v40 = vor.u32 %v2482_v36, %v2170_v38  ;;  %v2456_v41 = vld [vmem:[%s4158_s0 + $0x10] sm:$0xff] }
  0x23   :  { %242 = vmatmul.bf16.vlgmr.msra.gmra.mxu0 %v2896_v8 }
  0x24   :  { %541 = vmatpush.bf16.msrb.mxu0 %v2883_v3  ;;  %523 = vmatmul.bf16.vlgmr.msra.gmra.mxu3 %v4169_v24 }
  0x25   :  { %528 = vmatpush.bf16.msrb.mxu3 %v2891_v6  ;;  %298 = vmatpush.bf16.msra.mxu2 %v2093_v4  ;;  %v3188_v4 = vld [vmem:[%s4159_s3] ss:$0 sm:$0xff] }
  0x26   :  { %269 = vmatpush.bf16.msra.mxu1 %v2089_v20 }
  0x28   :  { %542 = vmatpush.bf16.msrb.mxu0 %v2906_v12 }
  0x29   :  { %529 = vmatpush.bf16.msrb.mxu3 %v2915_v15  ;;  %299 = vmatpush.bf16.msra.mxu2 %v2081_v30 }
  0x2a   :  { %270 = vmatpush.bf16.msra.mxu1 %v2077_v31 }
  0x2c   :  { %543 = vmatpush.bf16.msrb.mxu0 %v2938_v26  ;;  %300 = vmatmul.bf16.vlgmr.msra.gmra.mxu2 %v2896_v8 }
  0x2d   :  { %530 = vmatpush.bf16.msrb.mxu3 %v2956_v34  ;;  %592 = vmatpush.bf16.msrb.mxu2 %v2891_v6 }
  0x2e   :  { %579 = vmatpush.bf16.msrb.mxu1 %v2740_v7 }
  0x2f   :  { %271 = vmatmul.bf16.vlgmr.msra.gmra.mxu1 %v2896_v8  ;;  %v2457_v8 = vld [vmem:[%s4158_s0 + $0x18] sm:$0xff] }
  0x30   :  { %544 = vmatpush.bf16.msrb.mxu0 %v2980_v45 }
  0x31   :  { %531 = vmatpush.bf16.msrb.mxu3 %v2986_v48  ;;  %593 = vmatpush.bf16.msrb.mxu2 %v2915_v15 }
  0x32   :  { %580 = vmatpush.bf16.msrb.mxu1 %v2749_v11 }
  0x33   :  { %247 = vmatmul.bf16.gmra.mxu0 %v3024_v63 }
  0x34   :  { %545 = vmatpush.bf16.msrb.mxu0 %v3010_v58 }
  0x35   :  { %532 = vmatpush.bf16.msrb.mxu3 %v3013_v60  ;;  %594 = vmatpush.bf16.msrb.mxu2 %v2956_v34 }
  0x36   :  { %581 = vmatpush.bf16.msrb.mxu1 %v2764_v17 }
  0x38   :  { %546 = vmatpush.bf16.msrb.mxu0 %v3033_v5 }
  0x39   :  { %533 = vmatpush.bf16.msrb.mxu3 %v3039_v10  ;;  %595 = vmatpush.bf16.msrb.mxu2 %v2986_v48 }
  0x3a   :  { %582 = vmatpush.bf16.msrb.mxu1 %v2779_v23 }
  0x3c   :  { %547 = vmatpush.bf16.msrb.mxu0 %v3070_v28  ;;  %305 = vmatmul.bf16.gmra.mxu2 %v3024_v63 }
  0x3d   :  { %534 = vmatpush.bf16.msrb.mxu3 %v3073_v32  ;;  %596 = vmatpush.bf16.msrb.mxu2 %v3013_v60 }
  0x3e   :  { %583 = vmatpush.bf16.msrb.mxu1 %v2794_v29 }
  0x3f   :  { %276 = vmatmul.bf16.gmra.mxu1 %v3024_v63 }
  0x40   :  { %548 = vmatpush.bf16.msrb.mxu0 %v3089_v39 }
  0x41   :  { %535 = vmatpush.bf16.msrb.mxu3 %v3092_v40  ;;  %597 = vmatpush.bf16.msrb.mxu2 %v3039_v10 }
  0x42   :  { %584 = vmatpush.bf16.msrb.mxu1 %v2815_v37 }
  0x43   :  { %252 = vmatmul.bf16.gmra.mxu0 %v2456_v41 }
  0x44   :  { %644 = vmatpush.bf16.msra.mxu0 %v2740_v7  ;;  %536 = vmatmul.bf16.vlgmr.msrb.gmra.mxu3 %v4169_v24 }
  0x45   :  { %605 = vmatpush.bf16.msra.mxu3 %v2883_v3  ;;  %598 = vmatpush.bf16.msrb.mxu2 %v3073_v32 }
  0x46   :  { %585 = vmatpush.bf16.msrb.mxu1 %v2854_v54 }
  0x48   :  { %645 = vmatpush.bf16.msra.mxu0 %v2749_v11 }
  0x49   :  { %606 = vmatpush.bf16.msra.mxu3 %v2906_v12  ;;  %599 = vmatpush.bf16.msrb.mxu2 %v3092_v40 }
  0x4a   :  { %586 = vmatpush.bf16.msrb.mxu1 %v2881_v2 }
  0x4c   :  { %646 = vmatpush.bf16.msra.mxu0 %v2764_v17  ;;  %310 = vmatmul.bf16.gmra.mxu2 %v2456_v41 }
  0x4d   :  { %607 = vmatpush.bf16.msra.mxu3 %v2938_v26  ;;  %670 = vmatpush.bf16.msra.mxu2 %v2883_v3 }
  0x4e   :  { %657 = vmatpush.bf16.msra.mxu1 %v2891_v6 }
  0x4f   :  { %281 = vmatmul.bf16.gmra.mxu1 %v2456_v41 }
  0x50   :  { %647 = vmatpush.bf16.msra.mxu0 %v2779_v23 }
  0x51   :  { %608 = vmatpush.bf16.msra.mxu3 %v2980_v45  ;;  %671 = vmatpush.bf16.msra.mxu2 %v2906_v12 }
  0x52   :  { %658 = vmatpush.bf16.msra.mxu1 %v2915_v15 }
  0x53   :  { %257 = vmatmul.bf16.gmra.mxu0 %v2457_v8 }
  0x54   :  { %648 = vmatpush.bf16.msra.mxu0 %v2794_v29 }
  0x55   :  { %609 = vmatpush.bf16.msra.mxu3 %v3010_v58  ;;  %672 = vmatpush.bf16.msra.mxu2 %v2938_v26 }
  0x56   :  { %659 = vmatpush.bf16.msra.mxu1 %v2956_v34 }
  0x58   :  { %649 = vmatpush.bf16.msra.mxu0 %v2815_v37 }
  0x59   :  { %610 = vmatpush.bf16.msra.mxu3 %v3033_v5  ;;  %673 = vmatpush.bf16.msra.mxu2 %v2980_v45 }
  0x5a   :  { %660 = vmatpush.bf16.msra.mxu1 %v2986_v48 }
  0x5c   :  { %650 = vmatpush.bf16.msra.mxu0 %v2854_v54  ;;  %315 = vmatmul.bf16.gmra.mxu2 %v2457_v8 }
  0x5d   :  { %611 = vmatpush.bf16.msra.mxu3 %v3070_v28  ;;  %674 = vmatpush.bf16.msra.mxu2 %v3010_v58 }
  0x5e   :  { %661 = vmatpush.bf16.msra.mxu1 %v3013_v60 }
  0x5f   :  { %286 = vmatmul.bf16.gmra.mxu1 %v2457_v8 }
  0x60   :  { %651 = vmatpush.bf16.msra.mxu0 %v2881_v2 }
  0x61   :  { %612 = vmatpush.bf16.msra.mxu3 %v3089_v39  ;;  %675 = vmatpush.bf16.msra.mxu2 %v3033_v5 }
  0x62   :  { %662 = vmatpush.bf16.msra.mxu1 %v3039_v10 }
  0x63   :  { %549 = vmatmul.bf16.vlgmr.msrb.gmra.mxu0 %v4169_v24 }
  0x64   :  { %722 = vmatpush.bf16.msrb.mxu0 %v2891_v6 }
  0x65   :  { %709 = vmatpush.bf16.msrb.mxu3 %v2740_v7  ;;  %676 = vmatpush.bf16.msra.mxu2 %v3070_v28 }
  0x66   :  { %663 = vmatpush.bf16.msra.mxu1 %v3073_v32 }
  0x68   :  { %723 = vmatpush.bf16.msrb.mxu0 %v2915_v15 }
  0x69   :  { %710 = vmatpush.bf16.msrb.mxu3 %v2749_v11  ;;  %677 = vmatpush.bf16.msra.mxu2 %v3089_v39 }
  0x6a   :  { %664 = vmatpush.bf16.msra.mxu1 %v3092_v40 }
  0x6c   :  { %724 = vmatpush.bf16.msrb.mxu0 %v2956_v34 }
  0x6d   :  { %711 = vmatpush.bf16.msrb.mxu3 %v2764_v17 }
  0x70   :  { %725 = vmatpush.bf16.msrb.mxu0 %v2986_v48 }
  0x71   :  { %712 = vmatpush.bf16.msrb.mxu3 %v2779_v23 }
  0x74   :  { %726 = vmatpush.bf16.msrb.mxu0 %v3013_v60 }
  0x75   :  { %713 = vmatpush.bf16.msrb.mxu3 %v2794_v29 }
  0x78   :  { %727 = vmatpush.bf16.msrb.mxu0 %v3039_v10 }
  0x79   :  { %714 = vmatpush.bf16.msrb.mxu3 %v2815_v37 }
  0x7c   :  { %728 = vmatpush.bf16.msrb.mxu0 %v3073_v32 }
  0x7d   :  { %715 = vmatpush.bf16.msrb.mxu3 %v2854_v54 }
  0x80   :  { %729 = vmatpush.bf16.msrb.mxu0 %v3092_v40 }
  0x81   :  { %716 = vmatpush.bf16.msrb.mxu3 %v2881_v2 }
  0xa0   :  { %v243_v42 = vpop.f32.mrf.mxu0 }
  0xa7   :  { %v524_v43 = vpop.f32.mrf.mxu3 }
  0xa8   :  { %v3171_v44 = vpop.f32.mrf.mxu0  ;;  %v554_v53 = vadd.f32 %v524_v43, %v243_v42 }
  0xaa   :  { %v555_v56 = vmul.f32 0.5, %v554_v53 }
  0xac   :  { %2559 = vtanh.f32 %v555_v56  ;;  %v272_v59 = vpop.f32.mrf.mxu1 }
  0xaf   :  { %v526_v46 = vpop.f32.mrf.mxu3  ;;  %v301_v18 = vpop.f32.mrf.mxu2 }
  0xb0   :  { %v3173_v47 = vpop.f32.mrf.mxu0 }
  0xb2   :  { %v2560_v63 = vpop.eup %2559 }
  0xb3   :  { %v557_v1 = vmul.f32 0.5, %v2560_v63 }
  0xb4   :  { %v274_v36 = vpop.f32.mrf.mxu1 }
  0xb5   :  { %v558_v13 = vadd.f32 0.5, %v557_v1 }
  0xb7   :  { %v303_v38 = vpop.f32.mrf.mxu2 }
  0xb8   :  { %v3175_v49 = vpop.f32.mrf.mxu0 }
  0xbc   :  { %v3219_v41 = vpop.f32.mrf.mxu1 }
  0xbf   :  { %v3221_v8 = vpop.f32.mrf.mxu2 }
  0xc0   :  { %v3177_v50 = vpop.f32.mrf.mxu0 }
  0xc4   :  { %v3223_v42 = vpop.f32.mrf.mxu1 }
  0xc7   :  { %v537_v51 = vpop.f32.mrf.mxu3  ;;  %v3225_v43 = vpop.f32.mrf.mxu2 }
  0xc8   :  { %v3179_v52 = vpop.f32.mrf.mxu0  ;;  %v559_v61 = vadd.f32 %v537_v51, %v272_v59 }
  0xca   :  { %v560_v0 = vmul.f32 0.5, %v559_v61 }
  0xcc   :  { %2561 = vtanh.f32 %v560_v0  ;;  %v3227_v46 = vpop.f32.mrf.mxu1 }
  0xcf   :  { %v539_v55 = vpop.f32.mrf.mxu3  ;;  %v3229_v51 = vpop.f32.mrf.mxu2 }
  0xd0   :  { %v3181_v57 = vpop.f32.mrf.mxu0 }
  0xd2   :  { %v2562_v19 = vpop.eup %2561 }
  0xd3   :  { %v562_v21 = vmul.f32 0.5, %v2562_v19 }
  0xd4   :  { %v3231_v53 = vpop.f32.mrf.mxu1 }
  0xd5   :  { %v563_v25 = vadd.f32 0.5, %v562_v21 }
  0xd7   :  { %v3233_v55 = vpop.f32.mrf.mxu2 }
  0xd8   :  { %v3183_v62 = vpop.f32.mrf.mxu0 }
  0xdc   :  { %v3235_v56 = vpop.f32.mrf.mxu1 }
  0xdf   :  { %v3237_v59 = vpop.f32.mrf.mxu2 }
  0xe0   :  { %v550_v9 = vpop.f32.mrf.mxu0 }
  0xe1   :  { %v564_v14 = vadd.f32 %v3188_v4, %v550_v9 }
  0xe3   :  { %v565_v16 = vmul.f32 %v564_v14, %v558_v13 }
  0xe4   :  { %v3239_v61 = vpop.f32.mrf.mxu1 }
  0xe5   :  { %v566_v20 = vadd.f32 %v565_v16, %v301_v18 }
  0xe7   :  { %2563 = vtanh.f32 %v566_v20  ;;  %v3241_v63 = vpop.f32.mrf.mxu2 }
  0xe8   :  { %v552_v22 = vpop.f32.mrf.mxu0 }
  0xed   :  { %v2564_v27 = vpop.eup %2563 }
  0xee   :  { %v568_v30 = vsub.f32 0.0, %v2564_v27 }
  0xf0   :  { %v569_v31 = vmul.f32 %v568_v30, %v563_v25 }
  0xf2   :  { %v3191_v33 = vadd.f32 %v2564_v27, %v569_v31 }
  0xf4   :  { %v578_v35 = vpack.c.bf16 %v3191_v33, %v3191_v33 }
  0xf6   :  { %587 = vmatmul.bf16.vlgmr.msrb.gmra.mxu1 %v578_v35  ;;  %600 = vmatmul.bf16.vlgmr.msrb.gmra.mxu2 %v578_v35 }
  0xf7   :  { %613 = vmatmul.bf16.vlgmr.msra.gmra.mxu3 %v578_v35  ;;  %735 = vmatpush.bf16.msrb.mxu1 %v2883_v3 }
  0xf8   :  { %774 = vmatpush.bf16.msrb.mxu2 %v2740_v7  ;;  %787 = vmatpush.bf16.msra.mxu3 %v2891_v6 }
  0xfb   :  { %736 = vmatpush.bf16.msrb.mxu1 %v2906_v12 }
  0xfc   :  { %775 = vmatpush.bf16.msrb.mxu2 %v2749_v11  ;;  %788 = vmatpush.bf16.msra.mxu3 %v2915_v15 }
  0xff   :  { %737 = vmatpush.bf16.msrb.mxu1 %v2938_v26 }
 0x100   :  { %776 = vmatpush.bf16.msrb.mxu2 %v2764_v17  ;;  %789 = vmatpush.bf16.msra.mxu3 %v2956_v34 }
 0x103   :  { %738 = vmatpush.bf16.msrb.mxu1 %v2980_v45 }
 0x104   :  { %777 = vmatpush.bf16.msrb.mxu2 %v2779_v23  ;;  %790 = vmatpush.bf16.msra.mxu3 %v2986_v48 }
 0x107   :  { %739 = vmatpush.bf16.msrb.mxu1 %v3010_v58 }
 0x108   :  { %778 = vmatpush.bf16.msrb.mxu2 %v2794_v29  ;;  %791 = vmatpush.bf16.msra.mxu3 %v3013_v60 }
 0x10b   :  { %740 = vmatpush.bf16.msrb.mxu1 %v3033_v5 }
 0x10c   :  { %779 = vmatpush.bf16.msrb.mxu2 %v2815_v37  ;;  %792 = vmatpush.bf16.msra.mxu3 %v3039_v10 }
 0x10f   :  { %741 = vmatpush.bf16.msrb.mxu1 %v3070_v28 }
 0x110   :  { %780 = vmatpush.bf16.msrb.mxu2 %v2854_v54  ;;  %793 = vmatpush.bf16.msra.mxu3 %v3073_v32 }
 0x113   :  { %742 = vmatpush.bf16.msrb.mxu1 %v3089_v39 }
 0x114   :  { %781 = vmatpush.bf16.msrb.mxu2 %v2881_v2  ;;  %794 = vmatpush.bf16.msra.mxu3 %v3092_v40 }
 0x173   :  { %v588_v0 = vpop.f32.mrf.mxu1 }
 0x174   :  { %v618_v1 = vadd.f32 %v588_v0, %v3171_v44 }
 0x176   :  { %v619_v9 = vmul.f32 0.5, %v618_v1 }
 0x178   :  { %2565 = vtanh.f32 %v619_v9 }
 0x179   :  { %v601_v13 = vpop.f32.mrf.mxu2 }
 0x17a   :  { %v623_v14 = vadd.f32 %v601_v13, %v274_v36  ;;  %v614_v16 = vpop.f32.mrf.mxu3 }
 0x17b   :  { %v590_v18 = vpop.f32.mrf.mxu1  ;;  %v628_v25 = vadd.f32 %v3188_v4, %v614_v16 }
 0x17c   :  { %v624_v19 = vmul.f32 0.5, %v623_v14 }
 0x17e   :  { %v2566_v20 = vpop.eup %2565  ;;  %2567 = vtanh.f32 %v624_v19 }
 0x17f   :  { %v621_v21 = vmul.f32 0.5, %v2566_v20 }
 0x181   :  { %v622_v22 = vadd.f32 0.5, %v621_v21  ;;  %v603_v27 = vpop.f32.mrf.mxu2 }
 0x182   :  { %v616_v30 = vpop.f32.mrf.mxu3 }
 0x183   :  { %v629_v31 = vmul.f32 %v628_v25, %v622_v22 }
 0x184   :  { %v2568_v24 = vpop.eup %2567 }
 0x185   :  { %v630_v35 = vadd.f32 %v629_v31, %v303_v38  ;;  %v626_v44 = vmul.f32 0.5, %v2568_v24 }
 0x187   :  { %2569 = vtanh.f32 %v630_v35  ;;  %v627_v1 = vadd.f32 0.5, %v626_v44 }
 0x18d   :  { %v2570_v0 = vpop.eup %2569 }
 0x18e   :  { %v632_v36 = vsub.f32 %v3191_v33, %v2570_v0 }
 0x190   :  { %v633_v9 = vmul.f32 %v632_v36, %v627_v1 }
 0x192   :  { %v3246_v13 = vadd.f32 %v2570_v0, %v633_v9 }
 0x194   :  { %v643_v14 = vpack.c.bf16 %v3246_v13, %v3246_v13 }
 0x196   :  { %652 = vmatmul.bf16.vlgmr.msra.gmra.mxu0 %v643_v14  ;;  %665 = vmatmul.bf16.vlgmr.msra.gmra.mxu1 %v643_v14 }
 0x197   :  { %678 = vmatmul.bf16.vlgmr.msra.gmra.mxu2 %v643_v14  ;;  %800 = vmatpush.bf16.msra.mxu0 %v2883_v3 }
 0x198   :  { %839 = vmatpush.bf16.msra.mxu1 %v2740_v7  ;;  %852 = vmatpush.bf16.msra.mxu2 %v2891_v6 }
 0x19b   :  { %801 = vmatpush.bf16.msra.mxu0 %v2906_v12 }
 0x19c   :  { %840 = vmatpush.bf16.msra.mxu1 %v2749_v11  ;;  %853 = vmatpush.bf16.msra.mxu2 %v2915_v15 }
 0x19f   :  { %802 = vmatpush.bf16.msra.mxu0 %v2938_v26 }
 0x1a0   :  { %841 = vmatpush.bf16.msra.mxu1 %v2764_v17  ;;  %854 = vmatpush.bf16.msra.mxu2 %v2956_v34 }
 0x1a3   :  { %803 = vmatpush.bf16.msra.mxu0 %v2980_v45 }
 0x1a4   :  { %842 = vmatpush.bf16.msra.mxu1 %v2779_v23  ;;  %855 = vmatpush.bf16.msra.mxu2 %v2986_v48 }
 0x1a7   :  { %804 = vmatpush.bf16.msra.mxu0 %v3010_v58 }
 0x1a8   :  { %843 = vmatpush.bf16.msra.mxu1 %v2794_v29  ;;  %856 = vmatpush.bf16.msra.mxu2 %v3013_v60 }
 0x1ab   :  { %805 = vmatpush.bf16.msra.mxu0 %v3033_v5 }
 0x1ac   :  { %844 = vmatpush.bf16.msra.mxu1 %v2815_v37  ;;  %857 = vmatpush.bf16.msra.mxu2 %v3039_v10 }
 0x1af   :  { %806 = vmatpush.bf16.msra.mxu0 %v3070_v28 }
 0x1b0   :  { %845 = vmatpush.bf16.msra.mxu1 %v2854_v54  ;;  %858 = vmatpush.bf16.msra.mxu2 %v3073_v32 }
 0x1b3   :  { %807 = vmatpush.bf16.msra.mxu0 %v3089_v39 }
 0x1b4   :  { %846 = vmatpush.bf16.msra.mxu1 %v2881_v2  ;;  %859 = vmatpush.bf16.msra.mxu2 %v3092_v40 }
 0x213   :  { %v653_v24 = vpop.f32.mrf.mxu0  ;;  %v666_v38 = vpop.f32.mrf.mxu1 }
 0x214   :  { %v683_v16 = vadd.f32 %v653_v24, %v3173_v47  ;;  %v688_v19 = vadd.f32 %v666_v38, %v3219_v41 }
 0x216   :  { %v684_v18 = vmul.f32 0.5, %v683_v16  ;;  %v689_v25 = vmul.f32 0.5, %v688_v19 }
 0x218   :  { %2571 = vtanh.f32 %v684_v18 }
 0x219   :  { %2573 = vtanh.f32 %v689_v25 }
 0x21a   :  { %v679_v20 = vpop.f32.mrf.mxu2 }
 0x21b   :  { %v655_v21 = vpop.f32.mrf.mxu0  ;;  %v668_v22 = vpop.f32.mrf.mxu1  ;;  %v693_v35 = vadd.f32 %v3188_v4, %v679_v20 }
 0x21e   :  { %v2572_v27 = vpop.eup %2571 }
 0x21f   :  { %v686_v30 = vmul.f32 0.5, %v2572_v27  ;;  %v2574_v36 = vpop.eup %2573 }
 0x220   :  { %v691_v47 = vmul.f32 0.5, %v2574_v36 }
 0x221   :  { %v687_v31 = vadd.f32 0.5, %v686_v30 }
 0x222   :  { %v681_v44 = vpop.f32.mrf.mxu2  ;;  %v692_v14 = vadd.f32 0.5, %v691_v47 }
 0x223   :  { %v694_v0 = vmul.f32 %v693_v35, %v687_v31 }
 0x225   :  { %v695_v1 = vadd.f32 %v694_v0, %v3221_v8 }
 0x227   :  { %2575 = vtanh.f32 %v695_v1 }
 0x22d   :  { %v2576_v9 = vpop.eup %2575 }
 0x22e   :  { %v697_v41 = vsub.f32 %v3246_v13, %v2576_v9 }
 0x230   :  { %v698_v24 = vmul.f32 %v697_v41, %v692_v14 }
 0x232   :  { %v3279_v38 = vadd.f32 %v2576_v9, %v698_v24 }
 0x234   :  { %v708_v16 = vpack.c.bf16 %v3279_v38, %v3279_v38 }
 0x236   :  { %717 = vmatmul.bf16.vlgmr.msrb.gmra.mxu3 %v708_v16  ;;  %730 = vmatmul.bf16.vlgmr.msrb.gmra.mxu0 %v708_v16 }
 0x237   :  { %743 = vmatmul.bf16.vlgmr.msrb.gmra.mxu1 %v708_v16  ;;  %865 = vmatpush.bf16.msrb.mxu3 %v2883_v3 }
 0x238   :  { %904 = vmatpush.bf16.msrb.mxu0 %v2740_v7  ;;  %917 = vmatpush.bf16.msrb.mxu1 %v2891_v6 }
 0x23b   :  { %866 = vmatpush.bf16.msrb.mxu3 %v2906_v12 }
 0x23c   :  { %905 = vmatpush.bf16.msrb.mxu0 %v2749_v11  ;;  %918 = vmatpush.bf16.msrb.mxu1 %v2915_v15 }
 0x23f   :  { %867 = vmatpush.bf16.msrb.mxu3 %v2938_v26 }
 0x240   :  { %906 = vmatpush.bf16.msrb.mxu0 %v2764_v17  ;;  %919 = vmatpush.bf16.msrb.mxu1 %v2956_v34 }
 0x243   :  { %868 = vmatpush.bf16.msrb.mxu3 %v2980_v45 }
 0x244   :  { %907 = vmatpush.bf16.msrb.mxu0 %v2779_v23  ;;  %920 = vmatpush.bf16.msrb.mxu1 %v2986_v48 }
 0x247   :  { %869 = vmatpush.bf16.msrb.mxu3 %v3010_v58 }
 0x248   :  { %908 = vmatpush.bf16.msrb.mxu0 %v2794_v29  ;;  %921 = vmatpush.bf16.msrb.mxu1 %v3013_v60 }
 0x24b   :  { %870 = vmatpush.bf16.msrb.mxu3 %v3033_v5 }
 0x24c   :  { %909 = vmatpush.bf16.msrb.mxu0 %v2815_v37  ;;  %922 = vmatpush.bf16.msrb.mxu1 %v3039_v10 }
 0x24f   :  { %871 = vmatpush.bf16.msrb.mxu3 %v3070_v28 }
 0x250   :  { %910 = vmatpush.bf16.msrb.mxu0 %v2854_v54  ;;  %923 = vmatpush.bf16.msrb.mxu1 %v3073_v32 }
 0x253   :  { %872 = vmatpush.bf16.msrb.mxu3 %v3089_v39 }
 0x254   :  { %911 = vmatpush.bf16.msrb.mxu0 %v2881_v2  ;;  %924 = vmatpush.bf16.msrb.mxu1 %v3092_v40 }
 0x2b3   :  { %v731_v8 = vpop.f32.mrf.mxu0 }
 0x2b4   :  { %v744_v18 = vpop.f32.mrf.mxu1  ;;  %v753_v27 = vadd.f32 %v731_v8, %v3223_v42 }
 0x2b5   :  { %v758_v0 = vadd.f32 %v3188_v4, %v744_v18 }
 0x2b6   :  { %v754_v31 = vmul.f32 0.5, %v753_v27  ;;  %v2519_v27 = vld [vmem:[%s4160_s4 + $0x68] sm:$0xf0] }
 0x2b9   :  { %v718_v19 = vpop.f32.mrf.mxu3 }
 0x2ba   :  { %v748_v20 = vadd.f32 %v718_v19, %v3175_v49 }
 0x2bb   :  { %v733_v21 = vpop.f32.mrf.mxu0 }
 0x2bc   :  { %v749_v22 = vmul.f32 0.5, %v748_v20  ;;  %v746_v25 = vpop.f32.mrf.mxu1 }
 0x2bd   :  { %v2312_v25 = vld [vmem:[%s4160_s4 + $0x60] sm:$0xf] }
 0x2be   :  { %2577 = vtanh.f32 %v749_v22 }
 0x2bf   :  { %2579 = vtanh.f32 %v754_v31 }
 0x2c1   :  { %v720_v30 = vpop.f32.mrf.mxu3 }
 0x2c2   :  { %v2313_v30 = vor.u32 %v2519_v27, %v2312_v25  ;;  %v2529_v27 = vld [vmem:[%s4160_s4 + $0xb8] sm:$0xf0] }
 0x2c4   :  { %v2578_v35 = vpop.eup %2577 }
 0x2c5   :  { %v751_v44 = vmul.f32 0.5, %v2578_v35  ;;  %v2580_v9 = vpop.eup %2579 }
 0x2c6   :  { %v756_v49 = vmul.f32 0.5, %v2580_v9  ;;  %v2513_v9 = vld [vmem:[%s4160_s4 + $0x38] sm:$0xf0] }
 0x2c7   :  { %v752_v1 = vadd.f32 0.5, %v751_v44  ;;  %v2300_v44 = vld [vmem:[%s4160_s4 + $0x48] sm:$0xf] }
 0x2c8   :  { %v757_v41 = vadd.f32 0.5, %v756_v49 }
 0x2c9   :  { %v759_v36 = vmul.f32 %v758_v0, %v752_v1  ;;  %v2516_v0 = vld [vmem:[%s4160_s4 + $0x50] sm:$0xf0] }
 0x2cb   :  { %v760_v47 = vadd.f32 %v759_v36, %v3225_v43  ;;  %v2301_v36 = vor.u32 %v2516_v0, %v2300_v44  ;;  %v2524_v0 = vld [vmem:[%s4160_s4 + $0x94] sm:$0xf] }
 0x2cd   :  { %2581 = vtanh.f32 %v760_v47  ;;  %v2288_v47 = vld [vmem:[%s4160_s4 + $0x30] sm:$0xf] }
 0x2d3   :  { %v2582_v14 = vpop.eup %2581 }
 0x2d4   :  { %v762_v24 = vsub.f32 %v3279_v38, %v2582_v14 }
 0x2d6   :  { %v763_v16 = vmul.f32 %v762_v24, %v757_v41  ;;  %v2510_v41 = vld [vmem:[%s4160_s4 + $0x20] sm:$0xf0] }
 0x2d8   :  { %v3312_v42 = vadd.f32 %v2582_v14, %v763_v16  ;;  %v2276_v14 = vld [vmem:[%s4160_s4 + $0x18] sm:$0xf] }
 0x2da   :  { %v773_v8 = vpack.c.bf16 %v3312_v42, %v3312_v42 }
 0x2dc   :  { %782 = vmatmul.bf16.vlgmr.msrb.gmra.mxu2 %v773_v8  ;;  %795 = vmatmul.bf16.vlgmr.msra.gmra.mxu3 %v773_v8 }
 0x2dd   :  { %808 = vmatmul.bf16.vlgmr.msra.gmra.mxu0 %v773_v8  ;;  %930 = vmatpush.bf16.msrb.mxu2 %v2883_v3 }
 0x2de   :  { %969 = vmatpush.bf16.msra.mxu3 %v2740_v7  ;;  %982 = vmatpush.bf16.msra.mxu0 %v2891_v6 }
 0x2e1   :  { %931 = vmatpush.bf16.msrb.mxu2 %v2906_v12 }
 0x2e2   :  { %970 = vmatpush.bf16.msra.mxu3 %v2749_v11  ;;  %983 = vmatpush.bf16.msra.mxu0 %v2915_v15 }
 0x2e5   :  { %932 = vmatpush.bf16.msrb.mxu2 %v2938_v26 }
 0x2e6   :  { %971 = vmatpush.bf16.msra.mxu3 %v2764_v17  ;;  %984 = vmatpush.bf16.msra.mxu0 %v2956_v34 }
 0x2e9   :  { %933 = vmatpush.bf16.msrb.mxu2 %v2980_v45 }
 0x2ea   :  { %972 = vmatpush.bf16.msra.mxu3 %v2779_v23  ;;  %985 = vmatpush.bf16.msra.mxu0 %v2986_v48 }
 0x2ed   :  { %934 = vmatpush.bf16.msrb.mxu2 %v3010_v58 }
 0x2ee   :  { %973 = vmatpush.bf16.msra.mxu3 %v2794_v29  ;;  %986 = vmatpush.bf16.msra.mxu0 %v3013_v60 }
 0x2f1   :  { %935 = vmatpush.bf16.msrb.mxu2 %v3033_v5 }
 0x2f2   :  { %974 = vmatpush.bf16.msra.mxu3 %v2815_v37  ;;  %987 = vmatpush.bf16.msra.mxu0 %v3039_v10 }
 0x2f5   :  { %936 = vmatpush.bf16.msrb.mxu2 %v3070_v28 }
 0x2f6   :  { %975 = vmatpush.bf16.msra.mxu3 %v2854_v54  ;;  %988 = vmatpush.bf16.msra.mxu0 %v3073_v32 }
 0x2f9   :  { %937 = vmatpush.bf16.msrb.mxu2 %v3089_v39 }
 0x2fa   :  { %976 = vmatpush.bf16.msra.mxu3 %v2881_v2  ;;  %989 = vmatpush.bf16.msra.mxu0 %v3092_v40 }
 0x35a   :  { %v809_v7 = vpop.f32.mrf.mxu0 }
 0x35b   :  { %v823_v10 = vadd.f32 %v3188_v4, %v809_v7  ;;  %v2277_v7 = vor.u32 %v2510_v41, %v2276_v14  ;;  %v2537_v14 = vld [vmem:[%s4161_s5 + $0x38] sm:$0xf0] }
 0x35f   :  { %v783_v11 = vpop.f32.mrf.mxu2  ;;  %v796_v17 = vpop.f32.mrf.mxu3 }
 0x360   :  { %v813_v23 = vadd.f32 %v783_v11, %v3177_v50  ;;  %v818_v6 = vadd.f32 %v796_v17, %v3227_v46  ;;  %v2264_v17 = vld [vmem:[%s4160_s4] sm:$0xf] }
 0x362   :  { %v814_v29 = vmul.f32 0.5, %v813_v23  ;;  %v811_v37 = vpop.f32.mrf.mxu0  ;;  %v819_v34 = vmul.f32 0.5, %v818_v6  ;;  %v2507_v23 = vld [vmem:[%s4160_s4 + $0x8] sm:$0xf0] }
 0x363   :  { %v2265_v6 = vor.u32 %v2507_v23, %v2264_v17  ;;  %v2372_v23 = vld [vmem:[%s4161_s5 + $0x18] sm:$0xf] }
 0x364   :  { %2583 = vtanh.f32 %v814_v29 }
 0x365   :  { %2585 = vtanh.f32 %v819_v34 }
 0x367   :  { %v785_v15 = vpop.f32.mrf.mxu2  ;;  %v798_v54 = vpop.f32.mrf.mxu3 }
 0x36a   :  { %v2584_v48 = vpop.eup %2583 }
 0x36b   :  { %v816_v60 = vmul.f32 0.5, %v2584_v48  ;;  %v2586_v43 = vpop.eup %2585 }
 0x36c   :  { %v821_v50 = vmul.f32 0.5, %v2586_v43 }
 0x36d   :  { %v817_v2 = vadd.f32 0.5, %v816_v60 }
 0x36e   :  { %v822_v19 = vadd.f32 0.5, %v821_v50 }
 0x36f   :  { %v824_v32 = vmul.f32 %v823_v10, %v817_v2 }
 0x371   :  { %v825_v40 = vadd.f32 %v824_v32, %v3229_v51  ;;  %v2348_v51 = vld [vmem:[%s4160_s4 + $0xa8] sm:$0xf] }
 0x373   :  { %2587 = vtanh.f32 %v825_v40 }
 0x379   :  { %v2588_v18 = vpop.eup %2587 }
 0x37a   :  { %v827_v20 = vsub.f32 %v3312_v42, %v2588_v18 }
 0x37c   :  { %v828_v46 = vmul.f32 %v827_v20, %v822_v19  ;;  %v3416_v20 = vpack.c.bf16 %v3246_v13, %v3191_v33  ;;  %v2552_v33 = vld [vmem:[%s4161_s5 + $0xb0] sm:$0xf0] }
 0x37e   :  { %v3345_v21 = vadd.f32 %v2588_v18, %v828_v46 }
 0x380   :  { %v838_v22 = vpack.c.bf16 %v3345_v21, %v3345_v21 }
 0x382   :  { %847 = vmatmul.bf16.vlgmr.msra.gmra.mxu1 %v838_v22  ;;  %860 = vmatmul.bf16.vlgmr.msra.gmra.mxu2 %v838_v22 }
 0x383   :  { %873 = vmatmul.bf16.vlgmr.msrb.gmra.mxu3 %v838_v22  ;;  %995 = vmatpush.bf16.msra.mxu1 %v2883_v3  ;;  %v2528_v3 = vld [vmem:[%s4160_s4 + $0xb0] sm:$0xf0]  ;;  %v2444_v22 = vld [vmem:[%s4161_s5 + $0xa8] sm:$0xf] }
 0x384   :  { %v3435_v13 = vor.u32 %v2552_v33, %v2444_v22 }
 0x387   :  { %996 = vmatpush.bf16.msra.mxu1 %v2906_v12  ;;  %v2349_v12 = vor.u32 %v2528_v3, %v2348_v51  ;;  %v2420_v51 = vld [vmem:[%s4161_s5 + $0x78] sm:$0xf]  ;;  %v2546_v3 = vld [vmem:[%s4161_s5 + $0x80] sm:$0xf0] }
 0x389   :  { %1207 = vmatpush.bf16.msra.mxu2 %v2349_v12  ;;  %v3453_v12 = vor.u32 %v2546_v3, %v2420_v51  ;;  %v2512_v3 = vld [vmem:[%s4160_s4 + $0x34] sm:$0xf] }
 0x38b   :  { %997 = vmatpush.bf16.msra.mxu1 %v2938_v26  ;;  %v2336_v26 = vld [vmem:[%s4160_s4 + $0x90] sm:$0xf] }
 0x38f   :  { %998 = vmatpush.bf16.msra.mxu1 %v2980_v45  ;;  %v2525_v45 = vld [vmem:[%s4160_s4 + $0x98] sm:$0xf0] }
 0x393   :  { %999 = vmatpush.bf16.msra.mxu1 %v3010_v58  ;;  %v2337_v58 = vor.u32 %v2525_v45, %v2336_v26  ;;  %v2408_v26 = vld [vmem:[%s4161_s5 + $0x60] sm:$0xf]  ;;  %v2543_v45 = vld [vmem:[%s4161_s5 + $0x68] sm:$0xf0] }
 0x395   :  { %1208 = vmatpush.bf16.msra.mxu2 %v2337_v58  ;;  %v3462_v58 = vor.u32 %v2543_v45, %v2408_v26  ;;  %v2290_v26 = vld [vmem:[%s4160_s4 + $0x3c] sm:$0xf0]  ;;  %v2296_v45 = vld [vmem:[%s4160_s4 + $0x38] sm:$0xf] }
 0x397   :  { %1000 = vmatpush.bf16.msra.mxu1 %v3033_v5  ;;  %v2324_v5 = vld [vmem:[%s4160_s4 + $0x78] sm:$0xf] }
 0x39b   :  { %1001 = vmatpush.bf16.msra.mxu1 %v3070_v28  ;;  %v2522_v28 = vld [vmem:[%s4160_s4 + $0x80] sm:$0xf0] }
 0x39f   :  { %1002 = vmatpush.bf16.msra.mxu1 %v3089_v39  ;;  %v2325_v39 = vor.u32 %v2522_v28, %v2324_v5  ;;  %v2527_v5 = vld [vmem:[%s4160_s4 + $0xac] sm:$0xf]  ;;  %v2350_v28 = vld [vmem:[%s4160_s4 + $0xb4] sm:$0xf0] }
 0x3a0   :  { %v2353_v25 = vor.u32 %v2527_v5, %v2350_v28  ;;  %v2293_v28 = vor.u32 %v2512_v3, %v2290_v26  ;;  %v2398_v3 = vld [vmem:[%s4161_s5 + $0x54] sm:$0xf0] }
 0x3a1   :  { %1209 = vmatpush.bf16.msra.mxu2 %v2325_v39  ;;  %v2356_v39 = vld [vmem:[%s4160_s4 + $0xb0] sm:$0xf] }
 0x3a2   :  { %1236 = vmatpush.bf16.msrb.mxu3 %v2353_v25 }
 0x3a5   :  { %1210 = vmatpush.bf16.msra.mxu2 %v2313_v30  ;;  %v2357_v30 = vor.u32 %v2529_v27, %v2356_v39  ;;  %v2514_v39 = vld [vmem:[%s4160_s4 + $0x40] sm:$0xf0] }
 0x3a6   :  { %v2297_v27 = vor.u32 %v2514_v39, %v2296_v45  ;;  %v2536_v45 = vld [vmem:[%s4161_s5 + $0x34] sm:$0xf]  ;;  %v2553_v39 = vld [vmem:[%s4161_s5 + $0xb8] sm:$0xf0] }
 0x3a9   :  { %1211 = vmatpush.bf16.msra.mxu2 %v2301_v36 }
 0x3ff   :  { %v848_v31 = vpop.f32.mrf.mxu1 }
 0x400   :  { %v878_v35 = vadd.f32 %v848_v31, %v3179_v52  ;;  %v2289_v52 = vor.u32 %v2513_v9, %v2288_v47  ;;  %v2396_v31 = vld [vmem:[%s4161_s5 + $0x48] sm:$0xf]  ;;  %v2344_v47 = vld [vmem:[%s4160_s4 + $0x98] sm:$0xf]  ;;  %v2526_v9 = vld [vmem:[%s4160_s4 + $0xa0] sm:$0xf0] }
 0x402   :  { %v879_v1 = vmul.f32 0.5, %v878_v35  ;;  %1212 = vmatpush.bf16.msra.mxu2 %v2289_v52  ;;  %v2540_v35 = vld [vmem:[%s4161_s5 + $0x50] sm:$0xf0]  ;;  %v2345_v52 = vor.u32 %v2526_v9, %v2344_v47 }
 0x403   :  { %v3483_v44 = vor.u32 %v2540_v35, %v2396_v31  ;;  %v2278_v31 = vld [vmem:[%s4160_s4 + $0x24] sm:$0xf0]  ;;  %v2284_v35 = vld [vmem:[%s4160_s4 + $0x20] sm:$0xf] }
 0x404   :  { %2589 = vtanh.f32 %v879_v1  ;;  %v2338_v1 = vld [vmem:[%s4160_s4 + $0x9c] sm:$0xf0] }
 0x405   :  { %v861_v49 = vpop.f32.mrf.mxu2  ;;  %v2341_v36 = vor.u32 %v2524_v0, %v2338_v1 }
 0x406   :  { %v883_v24 = vadd.f32 %v861_v49, %v3231_v53  ;;  %v874_v16 = vpop.f32.mrf.mxu3  ;;  %1213 = vmatpush.bf16.msra.mxu2 %v2277_v7  ;;  %v2384_v49 = vld [vmem:[%s4161_s5 + $0x30] sm:$0xf] }
 0x407   :  { %v850_v8 = vpop.f32.mrf.mxu1  ;;  %v888_v53 = vadd.f32 %v3188_v4, %v874_v16  ;;  %1237 = vmatpush.bf16.msrb.mxu3 %v2341_v36  ;;  %v3504_v41 = vor.u32 %v2537_v14, %v2384_v49  ;;  %v2326_v16 = vld [vmem:[%s4160_s4 + $0x84] sm:$0xf0]  ;;  %v2511_v36 = vld [vmem:[%s4160_s4 + $0x28] sm:$0xf0] }
 0x408   :  { %v884_v11 = vmul.f32 0.5, %v883_v24  ;;  %v2521_v24 = vld [vmem:[%s4160_s4 + $0x7c] sm:$0xf]  ;;  %v2332_v8 = vld [vmem:[%s4160_s4 + $0x80] sm:$0xf]  ;;  %v2285_v9 = vor.u32 %v2511_v36, %v2284_v35 }
 0x409   :  { %v2329_v7 = vor.u32 %v2521_v24, %v2326_v16  ;;  %v2506_v24 = vld [vmem:[%s4160_s4 + $0x4] sm:$0xf]  ;;  %v2266_v16 = vld [vmem:[%s4160_s4 + $0xc] sm:$0xf0] }
 0x40a   :  { %v2590_v29 = vpop.eup %2589  ;;  %2591 = vtanh.f32 %v884_v11  ;;  %1214 = vmatpush.bf16.msra.mxu2 %v2265_v6  ;;  %v2523_v11 = vld [vmem:[%s4160_s4 + $0x88] sm:$0xf0]  ;;  %v2518_v6 = vld [vmem:[%s4160_s4 + $0x64] sm:$0xf] }
 0x40b   :  { %v881_v37 = vmul.f32 0.5, %v2590_v29  ;;  %v2333_v17 = vor.u32 %v2523_v11, %v2332_v8  ;;  %1238 = vmatpush.bf16.msrb.mxu3 %v2329_v7  ;;  %v2534_v29 = vld [vmem:[%s4161_s5 + $0x20] sm:$0xf0]  ;;  %v2269_v7 = vor.u32 %v2506_v24, %v2266_v16  ;;  %v2272_v11 = vld [vmem:[%s4160_s4 + $0x8] sm:$0xf] }
 0x40c   :  { %v2530_v35 = vld [vmem:[%s4161_s5 + $0x4] sm:$0xf]  ;;  %v2404_v24 = vld [vmem:[%s4161_s5 + $0x50] sm:$0xf] }
 0x40d   :  { %v882_v15 = vadd.f32 0.5, %v881_v37  ;;  %v863_v54 = vpop.f32.mrf.mxu2  ;;  %v3525_v37 = vor.u32 %v2534_v29, %v2372_v23  ;;  %v2550_v36 = vld [vmem:[%s4161_s5 + $0xa0] sm:$0xf0] }
 0x40e   :  { %v876_v34 = vpop.f32.mrf.mxu3 }
 0x40f   :  { %v889_v48 = vmul.f32 %v888_v53, %v882_v15  ;;  %v2314_v15 = vld [vmem:[%s4160_s4 + $0x6c] sm:$0xf0]  ;;  %v2320_v53 = vld [vmem:[%s4160_s4 + $0x68] sm:$0xf]  ;;  %v2520_v34 = vld [vmem:[%s4160_s4 + $0x70] sm:$0xf0] }
 0x410   :  { %v2592_v10 = vpop.eup %2591  ;;  %v2317_v54 = vor.u32 %v2518_v6, %v2314_v15 }
 0x411   :  { %v890_v60 = vadd.f32 %v889_v48, %v3233_v55  ;;  %v886_v2 = vmul.f32 0.5, %v2592_v10  ;;  %v3421_v55 = vpack.c.bf16 %v3312_v42, %v3279_v38  ;;  %v2432_v38 = vld [vmem:[%s4161_s5 + $0x90] sm:$0xf]  ;;  %v2549_v42 = vld [vmem:[%s4161_s5 + $0x98] sm:$0xf0]  ;;  %v2321_v10 = vor.u32 %v2520_v34, %v2320_v53 }
 0x412   :  { %1239 = vmatpush.bf16.msrb.mxu3 %v2317_v54 }
 0x413   :  { %2593 = vtanh.f32 %v890_v60  ;;  %v887_v40 = vadd.f32 0.5, %v886_v2 }
 0x419   :  { %v2594_v32 = vpop.eup %2593 }
 0x41a   :  { %v892_v43 = vsub.f32 %v3345_v21, %v2594_v32 }
 0x41c   :  { %v893_v50 = vmul.f32 %v892_v43, %v887_v40  ;;  %v2531_v40 = vld [vmem:[%s4161_s5 + $0x8] sm:$0xf0] }
 0x41e   :  { %v3410_v18 = vadd.f32 %v2594_v32, %v893_v50  ;;  %v2360_v32 = vld [vmem:[%s4161_s5] sm:$0xf]  ;;  %v2515_v50 = vld [vmem:[%s4160_s4 + $0x4c] sm:$0xf] }
 0x41f   :  { %v3547_v43 = vor.u32 %v2531_v40, %v2360_v32  ;;  %v2434_v40 = vld [vmem:[%s4161_s5 + $0x9c] sm:$0xf0] }
 0x420   :  { %v903_v19 = vpack.c.bf16 %v3410_v18, %v3410_v18  ;;  %v3426_v46 = vpack.c.bf16 %v3410_v18, %v3345_v21  ;;  %v3444_v21 = vor.u32 %v2549_v42, %v2432_v38  ;;  %v2517_v38 = vld [vmem:[%s4160_s4 + $0x58] sm:$0xf0] }
 0x422   :  { %912 = vmatmul.bf16.vlgmr.msrb.gmra.mxu0 %v903_v19  ;;  %925 = vmatmul.bf16.vlgmr.msrb.gmra.mxu1 %v903_v19 }
 0x423   :  { %938 = vmatmul.bf16.vlgmr.msrb.gmra.mxu2 %v903_v19  ;;  %1485 = vmatpush.bf16.msrb.mxu1 %v3435_v13  ;;  %v2308_v19 = vld [vmem:[%s4160_s4 + $0x50] sm:$0xf] }
 0x424   :  { %1265 = vmatpush.bf16.msrb.mxu0 %v2357_v30  ;;  %v2309_v42 = vor.u32 %v2517_v38, %v2308_v19  ;;  %v2509_v30 = vld [vmem:[%s4160_s4 + $0x1c] sm:$0xf]  ;;  %v2422_v19 = vld [vmem:[%s4161_s5 + $0x84] sm:$0xf0]  ;;  %v2410_v38 = vld [vmem:[%s4161_s5 + $0x6c] sm:$0xf0] }
 0x425   :  { %v2281_v1 = vor.u32 %v2509_v30, %v2278_v31  ;;  %v2374_v30 = vld [vmem:[%s4161_s5 + $0x24] sm:$0xf0] }
 0x427   :  { %1486 = vmatpush.bf16.msrb.mxu1 %v3444_v21 }
 0x428   :  { %1266 = vmatpush.bf16.msrb.mxu0 %v2345_v52 }
 0x42b   :  { %1487 = vmatpush.bf16.msrb.mxu1 %v3453_v12 }
 0x42c   :  { %1267 = vmatpush.bf16.msrb.mxu0 %v2333_v17  ;;  %v2508_v17 = vld [vmem:[%s4160_s4 + $0x10] sm:$0xf0] }
 0x42d   :  { %v2273_v23 = vor.u32 %v2508_v17, %v2272_v11 }
 0x42f   :  { %1488 = vmatpush.bf16.msrb.mxu1 %v3462_v58 }
 0x430   :  { %1268 = vmatpush.bf16.msrb.mxu0 %v2321_v10  ;;  %v2446_v10 = vld [vmem:[%s4161_s5 + $0xb4] sm:$0xf0] }
 0x433   :  { %1215 = vmatmul.bf16.vlgmr.msra.gmra.mxu2 %v3416_v20  ;;  %1489 = vmatpush.bf16.msrb.mxu1 %v3483_v44 }
 0x434   :  { %1269 = vmatpush.bf16.msrb.mxu0 %v2309_v42 }
 0x437   :  { %1490 = vmatpush.bf16.msrb.mxu1 %v3504_v41 }
 0x438   :  { %1270 = vmatpush.bf16.msrb.mxu0 %v2297_v27 }
 0x43b   :  { %1491 = vmatpush.bf16.msrb.mxu1 %v3525_v37 }
 0x43c   :  { %1271 = vmatpush.bf16.msrb.mxu0 %v2285_v9  ;;  %v2547_v9 = vld [vmem:[%s4161_s5 + $0x88] sm:$0xf0] }
 0x43f   :  { %1492 = vmatpush.bf16.msrb.mxu1 %v3547_v43 }
 0x440   :  { %1272 = vmatpush.bf16.msrb.mxu0 %v2273_v23 }
 0x443   :  { %1220 = vmatmul.bf16.gmra.mxu2 %v3421_v55 }
 0x453   :  { %1225 = vmatmul.bf16.gmra.mxu2 %v3426_v46 }
 0x49f   :  { %v913_v48 = vpop.f32.mrf.mxu0  ;;  %v926_v60 = vpop.f32.mrf.mxu1 }
 0x4a0   :  { %v943_v2 = vadd.f32 %v913_v48, %v3181_v57  ;;  %v2302_v57 = vld [vmem:[%s4160_s4 + $0x54] sm:$0xf0]  ;;  %v948_v51 = vadd.f32 %v926_v60, %v3235_v56  ;;  %v2551_v60 = vld [vmem:[%s4161_s5 + $0xac] sm:$0xf] }
 0x4a1   :  { %v2305_v33 = vor.u32 %v2515_v50, %v2302_v57  ;;  %v3612_v32 = vor.u32 %v2551_v60, %v2446_v10  ;;  %v2545_v57 = vld [vmem:[%s4161_s5 + $0x7c] sm:$0xf] }
 0x4a2   :  { %v944_v22 = vmul.f32 0.5, %v943_v2  ;;  %v949_v0 = vmul.f32 0.5, %v948_v51  ;;  %v2539_v51 = vld [vmem:[%s4161_s5 + $0x4c] sm:$0xf] }
 0x4a3   :  { %1240 = vmatpush.bf16.msrb.mxu3 %v2305_v33  ;;  %v2542_v33 = vld [vmem:[%s4161_s5 + $0x64] sm:$0xf]  ;;  %v3655_v26 = vor.u32 %v2539_v51, %v2398_v3  ;;  %v2655_v51 = vld [vmem:[%s4159_s3] ss:$0 sm:$0xff] }
 0x4a4   :  { %2595 = vtanh.f32 %v944_v22  ;;  %v3633_v22 = vor.u32 %v2545_v57, %v2422_v19  ;;  %v3644_v42 = vor.u32 %v2542_v33, %v2410_v38  ;;  %v2368_v57 = vld [vmem:[%s4161_s5 + $0x8] sm:$0xf]  ;;  %v2532_v19 = vld [vmem:[%s4161_s5 + $0x10] sm:$0xf0] }
 0x4a5   :  { %2597 = vtanh.f32 %v949_v0  ;;  %v2362_v0 = vld [vmem:[%s4161_s5 + $0xc] sm:$0xf0]  ;;  %v3795_v38 = vor.u32 %v2532_v19, %v2368_v57  ;;  %v3860_v57 = vld [vmem:[%s4162_s7] ss:$0 sm:$0xff] }
 0x4a6   :  { %v939_v5 = vpop.f32.mrf.mxu2 }
 0x4a7   :  { %v915_v56 = vpop.f32.mrf.mxu0  ;;  %v928_v25 = vpop.f32.mrf.mxu1  ;;  %1241 = vmatpush.bf16.msrb.mxu3 %v2293_v28  ;;  %v953_v14 = vadd.f32 %v3188_v4, %v939_v5  ;;  %v2386_v5 = vld [vmem:[%s4161_s5 + $0x3c] sm:$0xf0]  ;;  %v2452_v28 = vld [vmem:[%s4161_s5 + $0xb0] sm:$0xf] }
 0x4a8   :  { %v4171_v56 = vmov 0   ;;  %v3673_v25 = vor.u32 %v2553_v39, %v2452_v28  ;;  %v3677_v27 = vor.u32 %v2536_v45, %v2386_v5 }
 0x4aa   :  { %v2596_v47 = vpop.eup %2595  ;;  %1511 = vmatpush.bf16.msrb.mxu2 %v3673_v25 }
 0x4ab   :  { %v946_v52 = vmul.f32 0.5, %v2596_v47  ;;  %1242 = vmatpush.bf16.msrb.mxu3 %v2281_v1  ;;  %v2598_v6 = vpop.eup %2597  ;;  %v3700_v1 = vor.u32 %v2530_v35, %v2362_v0 }
 0x4ac   :  { %v951_v15 = vmul.f32 0.5, %v2598_v6 }
 0x4ad   :  { %v947_v49 = vadd.f32 0.5, %v946_v52 }
 0x4ae   :  { %v941_v8 = vpop.f32.mrf.mxu2  ;;  %v952_v54 = vadd.f32 0.5, %v951_v15 }
 0x4af   :  { %v954_v4 = vmul.f32 %v953_v14, %v947_v49  ;;  %1243 = vmatpush.bf16.msrb.mxu3 %v2269_v7  ;;  %v2416_v49 = vld [vmem:[%s4161_s5 + $0x68] sm:$0xf]  ;;  %v2544_v14 = vld [vmem:[%s4161_s5 + $0x70] sm:$0xf0]  ;;  %v2541_v7 = vld [vmem:[%s4161_s5 + $0x58] sm:$0xf0] }
 0x4b0   :  { %v3752_v8 = vor.u32 %v2544_v14, %v2416_v49  ;;  %v3758_v17 = vor.u32 %v2541_v7, %v2404_v24  ;;  %v1071_v7 = vld [vmem:[%s4163_s6] sm:$0x7] }
 0x4b1   :  { %v955_v29 = vadd.f32 %v954_v4, %v3237_v59 }
 0x4b3   :  { %2599 = vtanh.f32 %v955_v29 }
 0x4b9   :  { %v2600_v53 = vpop.eup %2599 }
 0x4ba   :  { %v957_v34 = vsub.f32 %v3410_v18, %v2600_v53  ;;  %v2548_v18 = vld [vmem:[%s4161_s5 + $0x94] sm:$0xf] }
 0x4bb   :  { %v3622_v50 = vor.u32 %v2548_v18, %v2434_v40 }
 0x4bc   :  { %v958_v48 = vmul.f32 %v957_v34, %v952_v54  ;;  %v2392_v54 = vld [vmem:[%s4161_s5 + $0x38] sm:$0xf]  ;;  %v2538_v34 = vld [vmem:[%s4161_s5 + $0x40] sm:$0xf0] }
 0x4be   :  { %v3608_v2 = vadd.f32 %v2600_v53, %v958_v48  ;;  %v3773_v48 = vor.u32 %v2538_v34, %v2392_v54 }
 0x4c0   :  { %v968_v59 = vpack.c.bf16 %v3608_v2, %v3608_v2 }
 0x4c2   :  { %977 = vmatmul.bf16.vlgmr.msra.gmra.mxu3 %v968_v59  ;;  %990 = vmatmul.bf16.vlgmr.msra.gmra.mxu0 %v968_v59 }
 0x4c3   :  { %1003 = vmatmul.bf16.vlgmr.msra.gmra.mxu1 %v968_v59  ;;  %1545 = vmatpush.bf16.msra.mxu3 %v3435_v13 }
 0x4c4   :  { %1498 = vmatpush.bf16.msra.mxu1 %v3612_v32  ;;  %1558 = vmatpush.bf16.msra.mxu0 %v3612_v32 }
 0x4c7   :  { %1546 = vmatpush.bf16.msra.mxu3 %v3444_v21 }
 0x4c8   :  { %1499 = vmatpush.bf16.msra.mxu1 %v3622_v50  ;;  %1559 = vmatpush.bf16.msra.mxu0 %v3622_v50 }
 0x4cb   :  { %1547 = vmatpush.bf16.msra.mxu3 %v3453_v12 }
 0x4cc   :  { %1500 = vmatpush.bf16.msra.mxu1 %v3633_v22  ;;  %1560 = vmatpush.bf16.msra.mxu0 %v3633_v22 }
 0x4cf   :  { %1548 = vmatpush.bf16.msra.mxu3 %v3462_v58 }
 0x4d0   :  { %1501 = vmatpush.bf16.msra.mxu1 %v3644_v42  ;;  %1561 = vmatpush.bf16.msra.mxu0 %v3644_v42 }
 0x4d2   :  { %1244 = vmatmul.bf16.vlgmr.msrb.gmra.mxu3 %v3416_v20  ;;  %1273 = vmatmul.bf16.vlgmr.msrb.gmra.mxu0 %v3416_v20  ;;  %v2533_v20 = vld [vmem:[%s4161_s5 + $0x1c] sm:$0xf] }
 0x4d3   :  { %1493 = vmatmul.bf16.vlgmr.msrb.gmra.mxu1 %v4171_v56  ;;  %1549 = vmatpush.bf16.msra.mxu3 %v3483_v44  ;;  %v3689_v31 = vor.u32 %v2533_v20, %v2374_v30 }
 0x4d4   :  { %1502 = vmatpush.bf16.msra.mxu1 %v3655_v26  ;;  %1562 = vmatpush.bf16.msra.mxu0 %v3655_v26 }
 0x4d7   :  { %1550 = vmatpush.bf16.msra.mxu3 %v3504_v41 }
 0x4d8   :  { %1503 = vmatpush.bf16.msra.mxu1 %v3677_v27  ;;  %1563 = vmatpush.bf16.msra.mxu0 %v3677_v27 }
 0x4db   :  { %1551 = vmatpush.bf16.msra.mxu3 %v3525_v37 }
 0x4dc   :  { %1504 = vmatpush.bf16.msra.mxu1 %v3689_v31  ;;  %1564 = vmatpush.bf16.msra.mxu0 %v3689_v31 }
 0x4df   :  { %1552 = vmatpush.bf16.msra.mxu3 %v3547_v43 }
 0x4e0   :  { %1505 = vmatpush.bf16.msra.mxu1 %v3700_v1  ;;  %1565 = vmatpush.bf16.msra.mxu0 %v3700_v1 }
 0x4e2   :  { %1249 = vmatmul.bf16.gmra.mxu3 %v3421_v55  ;;  %1278 = vmatmul.bf16.gmra.mxu0 %v3421_v55  ;;  %v2440_v55 = vld [vmem:[%s4161_s5 + $0x98] sm:$0xf] }
 0x4e3   :  { %1618 = vmatpush.bf16.msrb.mxu3 %v3612_v32  ;;  %1506 = vmatmul.bf16.vlgmr.msra.gmra.mxu1 %v4171_v56  ;;  %v3727_v47 = vor.u32 %v2550_v36, %v2440_v55 }
 0x4e4   :  { %1571 = vmatpush.bf16.msrb.mxu1 %v3673_v25  ;;  %1631 = vmatpush.bf16.msrb.mxu0 %v3673_v25 }
 0x4e5   :  { %1512 = vmatpush.bf16.msrb.mxu2 %v3727_v47 }
 0x4e7   :  { %1619 = vmatpush.bf16.msrb.mxu3 %v3622_v50 }
 0x4e8   :  { %1572 = vmatpush.bf16.msrb.mxu1 %v3727_v47  ;;  %1632 = vmatpush.bf16.msrb.mxu0 %v3727_v47 }
 0x4eb   :  { %1620 = vmatpush.bf16.msrb.mxu3 %v3633_v22 }
 0x4ef   :  { %1621 = vmatpush.bf16.msrb.mxu3 %v3644_v42 }
 0x4f2   :  { %1254 = vmatmul.bf16.gmra.mxu3 %v3426_v46  ;;  %1283 = vmatmul.bf16.gmra.mxu0 %v3426_v46  ;;  %v2428_v46 = vld [vmem:[%s4161_s5 + $0x80] sm:$0xf] }
 0x4f3   :  { %1622 = vmatpush.bf16.msrb.mxu3 %v3655_v26  ;;  %v3738_v52 = vor.u32 %v2547_v9, %v2428_v46 }
 0x4f5   :  { %1513 = vmatpush.bf16.msrb.mxu2 %v3738_v52  ;;  %1573 = vmatpush.bf16.msrb.mxu1 %v3738_v52 }
 0x4f6   :  { %1633 = vmatpush.bf16.msrb.mxu0 %v3738_v52 }
 0x4f7   :  { %1623 = vmatpush.bf16.msrb.mxu3 %v3677_v27 }
 0x4f9   :  { %1514 = vmatpush.bf16.msrb.mxu2 %v3752_v8  ;;  %1574 = vmatpush.bf16.msrb.mxu1 %v3752_v8 }
 0x4fa   :  { %1634 = vmatpush.bf16.msrb.mxu0 %v3752_v8 }
 0x4fb   :  { %1624 = vmatpush.bf16.msrb.mxu3 %v3689_v31 }
 0x4fd   :  { %1515 = vmatpush.bf16.msrb.mxu2 %v3758_v17  ;;  %1575 = vmatpush.bf16.msrb.mxu1 %v3758_v17 }
 0x4fe   :  { %1635 = vmatpush.bf16.msrb.mxu0 %v3758_v17 }
 0x4ff   :  { %1625 = vmatpush.bf16.msrb.mxu3 %v3700_v1 }
 0x501   :  { %1516 = vmatpush.bf16.msrb.mxu2 %v3773_v48  ;;  %1576 = vmatpush.bf16.msrb.mxu1 %v3773_v48 }
 0x502   :  { %1636 = vmatpush.bf16.msrb.mxu0 %v3773_v48 }
 0x53f   :  { %v991_v16 = vpop.f32.mrf.mxu0 }
 0x540   :  { %v1004_v11 = vpop.f32.mrf.mxu1  ;;  %v1013_v53 = vadd.f32 %v991_v16, %v3239_v61  ;;  %v2535_v61 = vld [vmem:[%s4161_s5 + $0x28] sm:$0xf0] }
 0x541   :  { %v1018_v3 = vadd.f32 %v2655_v51, %v1004_v11  ;;  %v3844_v11 = vperm.slane %v1071_v7, 0 }
 0x542   :  { %v1014_v10 = vmul.f32 0.5, %v1013_v53  ;;  %v3852_v53 = vperm.slane %v1071_v7, 1 }
 0x545   :  { %v978_v4 = vpop.f32.mrf.mxu3 }
 0x546   :  { %v1008_v23 = vadd.f32 %v978_v4, %v3183_v62  ;;  %v2380_v62 = vld [vmem:[%s4161_s5 + $0x20] sm:$0xf] }
 0x547   :  { %v993_v29 = vpop.f32.mrf.mxu0  ;;  %v3783_v59 = vor.u32 %v2535_v61, %v2380_v62 }
 0x548   :  { %v1009_v6 = vmul.f32 0.5, %v1008_v23  ;;  %v1006_v15 = vpop.f32.mrf.mxu1 }
 0x549   :  { %1517 = vmatpush.bf16.msrb.mxu2 %v3783_v59  ;;  %1577 = vmatpush.bf16.msrb.mxu1 %v3783_v59 }
 0x54a   :  { %2601 = vtanh.f32 %v1009_v6  ;;  %1637 = vmatpush.bf16.msrb.mxu0 %v3783_v59 }
 0x54b   :  { %2603 = vtanh.f32 %v1014_v10 }
 0x54d   :  { %v980_v60 = vpop.f32.mrf.mxu3  ;;  %1518 = vmatpush.bf16.msrb.mxu2 %v3795_v38  ;;  %1578 = vmatpush.bf16.msrb.mxu1 %v3795_v38 }
 0x54e   :  { %1638 = vmatpush.bf16.msrb.mxu0 %v3795_v38 }
 0x54f   :  { %v1274_v19 = vpop.f32.mrf.mxu0 }
 0x550   :  { %v2602_v18 = vpop.eup %2601  ;;  %v3786_v40 = vpop.f32.mrf.mxu1 }
 0x551   :  { %v1011_v33 = vmul.f32 0.5, %v2602_v18  ;;  %1605 = vmatpush.bf16.msra.mxu2 %v3435_v13  ;;  %1665 = vmatpush.bf16.msra.mxu1 %v3435_v13  ;;  %v2604_v20 = vpop.eup %2603 }
 0x552   :  { %v1016_v30 = vmul.f32 0.5, %v2604_v20 }
 0x553   :  { %v1012_v45 = vadd.f32 0.5, %v1011_v33 }
 0x554   :  { %v1017_v0 = vadd.f32 0.5, %v1016_v30 }
 0x555   :  { %v1019_v5 = vmul.f32 %v1018_v3, %v1012_v45  ;;  %1606 = vmatpush.bf16.msra.mxu2 %v3444_v21  ;;  %1666 = vmatpush.bf16.msra.mxu1 %v3444_v21  ;;  %v1245_v54 = vpop.f32.mrf.mxu3 }
 0x556   :  { %v1246_v34 = vadd.f32 %v1245_v54, %v3852_v53 }
 0x557   :  { %v1020_v28 = vadd.f32 %v1019_v5, %v3241_v63 }
 0x558   :  { %v1496_v39 = vpop.f32.mrf.mxu1 }
 0x559   :  { %2605 = vtanh.f32 %v1020_v28  ;;  %1607 = vmatpush.bf16.msra.mxu2 %v3453_v12  ;;  %1667 = vmatpush.bf16.msra.mxu1 %v3453_v12 }
 0x55d   :  { %1608 = vmatpush.bf16.msra.mxu2 %v3462_v58  ;;  %1668 = vmatpush.bf16.msra.mxu1 %v3462_v58 }
 0x55f   :  { %v2606_v35 = vpop.eup %2605 }
 0x560   :  { %v1507_v55 = vpop.f32.mrf.mxu1  ;;  %v1022_v63 = vsub.f32 %v3608_v2, %v2606_v35 }
 0x561   :  { %1609 = vmatpush.bf16.msra.mxu2 %v3483_v44  ;;  %1669 = vmatpush.bf16.msra.mxu1 %v3483_v44  ;;  %v1529_v62 = vadd.f32 %v1507_v55, %v1246_v34 }
 0x562   :  { %v1023_v36 = vmul.f32 %v1022_v63, %v1017_v0 }
 0x563   :  { %v1530_v18 = vmul.f32 0.5, %v1529_v62 }
 0x564   :  { %v1024_v46 = vadd.f32 %v2606_v35, %v1023_v36 }
 0x565   :  { %1610 = vmatpush.bf16.msra.mxu2 %v3504_v41  ;;  %1670 = vmatpush.bf16.msra.mxu1 %v3504_v41 }
 0x566   :  { %v1038_v9 = vpack.c.bf16 %v1024_v46, %v3608_v2  ;;  %v1216_v2 = vpop.f32.mrf.mxu2 }
 0x567   :  { %v1217_v23 = vadd.f32 %v1216_v2, %v3844_v11 }
 0x568   :  { %1230 = vmatmul.bf16.gmra.mxu2 %v1038_v9  ;;  %1259 = vmatmul.bf16.gmra.mxu3 %v1038_v9  ;;  %v1509_v49 = vpop.f32.mrf.mxu1 }
 0x569   :  { %1288 = vmatmul.bf16.gmra.mxu0 %v1038_v9  ;;  %1611 = vmatpush.bf16.msra.mxu2 %v3525_v37  ;;  %v1524_v29 = vadd.f32 %v3786_v40, %v1217_v23  ;;  %v3862_v40 = vperm.slane %v1071_v7, 2  ;;  %v1276_v9 = vpop.f32.mrf.mxu0  ;;  %v1247_v49 = vpop.f32.mrf.mxu3 }
 0x56a   :  { %1671 = vmatpush.bf16.msra.mxu1 %v3525_v37 }
 0x56b   :  { %v1525_v6 = vmul.f32 0.5, %v1524_v29  ;;  %v1275_v45 = vadd.f32 %v1274_v19, %v3862_v40 }
 0x56d   :  { %1612 = vmatpush.bf16.msra.mxu2 %v3547_v43  ;;  %2607 = vtanh.f32 %v1525_v6 }
 0x56e   :  { %1672 = vmatpush.bf16.msra.mxu1 %v3547_v43  ;;  %v3833_v14 = vpop.f32.mrf.mxu2  ;;  %2609 = vtanh.f32 %v1530_v18 }
 0x571   :  { %v3894_v2 = vpop.f32.mrf.mxu0  ;;  %v3896_v7 = vpop.f32.mrf.mxu3 }
 0x573   :  { %v2608_v61 = vpop.eup %2607 }
 0x574   :  { %v1527_v10 = vmul.f32 0.5, %v2608_v61  ;;  %v2610_v39 = vpop.eup %2609 }
 0x575   :  { %v1532_v30 = vmul.f32 0.5, %v2610_v39 }
 0x576   :  { %v1528_v51 = vadd.f32 0.5, %v1527_v10 }
 0x577   :  { %v1533_v0 = vadd.f32 0.5, %v1532_v30  ;;  %v1248_v30 = vadd.f32 %v1247_v49, %v3852_v53 }
 0x578   :  { %1519 = vmatmul.bf16.vlgmr.msrb.gmra.mxu2 %v4171_v56  ;;  %v3835_v56 = vpop.f32.mrf.mxu2 }
 0x579   :  { %1678 = vmatpush.bf16.msrb.mxu2 %v3612_v32  ;;  %v3898_v23 = vpop.f32.mrf.mxu0  ;;  %v3900_v29 = vpop.f32.mrf.mxu3 }
 0x57d   :  { %1679 = vmatpush.bf16.msrb.mxu2 %v3622_v50 }
 0x580   :  { %v3837_v24 = vpop.f32.mrf.mxu2 }
 0x581   :  { %1680 = vmatpush.bf16.msrb.mxu2 %v3633_v22  ;;  %v3902_v6 = vpop.f32.mrf.mxu0  ;;  %v3904_v54 = vpop.f32.mrf.mxu3 }
 0x585   :  { %1681 = vmatpush.bf16.msrb.mxu2 %v3644_v42 }
 0x588   :  { %v3839_v16 = vpop.f32.mrf.mxu2 }
 0x589   :  { %1682 = vmatpush.bf16.msrb.mxu2 %v3655_v26  ;;  %v3906_v34 = vpop.f32.mrf.mxu0  ;;  %v3908_v62 = vpop.f32.mrf.mxu3 }
 0x58d   :  { %1683 = vmatpush.bf16.msrb.mxu2 %v3677_v27 }
 0x590   :  { %v3846_v4 = vpop.f32.mrf.mxu2 }
 0x591   :  { %1684 = vmatpush.bf16.msrb.mxu2 %v3689_v31 }
 0x595   :  { %1685 = vmatpush.bf16.msrb.mxu2 %v3700_v1 }
 0x5e6   :  { %v3910_v61 = vpop.f32.mrf.mxu0 }
 0x5e7   :  { %4173 = vst [vmem:[#allocation5_spill] sm:$0xff] %v3910_v61 }
 0x5eb   :  { %v3850_v15 = vpop.f32.mrf.mxu2  ;;  %v3912_v10 = vpop.f32.mrf.mxu3 }
 0x5ee   :  { %v3914_v18 = vpop.f32.mrf.mxu0 }
 0x5ef   :  { %4174 = vst [vmem:[#allocation6_spill] sm:$0xff] %v3914_v18 }
 0x5f3   :  { %v3855_v60 = vpop.f32.mrf.mxu2  ;;  %v3916_v19 = vpop.f32.mrf.mxu3 }
 0x5f4   :  { %4172 = vst [vmem:[#allocation4_spill] sm:$0xff] %v3855_v60  ;;  %v1277_v60 = vadd.f32 %v1276_v9, %v3862_v40 }
 0x5f5   :  { %4175 = vst [vmem:[#allocation7_spill] sm:$0xff] %v3916_v19 }
 0x5fb   :  { %v1520_v33 = vpop.f32.mrf.mxu2 }
 0x5fc   :  { %v1534_v3 = vadd.f32 %v3860_v57, %v1520_v33 }
 0x5fe   :  { %v1535_v5 = vmul.f32 %v1534_v3, %v1528_v51  ;;  %v1219_v3 = vadd.f32 %v3833_v14, %v3844_v11 }
 0x600   :  { %v1536_v28 = vadd.f32 %v1535_v5, %v1275_v45 }
 0x602   :  { %2611 = vtanh.f32 %v1536_v28 }
 0x603   :  { %v1522_v20 = vpop.f32.mrf.mxu2 }
 0x608   :  { %v2612_v35 = vpop.eup %2611 }
 0x609   :  { %v1538_v55 = vsub.f32 0.0, %v2612_v35 }
 0x60b   :  { %v1539_v63 = vmul.f32 %v1538_v55, %v1533_v0 }
 0x60d   :  { %v3866_v36 = vadd.f32 %v2612_v35, %v1539_v63 }
 0x60f   :  { %v1544_v46 = vpack.c.bf16 %v3866_v36, %v3866_v36 }
 0x611   :  { %1553 = vmatmul.bf16.vlgmr.msra.gmra.mxu3 %v1544_v46  ;;  %1566 = vmatmul.bf16.vlgmr.msra.gmra.mxu0 %v1544_v46 }
 0x612   :  { %1579 = vmatmul.bf16.vlgmr.msrb.gmra.mxu1 %v1544_v46  ;;  %1691 = vmatpush.bf16.msra.mxu3 %v3673_v25 }
 0x613   :  { %1725 = vmatpush.bf16.msra.mxu0 %v3435_v13  ;;  %1738 = vmatpush.bf16.msrb.mxu1 %v3612_v32 }
 0x616   :  { %1692 = vmatpush.bf16.msra.mxu3 %v3727_v47 }
 0x617   :  { %1726 = vmatpush.bf16.msra.mxu0 %v3444_v21  ;;  %1739 = vmatpush.bf16.msrb.mxu1 %v3622_v50 }
 0x61a   :  { %1693 = vmatpush.bf16.msra.mxu3 %v3738_v52 }
 0x61b   :  { %1727 = vmatpush.bf16.msra.mxu0 %v3453_v12  ;;  %1740 = vmatpush.bf16.msrb.mxu1 %v3633_v22 }
 0x61e   :  { %1694 = vmatpush.bf16.msra.mxu3 %v3752_v8 }
 0x61f   :  { %1728 = vmatpush.bf16.msra.mxu0 %v3462_v58  ;;  %1741 = vmatpush.bf16.msrb.mxu1 %v3644_v42 }
 0x622   :  { %1695 = vmatpush.bf16.msra.mxu3 %v3758_v17 }
 0x623   :  { %1729 = vmatpush.bf16.msra.mxu0 %v3483_v44  ;;  %1742 = vmatpush.bf16.msrb.mxu1 %v3655_v26 }
 0x626   :  { %1696 = vmatpush.bf16.msra.mxu3 %v3773_v48 }
 0x627   :  { %1730 = vmatpush.bf16.msra.mxu0 %v3504_v41  ;;  %1743 = vmatpush.bf16.msrb.mxu1 %v3677_v27 }
 0x62a   :  { %1697 = vmatpush.bf16.msra.mxu3 %v3783_v59 }
 0x62b   :  { %1731 = vmatpush.bf16.msra.mxu0 %v3525_v37  ;;  %1744 = vmatpush.bf16.msrb.mxu1 %v3689_v31 }
 0x62e   :  { %1698 = vmatpush.bf16.msra.mxu3 %v3795_v38 }
 0x62f   :  { %1732 = vmatpush.bf16.msra.mxu0 %v3547_v43  ;;  %1745 = vmatpush.bf16.msrb.mxu1 %v3700_v1 }
 0x68e   :  { %v1567_v33 = vpop.f32.mrf.mxu0 }
 0x68f   :  { %v1580_v51 = vpop.f32.mrf.mxu1  ;;  %v1589_v35 = vadd.f32 %v1567_v33, %v1248_v30  ;;  %v1251_v30 = vadd.f32 %v3896_v7, %v3852_v53 }
 0x690   :  { %v1594_v18 = vadd.f32 %v3860_v57, %v1580_v51 }
 0x691   :  { %v1590_v55 = vmul.f32 0.5, %v1589_v35 }
 0x694   :  { %v1554_v45 = vpop.f32.mrf.mxu3 }
 0x695   :  { %v1584_v5 = vadd.f32 %v1554_v45, %v1219_v3 }
 0x696   :  { %v1569_v28 = vpop.f32.mrf.mxu0 }
 0x697   :  { %v1585_v39 = vmul.f32 0.5, %v1584_v5  ;;  %v1582_v20 = vpop.f32.mrf.mxu1 }
 0x699   :  { %2613 = vtanh.f32 %v1585_v39 }
 0x69a   :  { %2615 = vtanh.f32 %v1590_v55 }
 0x69c   :  { %v1556_v0 = vpop.f32.mrf.mxu3 }
 0x69f   :  { %v2614_v63 = vpop.eup %2613 }
 0x6a0   :  { %v1587_v46 = vmul.f32 0.5, %v2614_v63  ;;  %v2616_v3 = vpop.eup %2615 }
 0x6a1   :  { %v1592_v45 = vmul.f32 0.5, %v2616_v3 }
 0x6a2   :  { %v1588_v19 = vadd.f32 0.5, %v1587_v46 }
 0x6a3   :  { %v1593_v28 = vadd.f32 0.5, %v1592_v45 }
 0x6a4   :  { %v1595_v14 = vmul.f32 %v1594_v18, %v1588_v19 }
 0x6a6   :  { %v1596_v61 = vadd.f32 %v1595_v14, %v1277_v60 }
 0x6a8   :  { %2617 = vtanh.f32 %v1596_v61 }
 0x6ae   :  { %v2618_v5 = vpop.eup %2617 }
 0x6af   :  { %v1598_v49 = vsub.f32 %v3866_v36, %v2618_v5  ;;  %v1222_v36 = vadd.f32 %v3835_v56, %v3844_v11  ;;  %v1280_v56 = vadd.f32 %v3894_v2, %v3862_v40  ;;  %v1224_v2 = vadd.f32 %v3837_v24, %v3844_v11 }
 0x6b1   :  { %v1599_v33 = vmul.f32 %v1598_v49, %v1593_v28 }
 0x6b3   :  { %v1600_v39 = vadd.f32 %v2618_v5, %v1599_v33 }
 0x6b5   :  { %v1604_v20 = vpack.c.bf16 %v1600_v39, %v1600_v39 }
 0x6b7   :  { %1613 = vmatmul.bf16.vlgmr.msra.gmra.mxu2 %v1604_v20  ;;  %1626 = vmatmul.bf16.vlgmr.msrb.gmra.mxu3 %v1604_v20 }
 0x6b8   :  { %1639 = vmatmul.bf16.vlgmr.msrb.gmra.mxu0 %v1604_v20  ;;  %1751 = vmatpush.bf16.msra.mxu2 %v3673_v25 }
 0x6b9   :  { %1785 = vmatpush.bf16.msrb.mxu3 %v3435_v13  ;;  %1798 = vmatpush.bf16.msrb.mxu0 %v3612_v32 }
 0x6bc   :  { %1752 = vmatpush.bf16.msra.mxu2 %v3727_v47 }
 0x6bd   :  { %1786 = vmatpush.bf16.msrb.mxu3 %v3444_v21  ;;  %1799 = vmatpush.bf16.msrb.mxu0 %v3622_v50 }
 0x6c0   :  { %1753 = vmatpush.bf16.msra.mxu2 %v3738_v52 }
 0x6c1   :  { %1787 = vmatpush.bf16.msrb.mxu3 %v3453_v12  ;;  %1800 = vmatpush.bf16.msrb.mxu0 %v3633_v22 }
 0x6c4   :  { %1754 = vmatpush.bf16.msra.mxu2 %v3752_v8 }
 0x6c5   :  { %1788 = vmatpush.bf16.msrb.mxu3 %v3462_v58  ;;  %1801 = vmatpush.bf16.msrb.mxu0 %v3644_v42 }
 0x6c8   :  { %1755 = vmatpush.bf16.msra.mxu2 %v3758_v17 }
 0x6c9   :  { %1789 = vmatpush.bf16.msrb.mxu3 %v3483_v44  ;;  %1802 = vmatpush.bf16.msrb.mxu0 %v3655_v26 }
 0x6cc   :  { %1756 = vmatpush.bf16.msra.mxu2 %v3773_v48 }
 0x6cd   :  { %1790 = vmatpush.bf16.msrb.mxu3 %v3504_v41  ;;  %1803 = vmatpush.bf16.msrb.mxu0 %v3677_v27 }
 0x6d0   :  { %1757 = vmatpush.bf16.msra.mxu2 %v3783_v59 }
 0x6d1   :  { %1791 = vmatpush.bf16.msrb.mxu3 %v3525_v37  ;;  %1804 = vmatpush.bf16.msrb.mxu0 %v3689_v31 }
 0x6d4   :  { %1758 = vmatpush.bf16.msra.mxu2 %v3795_v38 }
 0x6d5   :  { %1792 = vmatpush.bf16.msrb.mxu3 %v3547_v43  ;;  %1805 = vmatpush.bf16.msrb.mxu0 %v3700_v1 }
 0x735   :  { %v1640_v60 = vpop.f32.mrf.mxu0 }
 0x736   :  { %v1654_v3 = vadd.f32 %v3860_v57, %v1640_v60 }
 0x73a   :  { %v1614_v9 = vpop.f32.mrf.mxu2  ;;  %v1627_v61 = vpop.f32.mrf.mxu3 }
 0x73b   :  { %v1644_v18 = vadd.f32 %v1614_v9, %v1222_v36  ;;  %v1649_v35 = vadd.f32 %v1627_v61, %v1251_v30 }
 0x73d   :  { %v1645_v19 = vmul.f32 0.5, %v1644_v18  ;;  %v1642_v51 = vpop.f32.mrf.mxu0  ;;  %v1650_v63 = vmul.f32 0.5, %v1649_v35 }
 0x73e   :  { %v1253_v51 = vadd.f32 %v3900_v29, %v3852_v53 }
 0x73f   :  { %2619 = vtanh.f32 %v1645_v19 }
 0x740   :  { %2621 = vtanh.f32 %v1650_v63 }
 0x742   :  { %v1616_v0 = vpop.f32.mrf.mxu2  ;;  %v1629_v55 = vpop.f32.mrf.mxu3 }
 0x745   :  { %v2620_v46 = vpop.eup %2619 }
 0x746   :  { %v1647_v14 = vmul.f32 0.5, %v2620_v46  ;;  %v2622_v49 = vpop.eup %2621 }
 0x747   :  { %v1652_v33 = vmul.f32 0.5, %v2622_v49 }
 0x748   :  { %v1648_v45 = vadd.f32 0.5, %v1647_v14 }
 0x749   :  { %v1653_v20 = vadd.f32 0.5, %v1652_v33 }
 0x74a   :  { %v1655_v5 = vmul.f32 %v1654_v3, %v1648_v45 }
 0x74c   :  { %v1656_v28 = vadd.f32 %v1655_v5, %v1280_v56  ;;  %v1282_v5 = vadd.f32 %v3898_v23, %v3862_v40 }
 0x74e   :  { %2623 = vtanh.f32 %v1656_v28 }
 0x754   :  { %v2624_v7 = vpop.eup %2623 }
 0x755   :  { %v1658_v36 = vsub.f32 %v1600_v39, %v2624_v7 }
 0x757   :  { %v1659_v9 = vmul.f32 %v1658_v36, %v1653_v20 }
 0x759   :  { %v1660_v61 = vadd.f32 %v2624_v7, %v1659_v9 }
 0x75b   :  { %v1664_v18 = vpack.c.bf16 %v1660_v61, %v1660_v61 }
 0x75d   :  { %1673 = vmatmul.bf16.vlgmr.msra.gmra.mxu1 %v1664_v18  ;;  %1686 = vmatmul.bf16.vlgmr.msrb.gmra.mxu2 %v1664_v18 }
 0x75e   :  { %1699 = vmatmul.bf16.vlgmr.msra.gmra.mxu3 %v1664_v18  ;;  %1811 = vmatpush.bf16.msra.mxu1 %v3673_v25 }
 0x75f   :  { %1845 = vmatpush.bf16.msrb.mxu2 %v3435_v13  ;;  %1858 = vmatpush.bf16.msra.mxu3 %v3612_v32 }
 0x762   :  { %1812 = vmatpush.bf16.msra.mxu1 %v3727_v47 }
 0x763   :  { %1846 = vmatpush.bf16.msrb.mxu2 %v3444_v21  ;;  %1859 = vmatpush.bf16.msra.mxu3 %v3622_v50 }
 0x766   :  { %1813 = vmatpush.bf16.msra.mxu1 %v3738_v52 }
 0x767   :  { %1847 = vmatpush.bf16.msrb.mxu2 %v3453_v12  ;;  %1860 = vmatpush.bf16.msra.mxu3 %v3633_v22 }
 0x76a   :  { %1814 = vmatpush.bf16.msra.mxu1 %v3752_v8 }
 0x76b   :  { %1848 = vmatpush.bf16.msrb.mxu2 %v3462_v58  ;;  %1861 = vmatpush.bf16.msra.mxu3 %v3644_v42 }
 0x76e   :  { %1815 = vmatpush.bf16.msra.mxu1 %v3758_v17 }
 0x76f   :  { %1849 = vmatpush.bf16.msrb.mxu2 %v3483_v44  ;;  %1862 = vmatpush.bf16.msra.mxu3 %v3655_v26 }
 0x772   :  { %1816 = vmatpush.bf16.msra.mxu1 %v3773_v48 }
 0x773   :  { %1850 = vmatpush.bf16.msrb.mxu2 %v3504_v41  ;;  %1863 = vmatpush.bf16.msra.mxu3 %v3677_v27 }
 0x776   :  { %1817 = vmatpush.bf16.msra.mxu1 %v3783_v59 }
 0x777   :  { %1851 = vmatpush.bf16.msrb.mxu2 %v3525_v37  ;;  %1864 = vmatpush.bf16.msra.mxu3 %v3689_v31 }
 0x77a   :  { %1818 = vmatpush.bf16.msra.mxu1 %v3795_v38 }
 0x77b   :  { %1852 = vmatpush.bf16.msrb.mxu2 %v3547_v43  ;;  %1865 = vmatpush.bf16.msra.mxu3 %v3700_v1 }
 0x7da   :  { %v1674_v39 = vpop.f32.mrf.mxu1 }
 0x7db   :  { %v1704_v60 = vadd.f32 %v1674_v39, %v1224_v2 }
 0x7dd   :  { %v1705_v19 = vmul.f32 0.5, %v1704_v60 }
 0x7df   :  { %2625 = vtanh.f32 %v1705_v19 }
 0x7e0   :  { %v1687_v30 = vpop.f32.mrf.mxu2 }
 0x7e1   :  { %v1709_v35 = vadd.f32 %v1687_v30, %v1253_v51  ;;  %v1700_v0 = vpop.f32.mrf.mxu3 }
 0x7e2   :  { %v1676_v55 = vpop.f32.mrf.mxu1  ;;  %v1714_v45 = vadd.f32 %v3860_v57, %v1700_v0 }
 0x7e3   :  { %v1710_v63 = vmul.f32 0.5, %v1709_v35 }
 0x7e5   :  { %v2626_v46 = vpop.eup %2625  ;;  %2627 = vtanh.f32 %v1710_v63  ;;  %v1229_v63 = vadd.f32 %v3846_v4, %v3844_v11  ;;  %v1287_v4 = vadd.f32 %v3906_v34, %v3862_v40 }
 0x7e6   :  { %v1707_v14 = vmul.f32 0.5, %v2626_v46 }
 0x7e8   :  { %v1708_v3 = vadd.f32 0.5, %v1707_v14  ;;  %v1689_v56 = vpop.f32.mrf.mxu2 }
 0x7e9   :  { %v1702_v24 = vpop.f32.mrf.mxu3 }
 0x7ea   :  { %v1715_v28 = vmul.f32 %v1714_v45, %v1708_v3 }
 0x7eb   :  { %v2628_v29 = vpop.eup %2627 }
 0x7ec   :  { %v1716_v49 = vadd.f32 %v1715_v28, %v1282_v5  ;;  %v1712_v33 = vmul.f32 0.5, %v2628_v29 }
 0x7ee   :  { %2629 = vtanh.f32 %v1716_v49  ;;  %v1713_v20 = vadd.f32 0.5, %v1712_v33 }
 0x7f4   :  { %v2630_v7 = vpop.eup %2629 }
 0x7f5   :  { %v1718_v36 = vsub.f32 %v1660_v61, %v2630_v7 }
 0x7f7   :  { %v1719_v9 = vmul.f32 %v1718_v36, %v1713_v20 }
 0x7f9   :  { %v1720_v18 = vadd.f32 %v2630_v7, %v1719_v9 }
 0x7fb   :  { %v1724_v2 = vpack.c.bf16 %v1720_v18, %v1720_v18 }
 0x7fd   :  { %1733 = vmatmul.bf16.vlgmr.msra.gmra.mxu0 %v1724_v2  ;;  %1746 = vmatmul.bf16.vlgmr.msrb.gmra.mxu1 %v1724_v2 }
 0x7fe   :  { %1759 = vmatmul.bf16.vlgmr.msra.gmra.mxu2 %v1724_v2  ;;  %1871 = vmatpush.bf16.msra.mxu0 %v3673_v25 }
 0x7ff   :  { %1905 = vmatpush.bf16.msrb.mxu1 %v3435_v13  ;;  %1918 = vmatpush.bf16.msra.mxu2 %v3612_v32  ;;  %v1227_v13 = vadd.f32 %v3839_v16, %v3844_v11  ;;  %v1285_v16 = vadd.f32 %v3902_v6, %v3862_v40 }
 0x802   :  { %1872 = vmatpush.bf16.msra.mxu0 %v3727_v47 }
 0x803   :  { %1906 = vmatpush.bf16.msrb.mxu1 %v3444_v21  ;;  %1919 = vmatpush.bf16.msra.mxu2 %v3622_v50 }
 0x806   :  { %1873 = vmatpush.bf16.msra.mxu0 %v3738_v52 }
 0x807   :  { %1907 = vmatpush.bf16.msrb.mxu1 %v3453_v12  ;;  %1920 = vmatpush.bf16.msra.mxu2 %v3633_v22 }
 0x80a   :  { %1874 = vmatpush.bf16.msra.mxu0 %v3752_v8 }
 0x80b   :  { %1908 = vmatpush.bf16.msrb.mxu1 %v3462_v58  ;;  %1921 = vmatpush.bf16.msra.mxu2 %v3644_v42 }
 0x80e   :  { %1875 = vmatpush.bf16.msra.mxu0 %v3758_v17 }
 0x80f   :  { %1909 = vmatpush.bf16.msrb.mxu1 %v3483_v44  ;;  %1922 = vmatpush.bf16.msra.mxu2 %v3655_v26 }
 0x812   :  { %1876 = vmatpush.bf16.msra.mxu0 %v3773_v48 }
 0x813   :  { %1910 = vmatpush.bf16.msrb.mxu1 %v3504_v41  ;;  %1923 = vmatpush.bf16.msra.mxu2 %v3677_v27  ;;  %v1256_v41 = vadd.f32 %v3904_v54, %v3852_v53 }
 0x816   :  { %1877 = vmatpush.bf16.msra.mxu0 %v3783_v59 }
 0x817   :  { %1911 = vmatpush.bf16.msrb.mxu1 %v3525_v37  ;;  %1924 = vmatpush.bf16.msra.mxu2 %v3689_v31 }
 0x81a   :  { %1878 = vmatpush.bf16.msra.mxu0 %v3795_v38 }
 0x81b   :  { %1912 = vmatpush.bf16.msrb.mxu1 %v3547_v43  ;;  %1925 = vmatpush.bf16.msra.mxu2 %v3700_v1 }
 0x87a   :  { %v1734_v21 = vpop.f32.mrf.mxu0  ;;  %v1747_v12 = vpop.f32.mrf.mxu1 }
 0x87b   :  { %v1764_v58 = vadd.f32 %v1734_v21, %v1227_v13  ;;  %v1769_v37 = vadd.f32 %v1747_v12, %v1256_v41 }
 0x87d   :  { %v1765_v44 = vmul.f32 0.5, %v1764_v58  ;;  %v1770_v42 = vmul.f32 0.5, %v1769_v37  ;;  %v1261_v58 = vadd.f32 %v3912_v10, %v3852_v53 }
 0x87f   :  { %2631 = vtanh.f32 %v1765_v44 }
 0x880   :  { %2633 = vtanh.f32 %v1770_v42 }
 0x881   :  { %v1760_v32 = vpop.f32.mrf.mxu2 }
 0x882   :  { %v1736_v50 = vpop.f32.mrf.mxu0  ;;  %v1749_v22 = vpop.f32.mrf.mxu1  ;;  %v1774_v31 = vadd.f32 %v3860_v57, %v1760_v32 }
 0x885   :  { %v2632_v26 = vpop.eup %2631 }
 0x886   :  { %v1767_v43 = vmul.f32 0.5, %v2632_v26  ;;  %v2634_v39 = vpop.eup %2633 }
 0x887   :  { %v1772_v54 = vmul.f32 0.5, %v2634_v39 }
 0x888   :  { %v1768_v27 = vadd.f32 0.5, %v1767_v43 }
 0x889   :  { %v1762_v1 = vpop.f32.mrf.mxu2  ;;  %v1773_v19 = vadd.f32 0.5, %v1772_v54 }
 0x88a   :  { %v1775_v23 = vmul.f32 %v1774_v31, %v1768_v27 }
 0x88c   :  { %v1776_v61 = vadd.f32 %v1775_v23, %v1285_v16 }
 0x88e   :  { %2635 = vtanh.f32 %v1776_v61 }
 0x894   :  { %v2636_v60 = vpop.eup %2635 }
 0x895   :  { %v1778_v51 = vsub.f32 %v1720_v18, %v2636_v60  ;;  %v1232_v18 = vadd.f32 %v3850_v15, %v3844_v11  ;;  %v4176_v15 = vld [vmem:[#allocation5_spill] sm:$0xff] }
 0x896   :  { %v1290_v43 = vadd.f32 %v4176_v15, %v3862_v40  ;;  %v2005_v15 = vld [vmem:[%s4166_s10 + $0x18] sm:$0xff] }
 0x897   :  { %v1779_v30 = vmul.f32 %v1778_v51, %v1773_v19  ;;  %v1976_v19 = vld [vmem:[%s4165_s8 + $0x78] sm:$0xff]  ;;  %v1975_v51 = vld [vmem:[%s4165_s8 + $0x70] sm:$0xff] }
 0x899   :  { %v1780_v35 = vadd.f32 %v2636_v60, %v1779_v30  ;;  %v1974_v30 = vld [vmem:[%s4165_s8 + $0x68] sm:$0xff] }
 0x89b   :  { %v1784_v0 = vpack.c.bf16 %v1780_v35, %v1780_v35 }
 0x89d   :  { %1793 = vmatmul.bf16.vlgmr.msrb.gmra.mxu3 %v1784_v0  ;;  %1806 = vmatmul.bf16.vlgmr.msrb.gmra.mxu0 %v1784_v0 }
 0x89e   :  { %1819 = vmatmul.bf16.vlgmr.msra.gmra.mxu1 %v1784_v0  ;;  %1931 = vmatpush.bf16.msrb.mxu3 %v3673_v25  ;;  %v1972_v0 = vld [vmem:[%s4165_s8 + $0x58] sm:$0xff] }
 0x89f   :  { %1981 = vmatpush.msrb.mxu0 %v1976_v19 }
 0x8a1   :  { %1982 = vmatpush.msrb.mxu0 %v1975_v51  ;;  %v2558_v51 = vld [vmem:[%s4167_s11] ss:$0 sm:$0xff] }
 0x8a2   :  { %1932 = vmatpush.bf16.msrb.mxu3 %v3727_v47 }
 0x8a3   :  { %1983 = vmatpush.msrb.mxu0 %v1974_v30 }
 0x8a6   :  { %1933 = vmatpush.bf16.msrb.mxu3 %v3738_v52 }
 0x8aa   :  { %1934 = vmatpush.bf16.msrb.mxu3 %v3752_v8  ;;  %v1258_v8 = vadd.f32 %v3908_v62, %v3852_v53 }
 0x8ae   :  { %1935 = vmatpush.bf16.msrb.mxu3 %v3758_v17 }
 0x8b2   :  { %1936 = vmatpush.bf16.msrb.mxu3 %v3773_v48 }
 0x8b6   :  { %1937 = vmatpush.bf16.msrb.mxu3 %v3783_v59 }
 0x8ba   :  { %1938 = vmatpush.bf16.msrb.mxu3 %v3795_v38 }
 0x91a   :  { %v1807_v6 = vpop.f32.mrf.mxu0 }
 0x91b   :  { %v1820_v55 = vpop.f32.mrf.mxu1  ;;  %v1829_v17 = vadd.f32 %v1807_v6, %v1258_v8  ;;  %v1971_v6 = vld [vmem:[%s4165_s8 + $0x50] sm:$0xff] }
 0x91c   :  { %v1834_v38 = vadd.f32 %v3860_v57, %v1820_v55  ;;  %v1970_v55 = vld [vmem:[%s4165_s8 + $0x48] sm:$0xff]  ;;  %v1963_v8 = vld [vmem:[%s4165_s8 + $0x10] sm:$0xff] }
 0x91d   :  { %v1830_v3 = vmul.f32 0.5, %v1829_v17  ;;  %v1962_v17 = vld [vmem:[%s4165_s8 + $0x8] sm:$0xff] }
 0x920   :  { %v1794_v25 = vpop.f32.mrf.mxu3 }
 0x921   :  { %v1824_v46 = vadd.f32 %v1794_v25, %v1229_v63  ;;  %v1969_v63 = vld [vmem:[%s4165_s8 + $0x40] sm:$0xff]  ;;  %v1968_v25 = vld [vmem:[%s4165_s8 + $0x38] sm:$0xff] }
 0x922   :  { %v1809_v47 = vpop.f32.mrf.mxu0 }
 0x923   :  { %v1825_v14 = vmul.f32 0.5, %v1824_v46  ;;  %v1822_v52 = vpop.f32.mrf.mxu1  ;;  %v1967_v46 = vld [vmem:[%s4165_s8 + $0x30] sm:$0xff]  ;;  %v1966_v47 = vld [vmem:[%s4165_s8 + $0x28] sm:$0xff] }
 0x924   :  { %v1964_v52 = vld [vmem:[%s4165_s8 + $0x18] sm:$0xff] }
 0x925   :  { %2637 = vtanh.f32 %v1825_v14  ;;  %v1965_v14 = vld [vmem:[%s4165_s8 + $0x20] sm:$0xff] }
 0x926   :  { %2639 = vtanh.f32 %v1830_v3  ;;  %v4177_v3 = vld [vmem:[#allocation4_spill] sm:$0xff] }
 0x928   :  { %v1796_v48 = vpop.f32.mrf.mxu3 }
 0x929   :  { %v1961_v48 = vld [vmem:[%s4165_s8] sm:$0xff] }
 0x92b   :  { %v2638_v59 = vpop.eup %2637 }
 0x92c   :  { %v1827_v45 = vmul.f32 0.5, %v2638_v59  ;;  %v2640_v28 = vpop.eup %2639  ;;  %v1234_v59 = vadd.f32 %v4177_v3, %v3844_v11  ;;  %v4178_v11 = vld [vmem:[#allocation7_spill] sm:$0xff] }
 0x92d   :  { %v1832_v49 = vmul.f32 0.5, %v2640_v28  ;;  %v1263_v28 = vadd.f32 %v4178_v11, %v3852_v53 }
 0x92e   :  { %v1828_v56 = vadd.f32 0.5, %v1827_v45 }
 0x92f   :  { %v1833_v62 = vadd.f32 0.5, %v1832_v49  ;;  %v2014_v49 = vld [vmem:[%s4166_s10 + $0x60] sm:$0xff] }
 0x930   :  { %v1835_v24 = vmul.f32 %v1834_v38, %v1828_v56  ;;  %v2017_v56 = vld [vmem:[%s4166_s10 + $0x78] sm:$0xff] }
 0x931   :  { %2022 = vmatpush.msra.mxu1 %v2017_v56 }
 0x932   :  { %v1836_v5 = vadd.f32 %v1835_v24, %v1287_v4  ;;  %v2016_v4 = vld [vmem:[%s4166_s10 + $0x70] sm:$0xff] }
 0x933   :  { %2023 = vmatpush.msra.mxu1 %v2016_v4 }
 0x934   :  { %2641 = vtanh.f32 %v1836_v5  ;;  %v2015_v5 = vld [vmem:[%s4166_s10 + $0x68] sm:$0xff] }
 0x935   :  { %2024 = vmatpush.msra.mxu1 %v2015_v5 }
 0x937   :  { %2025 = vmatpush.msra.mxu1 %v2014_v49 }
 0x93a   :  { %v2642_v29 = vpop.eup %2641 }
 0x93b   :  { %v1838_v33 = vsub.f32 %v1780_v35, %v2642_v29  ;;  %v1973_v35 = vld [vmem:[%s4165_s8 + $0x60] sm:$0xff] }
 0x93c   :  { %1984 = vmatpush.msrb.mxu0 %v1973_v35 }
 0x93d   :  { %v1839_v7 = vmul.f32 %v1838_v33, %v1833_v62 }
 0x93e   :  { %1985 = vmatpush.msrb.mxu0 %v1972_v0 }
 0x93f   :  { %v1840_v20 = vadd.f32 %v2642_v29, %v1839_v7  ;;  %v2013_v7 = vld [vmem:[%s4166_s10 + $0x58] sm:$0xff] }
 0x940   :  { %1986 = vmatpush.msrb.mxu0 %v1971_v6  ;;  %2026 = vmatpush.msra.mxu1 %v2013_v7 }
 0x941   :  { %v1844_v36 = vpack.c.bf16 %v1840_v20, %v1840_v20 }
 0x942   :  { %1987 = vmatpush.msrb.mxu0 %v1970_v55 }
 0x943   :  { %1853 = vmatmul.bf16.vlgmr.msrb.gmra.mxu2 %v1844_v36  ;;  %1866 = vmatmul.bf16.vlgmr.msra.gmra.mxu3 %v1844_v36 }
 0x944   :  { %1879 = vmatmul.bf16.vlgmr.msra.gmra.mxu0 %v1844_v36  ;;  %v2012_v36 = vld [vmem:[%s4166_s10 + $0x50] sm:$0xff] }
 0x945   :  { %1988 = vmatpush.msrb.mxu0 %v1969_v63  ;;  %2027 = vmatpush.msra.mxu1 %v2012_v36 }
 0x947   :  { %1989 = vmatpush.msrb.mxu0 %v1968_v25 }
 0x949   :  { %1990 = vmatpush.msrb.mxu0 %v1967_v46 }
 0x94b   :  { %1991 = vmatpush.msrb.mxu0 %v1966_v47 }
 0x94d   :  { %1992 = vmatpush.msrb.mxu0 %v1965_v14 }
 0x94f   :  { %1993 = vmatpush.msrb.mxu0 %v1964_v52 }
 0x951   :  { %1994 = vmatpush.msrb.mxu0 %v1963_v8 }
 0x953   :  { %1995 = vmatpush.msrb.mxu0 %v1962_v17 }
 0x955   :  { %1996 = vmatpush.msrb.mxu0 %v1961_v48 }
 0x9c1   :  { %v1880_v9 = vpop.f32.mrf.mxu0 }
 0x9c2   :  { %v1894_v42 = vadd.f32 %v3860_v57, %v1880_v9 }
 0x9c6   :  { %v1854_v2 = vpop.f32.mrf.mxu2  ;;  %v1867_v34 = vpop.f32.mrf.mxu3 }
 0x9c7   :  { %v1884_v13 = vadd.f32 %v1854_v2, %v1232_v18  ;;  %v1889_v44 = vadd.f32 %v1867_v34, %v1261_v58  ;;  %v2011_v18 = vld [vmem:[%s4166_s10 + $0x48] sm:$0xff]  ;;  %v2010_v34 = vld [vmem:[%s4166_s10 + $0x40] sm:$0xff] }
 0x9c8   :  { %2028 = vmatpush.msra.mxu1 %v2011_v18 }
 0x9c9   :  { %v1885_v21 = vmul.f32 0.5, %v1884_v13  ;;  %v1882_v12 = vpop.f32.mrf.mxu0  ;;  %v1890_v32 = vmul.f32 0.5, %v1889_v44  ;;  %v2009_v44 = vld [vmem:[%s4166_s10 + $0x38] sm:$0xff] }
 0x9ca   :  { %2029 = vmatpush.msra.mxu1 %v2010_v34 }
 0x9cb   :  { %2643 = vtanh.f32 %v1885_v21 }
 0x9cc   :  { %2645 = vtanh.f32 %v1890_v32  ;;  %2030 = vmatpush.msra.mxu1 %v2009_v44 }
 0x9ce   :  { %v1856_v41 = vpop.f32.mrf.mxu2  ;;  %v1869_v37 = vpop.f32.mrf.mxu3 }
 0x9cf   :  { %v4179_v41 = vld [vmem:[#allocation6_spill] sm:$0xff] }
 0x9d0   :  { %v1292_v37 = vadd.f32 %v4179_v41, %v3862_v40 }
 0x9d1   :  { %v2644_v50 = vpop.eup %2643 }
 0x9d2   :  { %v1887_v22 = vmul.f32 0.5, %v2644_v50  ;;  %v2646_v1 = vpop.eup %2645  ;;  %v2008_v50 = vld [vmem:[%s4166_s10 + $0x30] sm:$0xff] }
 0x9d3   :  { %v1892_v16 = vmul.f32 0.5, %v2646_v1  ;;  %2031 = vmatpush.msra.mxu1 %v2008_v50 }
 0x9d4   :  { %v1888_v26 = vadd.f32 0.5, %v1887_v22 }
 0x9d5   :  { %v1893_v23 = vadd.f32 0.5, %v1892_v16 }
 0x9d6   :  { %v1895_v27 = vmul.f32 %v1894_v42, %v1888_v26  ;;  %v2006_v26 = vld [vmem:[%s4166_s10 + $0x20] sm:$0xff] }
 0x9d8   :  { %v1896_v31 = vadd.f32 %v1895_v27, %v1290_v43 }
 0x9da   :  { %2647 = vtanh.f32 %v1896_v31 }
 0x9e0   :  { %v2648_v10 = vpop.eup %2647 }
 0x9e1   :  { %v1898_v61 = vsub.f32 %v1840_v20, %v2648_v10 }
 0x9e3   :  { %v1899_v39 = vmul.f32 %v1898_v61, %v1893_v23  ;;  %v2003_v23 = vld [vmem:[%s4166_s10 + $0x8] sm:$0xff]  ;;  %v2002_v61 = vld [vmem:[%s4166_s10] sm:$0xff] }
 0x9e5   :  { %v4039_v54 = vadd.f32 %v2648_v10, %v1899_v39  ;;  %v2004_v10 = vld [vmem:[%s4166_s10 + $0x10] sm:$0xff]  ;;  %v2557_v39 = vld [vmem:[%s4164_s9] ss:$0 sm:$0xff] }
 0x9e7   :  { %v1904_v60 = vpack.c.bf16 %v4039_v54, %v4039_v54 }
 0x9e9   :  { %1913 = vmatmul.bf16.vlgmr.msrb.gmra.mxu1 %v1904_v60  ;;  %1926 = vmatmul.bf16.vlgmr.msra.gmra.mxu2 %v1904_v60 }
 0x9ea   :  { %1939 = vmatmul.bf16.vlgmr.msrb.gmra.mxu3 %v1904_v60 }
 0xa66   :  { %v1914_v45 = vpop.f32.mrf.mxu1 }
 0xa67   :  { %v1944_v38 = vadd.f32 %v1914_v45, %v1234_v59 }
 0xa69   :  { %v1945_v24 = vmul.f32 0.5, %v1944_v38 }
 0xa6b   :  { %2649 = vtanh.f32 %v1945_v24 }
 0xa6c   :  { %v1927_v29 = vpop.f32.mrf.mxu2 }
 0xa6d   :  { %v1949_v62 = vadd.f32 %v1927_v29, %v1263_v28  ;;  %v1940_v33 = vpop.f32.mrf.mxu3 }
 0xa6e   :  { %v1916_v20 = vpop.f32.mrf.mxu1  ;;  %v1954_v21 = vadd.f32 %v3860_v57, %v1940_v33  ;;  %v2007_v57 = vld [vmem:[%s4166_s10 + $0x28] sm:$0xff] }
 0xa6f   :  { %v1950_v53 = vmul.f32 0.5, %v1949_v62  ;;  %2032 = vmatpush.msra.mxu1 %v2007_v57 }
 0xa71   :  { %v2650_v9 = vpop.eup %2649  ;;  %2651 = vtanh.f32 %v1950_v53  ;;  %2033 = vmatpush.msra.mxu1 %v2006_v26 }
 0xa72   :  { %v1947_v2 = vmul.f32 0.5, %v2650_v9 }
 0xa73   :  { %2034 = vmatpush.msra.mxu1 %v2005_v15 }
 0xa74   :  { %v1948_v13 = vadd.f32 0.5, %v1947_v2  ;;  %v1929_v12 = vpop.f32.mrf.mxu2 }
 0xa75   :  { %v1942_v58 = vpop.f32.mrf.mxu3  ;;  %2035 = vmatpush.msra.mxu1 %v2004_v10 }
 0xa76   :  { %v1955_v32 = vmul.f32 %v1954_v21, %v1948_v13 }
 0xa77   :  { %v2652_v42 = vpop.eup %2651  ;;  %2036 = vmatpush.msra.mxu1 %v2003_v23 }
 0xa78   :  { %v1956_v22 = vadd.f32 %v1955_v32, %v1292_v37  ;;  %v1952_v40 = vmul.f32 0.5, %v2652_v42 }
 0xa79   :  { %2037 = vmatpush.msra.mxu1 %v2002_v61 }
 0xa7a   :  { %2653 = vtanh.f32 %v1956_v22  ;;  %v1953_v27 = vadd.f32 0.5, %v1952_v40 }
 0xa80   :  { %v2654_v43 = vpop.eup %2653 }
 0xa81   :  { %v1958_v31 = vsub.f32 %v4039_v54, %v2654_v43 }
 0xa83   :  { %v1959_v1 = vmul.f32 %v1958_v31, %v1953_v27 }
 0xa85   :  { %v1960_v16 = vadd.f32 %v2654_v43, %v1959_v1 }
 0xa87   :  { %1997 = vmatmul.f32.vlgmr.msrb.gmra.mxu0 %v1960_v16 }
 0xb04   :  { %v1998_v54 = vpop.f32.mrf.mxu0 }
 0xb05   :  { %v1999_v60 = vadd.f32 %v2557_v39, %v1998_v54 }
 0xb07   :  { %v2001_v19 = vmax.f32 %v1999_v60, 0.0 }
 0xb09   :  { %2038 = vmatmul.f32.vlgmr.msra.gmra.mxu1 %v2001_v19 }
 0xb86   :  { %v2039_v30 = vpop.f32.mrf.mxu1 }
 0xb87   :  { %v2040_v35 = vadd.f32 %v2558_v51, %v2039_v30 }
 0xb89   :  { %2042 = vst [vmem:[%s4168_s12] sm:$0xff] %v2040_v35 }

</bundles_post_ra>
